<compile_context>
chip_gen: v7x
topology: tpu7x:2x2x1
jax: 0.10.0
libtpu: 0.0.40
codegen_flags: <defaults>
</compile_context>

<pallas_src>
import functools

import jax
import jax.numpy as jnp
from jax.experimental import pallas as pl
from jax.experimental.pallas import tpu as pltpu


# ----------------------------- kernel -----------------------------

def _layernorm(x, g, b, eps=1e-6):
    # PyTorch LayerNorm (biased variance), eps=1e-6.
    mu = jnp.mean(x, axis=-1, keepdims=True)
    var = jnp.mean((x - mu) ** 2, axis=-1, keepdims=True)
    return (x - mu) * jax.lax.rsqrt(var + eps) * g + b


def block_kernel(x_ref, ln1_g_ref, ln1_b_ref,
                 wqkv_ref, wproj_ref, bproj_ref,
                 ln2_g_ref, ln2_b_ref, w1_ref, b1_ref, w2_ref, b2_ref,
                 o_ref, *, num_heads):
    f32 = jnp.float32
    cd = wqkv_ref.dtype                      # MXU operand dtype (f32 or bf16)
    BT, N, D = x_ref.shape
    H = num_heads
    hd = D // H
    M = BT * N

    x = x_ref[...].reshape(M, D).astype(f32)             # [M, D] residual stream

    # ---------------- attention branch: attn(norm1(x)) ----------------
    xn = _layernorm(x, ln1_g_ref[...].astype(f32), ln1_b_ref[...].astype(f32))

    # Fused, lane-dense QKV projection (qkv_bias=False; scale folded into the
    # q columns on the host, so no score rescale below).
    qkv = jnp.dot(xn.astype(cd), wqkv_ref[...], preferred_element_type=f32)  # [M, 3D]

    def split_heads(col0):
        # [M, D]-wide column band -> [BT*H, N, hd], batch-major then head.
        parts = [qkv[b * N:(b + 1) * N, col0 + h * hd: col0 + (h + 1) * hd]
                 for b in range(BT) for h in range(H)]
        return jnp.stack(parts, axis=0)

    q = split_heads(0 * D)                                 # [G, N, hd], pre-scaled
    k = split_heads(1 * D)
    v = split_heads(2 * D)
    G = BT * H

    # scores: contract last dims directly (no explicit transpose)
    s = jnp.einsum('gnk,gmk->gnm', q.astype(cd), k.astype(cd),
                   preferred_element_type=f32)             # [G, N, N]
    s = s - jnp.max(s, axis=-1, keepdims=True)
    e = jnp.exp(s)
    # softmax(-1): reciprocal-multiply instead of per-element divide (EUP path).
    attn = e * pl.reciprocal(jnp.sum(e, axis=-1, keepdims=True), approx=False)
    # attn_drop is identity (p = 0); attention-map hooks are host-side state.

    ctx = jnp.einsum('gnm,gmk->gnk', attn.astype(cd), v.astype(cd),
                     preferred_element_type=f32)           # [G, N, hd]

    # 'b h n d -> b n (h d)': merge heads back into lanes, then ONE projection
    # matmul contracting the full depth D (no per-head proj / cross-head sum).
    rows = [jnp.concatenate([ctx[b * H + h] for h in range(H)], axis=-1)
            for b in range(BT)]                            # each [N, D]
    ctx2d = rows[0] if BT == 1 else jnp.concatenate(rows, axis=0)   # [M, D]

    attn_out = jnp.dot(ctx2d.astype(cd), wproj_ref[...],
                       preferred_element_type=f32) + bproj_ref[...].astype(f32)

    x = x + attn_out                                       # residual 1

    # ---------------- MLP branch: mlp(norm2(x)) ----------------
    xn2 = _layernorm(x, ln2_g_ref[...].astype(f32), ln2_b_ref[...].astype(f32))
    h1 = jnp.dot(xn2.astype(cd), w1_ref[...],
                 preferred_element_type=f32) + b1_ref[...].astype(f32)
    # exact GELU (torch.nn.GELU default): 0.5*x*(1+erf(x/sqrt(2)))
    # (tanh-approx GELU would free VALU slots but deviates from torch numerics)
    h1 = 0.5 * h1 * (1.0 + jax.lax.erf(h1 * 0.7071067811865475))
    h2 = jnp.dot(h1.astype(cd), w2_ref[...],
                 preferred_element_type=f32) + b2_ref[...].astype(f32)

    o_ref[...] = (x + h2).reshape(BT, N, D).astype(o_ref.dtype)     # residual 2


# ----------------------------- wrapper -----------------------------

def _pick_block_b(B):
    """Largest batch block that still leaves >=2 (>=4 if possible) grid steps,
    so each TensorCore gets pipelined x/out tiles while matmul M grows."""
    target_steps = 4 if B >= 4 else (2 if B >= 2 else 1)
    for bt in range(B, 0, -1):
        if B % bt == 0 and (B // bt) >= target_steps:
            return bt
    return 1


def vit_block(x, params, num_heads, weight_dtype=None, block_b=None):
    B, N, D = x.shape
    H = num_heads
    hd = D // H
    Dh = params["w1"].shape[1]
    scale = float(hd ** -0.5)
    wdt = jnp.dtype(weight_dtype) if weight_dtype is not None else x.dtype

    # Host-side weight prep: fold the attention scale into the q columns of the
    # fused qkv weight (column order is already (qkv, head, hd) — matches the
    # 'b n (qkv h d)' rearrange), and ship weights in the MXU operand dtype.
    wqkv = params["wqkv"]
    wqkv = jnp.concatenate([wqkv[:, :D] * scale, wqkv[:, D:]], axis=1).astype(wdt)
    wproj = params["wproj"].astype(wdt)        # [D, D]: contracts full depth
    w1 = params["w1"].astype(wdt)
    w2 = params["w2"].astype(wdt)

    ln1_g = params["ln1_g"].astype(jnp.float32)
    ln1_b = params["ln1_b"].astype(jnp.float32)
    bproj = params["bproj"].astype(jnp.float32)
    ln2_g = params["ln2_g"].astype(jnp.float32)
    ln2_b = params["ln2_b"].astype(jnp.float32)
    b1 = params["b1"].astype(jnp.float32)
    b2 = params["b2"].astype(jnp.float32)

    BT = block_b if block_b is not None else _pick_block_b(B)
    assert B % BT == 0
    M, G = BT * N, BT * H

    # ---- generation-aware VMEM budget ----
    weights = (wqkv, wproj, w1, w2)
    small = (ln1_g, ln1_b, bproj, ln2_g, ln2_b, b1, b2)
    w_bytes = sum(int(a.size) * a.dtype.itemsize for a in weights + small)
    act_bytes = 4 * (8 * M * D + 2 * M * 3 * D + 4 * G * N * hd
                     + 3 * G * N * N + 2 * M * Dh)
    io_bytes = 2 * 2 * BT * N * D * x.dtype.itemsize       # double-buffered x/out
    need = 2 * w_bytes + act_bytes + io_bytes + (4 << 20)

    try:
        vmem_cap = int(pltpu.get_tpu_info().vmem_capacity_bytes)
    except Exception:
        vmem_cap = 64 << 20                                 # conservative (v7x)
    budget_cap = min(max(32 << 20, vmem_cap - (8 << 20)), 100 << 20)
    vmem_limit = int(min(max(need, 32 << 20), budget_cap))

    kern = functools.partial(block_kernel, num_heads=H)

    def run(weight_mode):
        def const_spec(a):
            idx = lambda b, _n=a.ndim: (0,) * _n
            if weight_mode is None:
                return pl.BlockSpec(a.shape, idx)
            # constant index_map -> never re-fetched; single buffer saves VMEM
            return pl.BlockSpec(a.shape, idx, pipeline_mode=weight_mode)

        return pl.pallas_call(
            kern,
            out_shape=jax.ShapeDtypeStruct((B, N, D), x.dtype),
            grid=(B // BT,),
            in_specs=[
                pl.BlockSpec((BT, N, D), lambda b: (b, 0, 0)),   # x tile
                const_spec(ln1_g), const_spec(ln1_b),
                const_spec(wqkv), const_spec(wproj), const_spec(bproj),
                const_spec(ln2_g), const_spec(ln2_b),
                const_spec(w1), const_spec(b1),
                const_spec(w2), const_spec(b2),
            ],
            out_specs=pl.BlockSpec((BT, N, D), lambda b: (b, 0, 0)),
            compiler_params=pltpu.CompilerParams(
                dimension_semantics=("parallel",),
                vmem_limit_bytes=vmem_limit),
        )(x, ln1_g, ln1_b, wqkv, wproj, bproj, ln2_g, ln2_b, w1, b1, w2, b2)

    modes = []
    if hasattr(pl, "Buffered"):
        modes.append(pl.Buffered(1))        # single-buffer the constant weights
    modes.append(None)                      # fallback: default double buffering
    last_err = None
    for mode in modes:
        try:
            return run(mode)
        except Exception as err:            # pragma: no cover - version fallback
            last_err = err
    raise last_err


# ----------------------------- pure-JAX reference -----------------------------

def vit_block_ref(x, p, num_heads):
    B, N, D = x.shape
    hd = D // num_heads
    scale = hd ** -0.5

    def ln(v, g, b):
        mu = jnp.mean(v, -1, keepdims=True)
        var = jnp.mean((v - mu) ** 2, -1, keepdims=True)
        return (v - mu) / jnp.sqrt(var + 1e-6) * g + b

    xn = ln(x, p["ln1_g"], p["ln1_b"])
    qkv = xn @ p["wqkv"]                                    # [B,N,3D]
    qkv = qkv.reshape(B, N, 3, num_heads, hd)
    q, k, v = (qkv[:, :, i].transpose(0, 2, 1, 3) for i in range(3))  # [B,H,N,hd]
    dots = jnp.einsum("bhid,bhjd->bhij", q, k) * scale
    attn = jax.nn.softmax(dots, axis=-1)
    out = jnp.einsum("bhij,bhjd->bhid", attn, v)
    out = out.transpose(0, 2, 1, 3).reshape(B, N, D)
    out = out @ p["wproj"] + p["bproj"]
    x = x + out
    xn2 = ln(x, p["ln2_g"], p["ln2_b"])
    h1 = jax.nn.gelu(xn2 @ p["w1"] + p["b1"], approximate=False)
    h2 = h1 @ p["w2"] + p["b2"]
    return x + h2


# ----------------------------- main -----------------------------

if __name__ == "__main__":
    # Small, lane-aligned shapes (D multiple of 128 -> dense, unmasked stores).
    B, N, D = 2, 16, 128
    num_heads = 4
    mlp_ratio = 4.0
    Dh = int(D * mlp_ratio)

    key = jax.random.PRNGKey(0)
    ks = jax.random.split(key, 12)

    params = {
        "ln1_g": 1.0 + 0.1 * jax.random.normal(ks[0], (1, D), jnp.float32),
        "ln1_b": 0.1 * jax.random.normal(ks[1], (1, D), jnp.float32),
        "wqkv": 0.05 * jax.random.normal(ks[2], (D, 3 * D), jnp.float32),
        "wproj": 0.05 * jax.random.normal(ks[3], (D, D), jnp.float32),
        "bproj": 0.05 * jax.random.normal(ks[4], (1, D), jnp.float32),
        "ln2_g": 1.0 + 0.1 * jax.random.normal(ks[5], (1, D), jnp.float32),
        "ln2_b": 0.1 * jax.random.normal(ks[6], (1, D), jnp.float32),
        "w1": 0.05 * jax.random.normal(ks[7], (D, Dh), jnp.float32),
        "b1": 0.05 * jax.random.normal(ks[8], (1, Dh), jnp.float32),
        "w2": 0.05 * jax.random.normal(ks[9], (Dh, D), jnp.float32),
        "b2": 0.05 * jax.random.normal(ks[10], (1, D), jnp.float32),
    }
    x = jax.random.normal(ks[11], (B, N, D), jnp.float32)

    out = vit_block(x, params, num_heads)
    out = jax.block_until_ready(out)

    ref = vit_block_ref(x, params, num_heads)
    assert out.shape == (B, N, D)
    assert jnp.allclose(out, ref, rtol=2e-4, atol=1e-4), (
        f"max abs err {jnp.max(jnp.abs(out - ref))}")

    print("KERNEL_OK")
</pallas_src>

<mosaic_0001>
module attributes {stable_mosaic.version = 11 : i64} {
  func.func @block_kernel(%arg0: i32, %arg1: memref<1x16x128xf32, #tpu.memory_space<vmem>>, %arg2: memref<1x128xf32, #tpu.memory_space<vmem>>, %arg3: memref<1x128xf32, #tpu.memory_space<vmem>>, %arg4: memref<128x384xf32, #tpu.memory_space<vmem>>, %arg5: memref<128x128xf32, #tpu.memory_space<vmem>>, %arg6: memref<1x128xf32, #tpu.memory_space<vmem>>, %arg7: memref<1x128xf32, #tpu.memory_space<vmem>>, %arg8: memref<1x128xf32, #tpu.memory_space<vmem>>, %arg9: memref<128x512xf32, #tpu.memory_space<vmem>>, %arg10: memref<1x512xf32, #tpu.memory_space<vmem>>, %arg11: memref<512x128xf32, #tpu.memory_space<vmem>>, %arg12: memref<1x128xf32, #tpu.memory_space<vmem>>, %arg13: memref<1x16x128xf32, #tpu.memory_space<vmem>>) attributes {dimension_semantics = [#tpu.dimension_semantics<parallel>], iteration_bounds = array<i64: 2>, scalar_prefetch = 0 : i64, scratch_operands = 0 : i64, tpu.core_type = #tpu.core_type<tc>, window_params = [{transform_indices = @transform_0, window_bounds = array<i64: 1, 16, 128>}, {pipeline_mode = #tpu.pipeline_mode<synchronous>, transform_indices = @transform_1, window_bounds = array<i64: 1, 128>}, {pipeline_mode = #tpu.pipeline_mode<synchronous>, transform_indices = @transform_2, window_bounds = array<i64: 1, 128>}, {pipeline_mode = #tpu.pipeline_mode<synchronous>, transform_indices = @transform_3, window_bounds = array<i64: 128, 384>}, {pipeline_mode = #tpu.pipeline_mode<synchronous>, transform_indices = @transform_4, window_bounds = array<i64: 128, 128>}, {pipeline_mode = #tpu.pipeline_mode<synchronous>, transform_indices = @transform_5, window_bounds = array<i64: 1, 128>}, {pipeline_mode = #tpu.pipeline_mode<synchronous>, transform_indices = @transform_6, window_bounds = array<i64: 1, 128>}, {pipeline_mode = #tpu.pipeline_mode<synchronous>, transform_indices = @transform_7, window_bounds = array<i64: 1, 128>}, {pipeline_mode = #tpu.pipeline_mode<synchronous>, transform_indices = @transform_8, window_bounds = array<i64: 128, 512>}, {pipeline_mode = #tpu.pipeline_mode<synchronous>, transform_indices = @transform_9, window_bounds = array<i64: 1, 512>}, {pipeline_mode = #tpu.pipeline_mode<synchronous>, transform_indices = @transform_10, window_bounds = array<i64: 512, 128>}, {pipeline_mode = #tpu.pipeline_mode<synchronous>, transform_indices = @transform_11, window_bounds = array<i64: 1, 128>}, {transform_indices = @transform_12, window_bounds = array<i64: 1, 16, 128>}]} {
    %c0 = arith.constant 0 : index
    %c0_0 = arith.constant 0 : index
    %c0_1 = arith.constant 0 : index
    %0 = vector.load %arg1[%c0, %c0_0, %c0_1] : memref<1x16x128xf32, #tpu.memory_space<vmem>>, vector<1x16x128xf32>
    %1 = vector.shape_cast %0 : vector<1x16x128xf32> to vector<16x128xf32>
    %c0_2 = arith.constant 0 : index
    %c0_3 = arith.constant 0 : index
    %2 = vector.load %arg2[%c0_2, %c0_3] : memref<1x128xf32, #tpu.memory_space<vmem>>, vector<1x128xf32>
    %c0_4 = arith.constant 0 : index
    %c0_5 = arith.constant 0 : index
    %3 = vector.load %arg3[%c0_4, %c0_5] : memref<1x128xf32, #tpu.memory_space<vmem>>, vector<1x128xf32>
    %cst = arith.constant dense<0.000000e+00> : vector<16xf32>
    %4 = vector.multi_reduction <add>, %1, %cst [1] : vector<16x128xf32> to vector<16xf32>
    %5 = vector.shape_cast %4 : vector<16xf32> to vector<16x1xf32>
    %cst_6 = arith.constant 1.280000e+02 : f32
    %6 = vector.broadcast %cst_6 : f32 to vector<16x1xf32>
    %7 = arith.divf %5, %6 : vector<16x1xf32>
    %8 = vector.broadcast %7 : vector<16x1xf32> to vector<16x128xf32>
    %9 = arith.subf %1, %8 : vector<16x128xf32>
    %10 = arith.mulf %9, %9 : vector<16x128xf32>
    %cst_7 = arith.constant dense<0.000000e+00> : vector<16xf32>
    %11 = vector.multi_reduction <add>, %10, %cst_7 [1] : vector<16x128xf32> to vector<16xf32>
    %12 = vector.shape_cast %11 : vector<16xf32> to vector<16x1xf32>
    %cst_8 = arith.constant 1.280000e+02 : f32
    %13 = vector.broadcast %cst_8 : f32 to vector<16x1xf32>
    %14 = arith.divf %12, %13 : vector<16x1xf32>
    %15 = vector.broadcast %7 : vector<16x1xf32> to vector<16x128xf32>
    %16 = arith.subf %1, %15 : vector<16x128xf32>
    %cst_9 = arith.constant 9.99999997E-7 : f32
    %17 = vector.broadcast %cst_9 : f32 to vector<16x1xf32>
    %18 = arith.addf %14, %17 : vector<16x1xf32>
    %19 = math.rsqrt %18 : vector<16x1xf32>
    %20 = vector.broadcast %19 : vector<16x1xf32> to vector<16x128xf32>
    %21 = arith.mulf %16, %20 : vector<16x128xf32>
    %22 = vector.broadcast %2 : vector<1x128xf32> to vector<16x128xf32>
    %23 = arith.mulf %21, %22 : vector<16x128xf32>
    %24 = vector.broadcast %3 : vector<1x128xf32> to vector<16x128xf32>
    %25 = arith.addf %23, %24 : vector<16x128xf32>
    %c0_10 = arith.constant 0 : index
    %c0_11 = arith.constant 0 : index
    %26 = vector.load %arg4[%c0_10, %c0_11] : memref<128x384xf32, #tpu.memory_space<vmem>>, vector<128x384xf32>
    %cst_12 = arith.constant dense<0.000000e+00> : vector<16x384xf32>
    %27 = tpu.matmul %25, %26, %cst_12 {dimension_numbers = #tpu.dot_dimension_numbers<[1], [0], [0], [1], [0, 0, 1, 1], [], []>} : vector<16x128xf32>, vector<128x384xf32>, vector<16x384xf32> -> vector<16x384xf32>
    %28 = vector.extract_strided_slice %27 {offsets = [0, 0], sizes = [16, 32], strides = [1, 1]} : vector<16x384xf32> to vector<16x32xf32>
    %29 = vector.extract_strided_slice %27 {offsets = [0, 32], sizes = [16, 32], strides = [1, 1]} : vector<16x384xf32> to vector<16x32xf32>
    %30 = vector.extract_strided_slice %27 {offsets = [0, 64], sizes = [16, 32], strides = [1, 1]} : vector<16x384xf32> to vector<16x32xf32>
    %31 = vector.extract_strided_slice %27 {offsets = [0, 96], sizes = [16, 32], strides = [1, 1]} : vector<16x384xf32> to vector<16x32xf32>
    %32 = vector.shape_cast %28 : vector<16x32xf32> to vector<1x16x32xf32>
    %33 = vector.shape_cast %29 : vector<16x32xf32> to vector<1x16x32xf32>
    %34 = vector.shape_cast %30 : vector<16x32xf32> to vector<1x16x32xf32>
    %35 = vector.shape_cast %31 : vector<16x32xf32> to vector<1x16x32xf32>
    %36 = tpu.concatenate %32, %33, %34, %35 in 0 : vector<1x16x32xf32>, vector<1x16x32xf32>, vector<1x16x32xf32>, vector<1x16x32xf32> -> vector<4x16x32xf32>
    %37 = vector.extract_strided_slice %27 {offsets = [0, 128], sizes = [16, 32], strides = [1, 1]} : vector<16x384xf32> to vector<16x32xf32>
    %38 = vector.extract_strided_slice %27 {offsets = [0, 160], sizes = [16, 32], strides = [1, 1]} : vector<16x384xf32> to vector<16x32xf32>
    %39 = vector.extract_strided_slice %27 {offsets = [0, 192], sizes = [16, 32], strides = [1, 1]} : vector<16x384xf32> to vector<16x32xf32>
    %40 = vector.extract_strided_slice %27 {offsets = [0, 224], sizes = [16, 32], strides = [1, 1]} : vector<16x384xf32> to vector<16x32xf32>
    %41 = vector.shape_cast %37 : vector<16x32xf32> to vector<1x16x32xf32>
    %42 = vector.shape_cast %38 : vector<16x32xf32> to vector<1x16x32xf32>
    %43 = vector.shape_cast %39 : vector<16x32xf32> to vector<1x16x32xf32>
    %44 = vector.shape_cast %40 : vector<16x32xf32> to vector<1x16x32xf32>
    %45 = tpu.concatenate %41, %42, %43, %44 in 0 : vector<1x16x32xf32>, vector<1x16x32xf32>, vector<1x16x32xf32>, vector<1x16x32xf32> -> vector<4x16x32xf32>
    %46 = vector.extract_strided_slice %27 {offsets = [0, 256], sizes = [16, 32], strides = [1, 1]} : vector<16x384xf32> to vector<16x32xf32>
    %47 = vector.extract_strided_slice %27 {offsets = [0, 288], sizes = [16, 32], strides = [1, 1]} : vector<16x384xf32> to vector<16x32xf32>
    %48 = vector.extract_strided_slice %27 {offsets = [0, 320], sizes = [16, 32], strides = [1, 1]} : vector<16x384xf32> to vector<16x32xf32>
    %49 = vector.extract_strided_slice %27 {offsets = [0, 352], sizes = [16, 32], strides = [1, 1]} : vector<16x384xf32> to vector<16x32xf32>
    %50 = vector.shape_cast %46 : vector<16x32xf32> to vector<1x16x32xf32>
    %51 = vector.shape_cast %47 : vector<16x32xf32> to vector<1x16x32xf32>
    %52 = vector.shape_cast %48 : vector<16x32xf32> to vector<1x16x32xf32>
    %53 = vector.shape_cast %49 : vector<16x32xf32> to vector<1x16x32xf32>
    %54 = tpu.concatenate %50, %51, %52, %53 in 0 : vector<1x16x32xf32>, vector<1x16x32xf32>, vector<1x16x32xf32>, vector<1x16x32xf32> -> vector<4x16x32xf32>
    "tpu.trace_start"() <{level = 10 : i32, message = "gnk,gmk->gnm"}> : () -> ()
    %cst_13 = arith.constant dense<0.000000e+00> : vector<4x16x16xf32>
    %55 = tpu.matmul %36, %45, %cst_13 {dimension_numbers = #tpu.dot_dimension_numbers<[2], [2], [1], [1], [0, 0, 0, 1, 1, 1], [0], [0]>} : vector<4x16x32xf32>, vector<4x16x32xf32>, vector<4x16x16xf32> -> vector<4x16x16xf32>
    "tpu.trace_stop"() : () -> ()
    %cst_14 = arith.constant dense<0xFF800000> : vector<4x16xf32>
    %56 = vector.multi_reduction <maximumf>, %55, %cst_14 [2] : vector<4x16x16xf32> to vector<4x16xf32>
    %57 = vector.shape_cast %56 : vector<4x16xf32> to vector<4x16x1xf32>
    %58 = vector.broadcast %57 : vector<4x16x1xf32> to vector<4x16x16xf32>
    %59 = arith.subf %55, %58 : vector<4x16x16xf32>
    %60 = math.exp %59 : vector<4x16x16xf32>
    %cst_15 = arith.constant dense<0.000000e+00> : vector<4x16xf32>
    %61 = vector.multi_reduction <add>, %60, %cst_15 [2] : vector<4x16x16xf32> to vector<4x16xf32>
    %62 = vector.shape_cast %61 : vector<4x16xf32> to vector<4x16x1xf32>
    %63 = tpu.reciprocal %62 : vector<4x16x1xf32> -> vector<4x16x1xf32>
    %64 = vector.broadcast %63 : vector<4x16x1xf32> to vector<4x16x16xf32>
    %65 = arith.mulf %60, %64 : vector<4x16x16xf32>
    "tpu.trace_start"() <{level = 10 : i32, message = "gnm,gmk->gnk"}> : () -> ()
    %cst_16 = arith.constant dense<0.000000e+00> : vector<4x16x32xf32>
    %66 = tpu.matmul %65, %54, %cst_16 {dimension_numbers = #tpu.dot_dimension_numbers<[2], [1], [1], [2], [0, 0, 0, 1, 1, 2], [0], [0]>} : vector<4x16x16xf32>, vector<4x16x32xf32>, vector<4x16x32xf32> -> vector<4x16x32xf32>
    "tpu.trace_stop"() : () -> ()
    %67 = vector.extract_strided_slice %66 {offsets = [0, 0, 0], sizes = [1, 16, 32], strides = [1, 1, 1]} : vector<4x16x32xf32> to vector<1x16x32xf32>
    %68 = vector.shape_cast %67 : vector<1x16x32xf32> to vector<16x32xf32>
    %69 = vector.extract_strided_slice %66 {offsets = [1, 0, 0], sizes = [1, 16, 32], strides = [1, 1, 1]} : vector<4x16x32xf32> to vector<1x16x32xf32>
    %70 = vector.shape_cast %69 : vector<1x16x32xf32> to vector<16x32xf32>
    %71 = vector.extract_strided_slice %66 {offsets = [2, 0, 0], sizes = [1, 16, 32], strides = [1, 1, 1]} : vector<4x16x32xf32> to vector<1x16x32xf32>
    %72 = vector.shape_cast %71 : vector<1x16x32xf32> to vector<16x32xf32>
    %73 = vector.extract_strided_slice %66 {offsets = [3, 0, 0], sizes = [1, 16, 32], strides = [1, 1, 1]} : vector<4x16x32xf32> to vector<1x16x32xf32>
    %74 = vector.shape_cast %73 : vector<1x16x32xf32> to vector<16x32xf32>
    %75 = tpu.concatenate %68, %70, %72, %74 in 1 : vector<16x32xf32>, vector<16x32xf32>, vector<16x32xf32>, vector<16x32xf32> -> vector<16x128xf32>
    %c0_17 = arith.constant 0 : index
    %c0_18 = arith.constant 0 : index
    %76 = vector.load %arg5[%c0_17, %c0_18] : memref<128x128xf32, #tpu.memory_space<vmem>>, vector<128x128xf32>
    %cst_19 = arith.constant dense<0.000000e+00> : vector<16x128xf32>
    %77 = tpu.matmul %75, %76, %cst_19 {dimension_numbers = #tpu.dot_dimension_numbers<[1], [0], [0], [1], [0, 0, 1, 1], [], []>} : vector<16x128xf32>, vector<128x128xf32>, vector<16x128xf32> -> vector<16x128xf32>
    %c0_20 = arith.constant 0 : index
    %c0_21 = arith.constant 0 : index
    %78 = vector.load %arg6[%c0_20, %c0_21] : memref<1x128xf32, #tpu.memory_space<vmem>>, vector<1x128xf32>
    %79 = vector.broadcast %78 : vector<1x128xf32> to vector<16x128xf32>
    %80 = arith.addf %77, %79 : vector<16x128xf32>
    %81 = arith.addf %1, %80 : vector<16x128xf32>
    %c0_22 = arith.constant 0 : index
    %c0_23 = arith.constant 0 : index
    %82 = vector.load %arg7[%c0_22, %c0_23] : memref<1x128xf32, #tpu.memory_space<vmem>>, vector<1x128xf32>
    %c0_24 = arith.constant 0 : index
    %c0_25 = arith.constant 0 : index
    %83 = vector.load %arg8[%c0_24, %c0_25] : memref<1x128xf32, #tpu.memory_space<vmem>>, vector<1x128xf32>
    %cst_26 = arith.constant dense<0.000000e+00> : vector<16xf32>
    %84 = vector.multi_reduction <add>, %81, %cst_26 [1] : vector<16x128xf32> to vector<16xf32>
    %85 = vector.shape_cast %84 : vector<16xf32> to vector<16x1xf32>
    %cst_27 = arith.constant 1.280000e+02 : f32
    %86 = vector.broadcast %cst_27 : f32 to vector<16x1xf32>
    %87 = arith.divf %85, %86 : vector<16x1xf32>
    %88 = vector.broadcast %87 : vector<16x1xf32> to vector<16x128xf32>
    %89 = arith.subf %81, %88 : vector<16x128xf32>
    %90 = arith.mulf %89, %89 : vector<16x128xf32>
    %cst_28 = arith.constant dense<0.000000e+00> : vector<16xf32>
    %91 = vector.multi_reduction <add>, %90, %cst_28 [1] : vector<16x128xf32> to vector<16xf32>
    %92 = vector.shape_cast %91 : vector<16xf32> to vector<16x1xf32>
    %cst_29 = arith.constant 1.280000e+02 : f32
    %93 = vector.broadcast %cst_29 : f32 to vector<16x1xf32>
    %94 = arith.divf %92, %93 : vector<16x1xf32>
    %95 = vector.broadcast %87 : vector<16x1xf32> to vector<16x128xf32>
    %96 = arith.subf %81, %95 : vector<16x128xf32>
    %cst_30 = arith.constant 9.99999997E-7 : f32
    %97 = vector.broadcast %cst_30 : f32 to vector<16x1xf32>
    %98 = arith.addf %94, %97 : vector<16x1xf32>
    %99 = math.rsqrt %98 : vector<16x1xf32>
    %100 = vector.broadcast %99 : vector<16x1xf32> to vector<16x128xf32>
    %101 = arith.mulf %96, %100 : vector<16x128xf32>
    %102 = vector.broadcast %82 : vector<1x128xf32> to vector<16x128xf32>
    %103 = arith.mulf %101, %102 : vector<16x128xf32>
    %104 = vector.broadcast %83 : vector<1x128xf32> to vector<16x128xf32>
    %105 = arith.addf %103, %104 : vector<16x128xf32>
    %c0_31 = arith.constant 0 : index
    %c0_32 = arith.constant 0 : index
    %106 = vector.load %arg9[%c0_31, %c0_32] : memref<128x512xf32, #tpu.memory_space<vmem>>, vector<128x512xf32>
    %cst_33 = arith.constant dense<0.000000e+00> : vector<16x512xf32>
    %107 = tpu.matmul %105, %106, %cst_33 {dimension_numbers = #tpu.dot_dimension_numbers<[1], [0], [0], [1], [0, 0, 1, 1], [], []>} : vector<16x128xf32>, vector<128x512xf32>, vector<16x512xf32> -> vector<16x512xf32>
    %c0_34 = arith.constant 0 : index
    %c0_35 = arith.constant 0 : index
    %108 = vector.load %arg10[%c0_34, %c0_35] : memref<1x512xf32, #tpu.memory_space<vmem>>, vector<1x512xf32>
    %109 = vector.broadcast %108 : vector<1x512xf32> to vector<16x512xf32>
    %110 = arith.addf %107, %109 : vector<16x512xf32>
    %cst_36 = arith.constant 5.000000e-01 : f32
    %111 = vector.broadcast %cst_36 : f32 to vector<16x512xf32>
    %112 = arith.mulf %111, %110 : vector<16x512xf32>
    %cst_37 = arith.constant 0.707106769 : f32
    %113 = vector.broadcast %cst_37 : f32 to vector<16x512xf32>
    %114 = arith.mulf %110, %113 : vector<16x512xf32>
    %115 = math.erf %114 : vector<16x512xf32>
    %cst_38 = arith.constant 1.000000e+00 : f32
    %116 = vector.broadcast %cst_38 : f32 to vector<16x512xf32>
    %117 = arith.addf %116, %115 : vector<16x512xf32>
    %118 = arith.mulf %112, %117 : vector<16x512xf32>
    %c0_39 = arith.constant 0 : index
    %c0_40 = arith.constant 0 : index
    %119 = vector.load %arg11[%c0_39, %c0_40] : memref<512x128xf32, #tpu.memory_space<vmem>>, vector<512x128xf32>
    %cst_41 = arith.constant dense<0.000000e+00> : vector<16x128xf32>
    %120 = tpu.matmul %118, %119, %cst_41 {dimension_numbers = #tpu.dot_dimension_numbers<[1], [0], [0], [1], [0, 0, 1, 1], [], []>} : vector<16x512xf32>, vector<512x128xf32>, vector<16x128xf32> -> vector<16x128xf32>
    %c0_42 = arith.constant 0 : index
    %c0_43 = arith.constant 0 : index
    %121 = vector.load %arg12[%c0_42, %c0_43] : memref<1x128xf32, #tpu.memory_space<vmem>>, vector<1x128xf32>
    %122 = vector.broadcast %121 : vector<1x128xf32> to vector<16x128xf32>
    %123 = arith.addf %120, %122 : vector<16x128xf32>
    %124 = arith.addf %81, %123 : vector<16x128xf32>
    %125 = vector.shape_cast %124 : vector<16x128xf32> to vector<1x16x128xf32>
    %c0_44 = arith.constant 0 : index
    %c0_45 = arith.constant 0 : index
    %c0_46 = arith.constant 0 : index
    %126 = vector.load %arg13[%c0_44, %c0_45, %c0_46] : memref<1x16x128xf32, #tpu.memory_space<vmem>>, vector<1x16x128xf32>
    tpu.vector_store %arg13[%c0_44, %c0_45, %c0_46], %125 {strides = array<i32>} : memref<1x16x128xf32, #tpu.memory_space<vmem>>, vector<1x16x128xf32>,
    return
  }
  func.func @transform_0(%arg0: i32) -> (i32, i32, i32) {
    %c0_i32 = arith.constant 0 : i32
    %c0_i32_0 = arith.constant 0 : i32
    %c0_i32_1 = arith.constant 0 : i32
    return %arg0, %c0_i32, %c0_i32_0 : i32, i32, i32
  }
  func.func @transform_1(%arg0: i32) -> (i32, i32) {
    %c0_i32 = arith.constant 0 : i32
    %c0_i32_0 = arith.constant 0 : i32
    %c0_i32_1 = arith.constant 0 : i32
    return %c0_i32, %c0_i32_0 : i32, i32
  }
  func.func @transform_2(%arg0: i32) -> (i32, i32) {
    %c0_i32 = arith.constant 0 : i32
    %c0_i32_0 = arith.constant 0 : i32
    %c0_i32_1 = arith.constant 0 : i32
    return %c0_i32, %c0_i32_0 : i32, i32
  }
  func.func @transform_3(%arg0: i32) -> (i32, i32) {
    %c0_i32 = arith.constant 0 : i32
    %c0_i32_0 = arith.constant 0 : i32
    %c0_i32_1 = arith.constant 0 : i32
    return %c0_i32, %c0_i32_0 : i32, i32
  }
  func.func @transform_4(%arg0: i32) -> (i32, i32) {
    %c0_i32 = arith.constant 0 : i32
    %c0_i32_0 = arith.constant 0 : i32
    %c0_i32_1 = arith.constant 0 : i32
    return %c0_i32, %c0_i32_0 : i32, i32
  }
  func.func @transform_5(%arg0: i32) -> (i32, i32) {
    %c0_i32 = arith.constant 0 : i32
    %c0_i32_0 = arith.constant 0 : i32
    %c0_i32_1 = arith.constant 0 : i32
    return %c0_i32, %c0_i32_0 : i32, i32
  }
  func.func @transform_6(%arg0: i32) -> (i32, i32) {
    %c0_i32 = arith.constant 0 : i32
    %c0_i32_0 = arith.constant 0 : i32
    %c0_i32_1 = arith.constant 0 : i32
    return %c0_i32, %c0_i32_0 : i32, i32
  }
  func.func @transform_7(%arg0: i32) -> (i32, i32) {
    %c0_i32 = arith.constant 0 : i32
    %c0_i32_0 = arith.constant 0 : i32
    %c0_i32_1 = arith.constant 0 : i32
    return %c0_i32, %c0_i32_0 : i32, i32
  }
  func.func @transform_8(%arg0: i32) -> (i32, i32) {
    %c0_i32 = arith.constant 0 : i32
    %c0_i32_0 = arith.constant 0 : i32
    %c0_i32_1 = arith.constant 0 : i32
    return %c0_i32, %c0_i32_0 : i32, i32
  }
  func.func @transform_9(%arg0: i32) -> (i32, i32) {
    %c0_i32 = arith.constant 0 : i32
    %c0_i32_0 = arith.constant 0 : i32
    %c0_i32_1 = arith.constant 0 : i32
    return %c0_i32, %c0_i32_0 : i32, i32
  }
  func.func @transform_10(%arg0: i32) -> (i32, i32) {
    %c0_i32 = arith.constant 0 : i32
    %c0_i32_0 = arith.constant 0 : i32
    %c0_i32_1 = arith.constant 0 : i32
    return %c0_i32, %c0_i32_0 : i32, i32
  }
  func.func @transform_11(%arg0: i32) -> (i32, i32) {
    %c0_i32 = arith.constant 0 : i32
    %c0_i32_0 = arith.constant 0 : i32
    %c0_i32_1 = arith.constant 0 : i32
    return %c0_i32, %c0_i32_0 : i32, i32
  }
  func.func @transform_12(%arg0: i32) -> (i32, i32, i32) {
    %c0_i32 = arith.constant 0 : i32
    %c0_i32_0 = arith.constant 0 : i32
    %c0_i32_1 = arith.constant 0 : i32
    return %arg0, %c0_i32, %c0_i32_0 : i32, i32, i32
  }
}

module attributes {stable_mosaic.version = 11 : i64} {
  func.func @block_kernel(%arg0: i32, %arg1: memref<1x16x128xf32, #tpu.memory_space<vmem>>, %arg2: memref<1x128xf32, #tpu.memory_space<vmem>>, %arg3: memref<1x128xf32, #tpu.memory_space<vmem>>, %arg4: memref<128x384xf32, #tpu.memory_space<vmem>>, %arg5: memref<128x128xf32, #tpu.memory_space<vmem>>, %arg6: memref<1x128xf32, #tpu.memory_space<vmem>>, %arg7: memref<1x128xf32, #tpu.memory_space<vmem>>, %arg8: memref<1x128xf32, #tpu.memory_space<vmem>>, %arg9: memref<128x512xf32, #tpu.memory_space<vmem>>, %arg10: memref<1x512xf32, #tpu.memory_space<vmem>>, %arg11: memref<512x128xf32, #tpu.memory_space<vmem>>, %arg12: memref<1x128xf32, #tpu.memory_space<vmem>>, %arg13: memref<1x16x128xf32, #tpu.memory_space<vmem>>) attributes {dimension_semantics = [#tpu.dimension_semantics<parallel>], iteration_bounds = array<i64: 2>, scalar_prefetch = 0 : i64, scratch_operands = 0 : i64, tpu.core_type = #tpu.core_type<tc>, window_params = [{transform_indices = @transform_0, window_bounds = array<i64: 1, 16, 128>}, {pipeline_mode = #tpu.pipeline_mode<synchronous>, transform_indices = @transform_1, window_bounds = array<i64: 1, 128>}, {pipeline_mode = #tpu.pipeline_mode<synchronous>, transform_indices = @transform_2, window_bounds = array<i64: 1, 128>}, {pipeline_mode = #tpu.pipeline_mode<synchronous>, transform_indices = @transform_3, window_bounds = array<i64: 128, 384>}, {pipeline_mode = #tpu.pipeline_mode<synchronous>, transform_indices = @transform_4, window_bounds = array<i64: 128, 128>}, {pipeline_mode = #tpu.pipeline_mode<synchronous>, transform_indices = @transform_5, window_bounds = array<i64: 1, 128>}, {pipeline_mode = #tpu.pipeline_mode<synchronous>, transform_indices = @transform_6, window_bounds = array<i64: 1, 128>}, {pipeline_mode = #tpu.pipeline_mode<synchronous>, transform_indices = @transform_7, window_bounds = array<i64: 1, 128>}, {pipeline_mode = #tpu.pipeline_mode<synchronous>, transform_indices = @transform_8, window_bounds = array<i64: 128, 512>}, {pipeline_mode = #tpu.pipeline_mode<synchronous>, transform_indices = @transform_9, window_bounds = array<i64: 1, 512>}, {pipeline_mode = #tpu.pipeline_mode<synchronous>, transform_indices = @transform_10, window_bounds = array<i64: 512, 128>}, {pipeline_mode = #tpu.pipeline_mode<synchronous>, transform_indices = @transform_11, window_bounds = array<i64: 1, 128>}, {transform_indices = @transform_12, window_bounds = array<i64: 1, 16, 128>}]} {
    %c0 = arith.constant 0 : index
    %c0_0 = arith.constant 0 : index
    %c0_1 = arith.constant 0 : index
    %0 = vector.load %arg1[%c0, %c0_0, %c0_1] : memref<1x16x128xf32, #tpu.memory_space<vmem>>, vector<1x16x128xf32>
    %1 = vector.shape_cast %0 : vector<1x16x128xf32> to vector<16x128xf32>
    %c0_2 = arith.constant 0 : index
    %c0_3 = arith.constant 0 : index
    %2 = vector.load %arg2[%c0_2, %c0_3] : memref<1x128xf32, #tpu.memory_space<vmem>>, vector<1x128xf32>
    %c0_4 = arith.constant 0 : index
    %c0_5 = arith.constant 0 : index
    %3 = vector.load %arg3[%c0_4, %c0_5] : memref<1x128xf32, #tpu.memory_space<vmem>>, vector<1x128xf32>
    %cst = arith.constant dense<0.000000e+00> : vector<16xf32>
    %4 = vector.multi_reduction <add>, %1, %cst [1] : vector<16x128xf32> to vector<16xf32>
    %5 = vector.shape_cast %4 : vector<16xf32> to vector<16x1xf32>
    %cst_6 = arith.constant 1.280000e+02 : f32
    %6 = vector.broadcast %cst_6 : f32 to vector<16x1xf32>
    %7 = arith.divf %5, %6 : vector<16x1xf32>
    %8 = vector.broadcast %7 : vector<16x1xf32> to vector<16x128xf32>
    %9 = arith.subf %1, %8 : vector<16x128xf32>
    %10 = arith.mulf %9, %9 : vector<16x128xf32>
    %cst_7 = arith.constant dense<0.000000e+00> : vector<16xf32>
    %11 = vector.multi_reduction <add>, %10, %cst_7 [1] : vector<16x128xf32> to vector<16xf32>
    %12 = vector.shape_cast %11 : vector<16xf32> to vector<16x1xf32>
    %cst_8 = arith.constant 1.280000e+02 : f32
    %13 = vector.broadcast %cst_8 : f32 to vector<16x1xf32>
    %14 = arith.divf %12, %13 : vector<16x1xf32>
    %15 = vector.broadcast %7 : vector<16x1xf32> to vector<16x128xf32>
    %16 = arith.subf %1, %15 : vector<16x128xf32>
    %cst_9 = arith.constant 9.99999997E-7 : f32
    %17 = vector.broadcast %cst_9 : f32 to vector<16x1xf32>
    %18 = arith.addf %14, %17 : vector<16x1xf32>
    %19 = math.rsqrt %18 : vector<16x1xf32>
    %20 = vector.broadcast %19 : vector<16x1xf32> to vector<16x128xf32>
    %21 = arith.mulf %16, %20 : vector<16x128xf32>
    %22 = vector.broadcast %2 : vector<1x128xf32> to vector<16x128xf32>
    %23 = arith.mulf %21, %22 : vector<16x128xf32>
    %24 = vector.broadcast %3 : vector<1x128xf32> to vector<16x128xf32>
    %25 = arith.addf %23, %24 : vector<16x128xf32>
    %c0_10 = arith.constant 0 : index
    %c0_11 = arith.constant 0 : index
    %26 = vector.load %arg4[%c0_10, %c0_11] : memref<128x384xf32, #tpu.memory_space<vmem>>, vector<128x384xf32>
    %cst_12 = arith.constant dense<0.000000e+00> : vector<16x384xf32>
    %27 = tpu.matmul %25, %26, %cst_12 {dimension_numbers = #tpu.dot_dimension_numbers<[1], [0], [0], [1], [0, 0, 1, 1], [], []>} : vector<16x128xf32>, vector<128x384xf32>, vector<16x384xf32> -> vector<16x384xf32>
    %28 = vector.extract_strided_slice %27 {offsets = [0, 0], sizes = [16, 32], strides = [1, 1]} : vector<16x384xf32> to vector<16x32xf32>
    %29 = vector.extract_strided_slice %27 {offsets = [0, 32], sizes = [16, 32], strides = [1, 1]} : vector<16x384xf32> to vector<16x32xf32>
    %30 = vector.extract_strided_slice %27 {offsets = [0, 64], sizes = [16, 32], strides = [1, 1]} : vector<16x384xf32> to vector<16x32xf32>
    %31 = vector.extract_strided_slice %27 {offsets = [0, 96], sizes = [16, 32], strides = [1, 1]} : vector<16x384xf32> to vector<16x32xf32>
    %32 = vector.shape_cast %28 : vector<16x32xf32> to vector<1x16x32xf32>
    %33 = vector.shape_cast %29 : vector<16x32xf32> to vector<1x16x32xf32>
    %34 = vector.shape_cast %30 : vector<16x32xf32> to vector<1x16x32xf32>
    %35 = vector.shape_cast %31 : vector<16x32xf32> to vector<1x16x32xf32>
    %36 = tpu.concatenate %32, %33, %34, %35 in 0 : vector<1x16x32xf32>, vector<1x16x32xf32>, vector<1x16x32xf32>, vector<1x16x32xf32> -> vector<4x16x32xf32>
    %37 = vector.extract_strided_slice %27 {offsets = [0, 128], sizes = [16, 32], strides = [1, 1]} : vector<16x384xf32> to vector<16x32xf32>
    %38 = vector.extract_strided_slice %27 {offsets = [0, 160], sizes = [16, 32], strides = [1, 1]} : vector<16x384xf32> to vector<16x32xf32>
    %39 = vector.extract_strided_slice %27 {offsets = [0, 192], sizes = [16, 32], strides = [1, 1]} : vector<16x384xf32> to vector<16x32xf32>
    %40 = vector.extract_strided_slice %27 {offsets = [0, 224], sizes = [16, 32], strides = [1, 1]} : vector<16x384xf32> to vector<16x32xf32>
    %41 = vector.shape_cast %37 : vector<16x32xf32> to vector<1x16x32xf32>
    %42 = vector.shape_cast %38 : vector<16x32xf32> to vector<1x16x32xf32>
    %43 = vector.shape_cast %39 : vector<16x32xf32> to vector<1x16x32xf32>
    %44 = vector.shape_cast %40 : vector<16x32xf32> to vector<1x16x32xf32>
    %45 = tpu.concatenate %41, %42, %43, %44 in 0 : vector<1x16x32xf32>, vector<1x16x32xf32>, vector<1x16x32xf32>, vector<1x16x32xf32> -> vector<4x16x32xf32>
    %46 = vector.extract_strided_slice %27 {offsets = [0, 256], sizes = [16, 32], strides = [1, 1]} : vector<16x384xf32> to vector<16x32xf32>
    %47 = vector.extract_strided_slice %27 {offsets = [0, 288], sizes = [16, 32], strides = [1, 1]} : vector<16x384xf32> to vector<16x32xf32>
    %48 = vector.extract_strided_slice %27 {offsets = [0, 320], sizes = [16, 32], strides = [1, 1]} : vector<16x384xf32> to vector<16x32xf32>
    %49 = vector.extract_strided_slice %27 {offsets = [0, 352], sizes = [16, 32], strides = [1, 1]} : vector<16x384xf32> to vector<16x32xf32>
    %50 = vector.shape_cast %46 : vector<16x32xf32> to vector<1x16x32xf32>
    %51 = vector.shape_cast %47 : vector<16x32xf32> to vector<1x16x32xf32>
    %52 = vector.shape_cast %48 : vector<16x32xf32> to vector<1x16x32xf32>
    %53 = vector.shape_cast %49 : vector<16x32xf32> to vector<1x16x32xf32>
    %54 = tpu.concatenate %50, %51, %52, %53 in 0 : vector<1x16x32xf32>, vector<1x16x32xf32>, vector<1x16x32xf32>, vector<1x16x32xf32> -> vector<4x16x32xf32>
    "tpu.trace_start"() <{level = 10 : i32, message = "gnk,gmk->gnm"}> : () -> ()
    %cst_13 = arith.constant dense<0.000000e+00> : vector<4x16x16xf32>
    %55 = tpu.matmul %36, %45, %cst_13 {dimension_numbers = #tpu.dot_dimension_numbers<[2], [2], [1], [1], [0, 0, 0, 1, 1, 1], [0], [0]>} : vector<4x16x32xf32>, vector<4x16x32xf32>, vector<4x16x16xf32> -> vector<4x16x16xf32>
    "tpu.trace_stop"() : () -> ()
    %cst_14 = arith.constant dense<0xFF800000> : vector<4x16xf32>
    %56 = vector.multi_reduction <maximumf>, %55, %cst_14 [2] : vector<4x16x16xf32> to vector<4x16xf32>
    %57 = vector.shape_cast %56 : vector<4x16xf32> to vector<4x16x1xf32>
    %58 = vector.broadcast %57 : vector<4x16x1xf32> to vector<4x16x16xf32>
    %59 = arith.subf %55, %58 : vector<4x16x16xf32>
    %60 = math.exp %59 : vector<4x16x16xf32>
    %cst_15 = arith.constant dense<0.000000e+00> : vector<4x16xf32>
    %61 = vector.multi_reduction <add>, %60, %cst_15 [2] : vector<4x16x16xf32> to vector<4x16xf32>
    %62 = vector.shape_cast %61 : vector<4x16xf32> to vector<4x16x1xf32>
    %63 = tpu.reciprocal %62 : vector<4x16x1xf32> -> vector<4x16x1xf32>
    %64 = vector.broadcast %63 : vector<4x16x1xf32> to vector<4x16x16xf32>
    %65 = arith.mulf %60, %64 : vector<4x16x16xf32>
    "tpu.trace_start"() <{level = 10 : i32, message = "gnm,gmk->gnk"}> : () -> ()
    %cst_16 = arith.constant dense<0.000000e+00> : vector<4x16x32xf32>
    %66 = tpu.matmul %65, %54, %cst_16 {dimension_numbers = #tpu.dot_dimension_numbers<[2], [1], [1], [2], [0, 0, 0, 1, 1, 2], [0], [0]>} : vector<4x16x16xf32>, vector<4x16x32xf32>, vector<4x16x32xf32> -> vector<4x16x32xf32>
    "tpu.trace_stop"() : () -> ()
    %67 = vector.extract_strided_slice %66 {offsets = [0, 0, 0], sizes = [1, 16, 32], strides = [1, 1, 1]} : vector<4x16x32xf32> to vector<1x16x32xf32>
    %68 = vector.shape_cast %67 : vector<1x16x32xf32> to vector<16x32xf32>
    %69 = vector.extract_strided_slice %66 {offsets = [1, 0, 0], sizes = [1, 16, 32], strides = [1, 1, 1]} : vector<4x16x32xf32> to vector<1x16x32xf32>
    %70 = vector.shape_cast %69 : vector<1x16x32xf32> to vector<16x32xf32>
    %71 = vector.extract_strided_slice %66 {offsets = [2, 0, 0], sizes = [1, 16, 32], strides = [1, 1, 1]} : vector<4x16x32xf32> to vector<1x16x32xf32>
    %72 = vector.shape_cast %71 : vector<1x16x32xf32> to vector<16x32xf32>
    %73 = vector.extract_strided_slice %66 {offsets = [3, 0, 0], sizes = [1, 16, 32], strides = [1, 1, 1]} : vector<4x16x32xf32> to vector<1x16x32xf32>
    %74 = vector.shape_cast %73 : vector<1x16x32xf32> to vector<16x32xf32>
    %75 = tpu.concatenate %68, %70, %72, %74 in 1 : vector<16x32xf32>, vector<16x32xf32>, vector<16x32xf32>, vector<16x32xf32> -> vector<16x128xf32>
    %c0_17 = arith.constant 0 : index
    %c0_18 = arith.constant 0 : index
    %76 = vector.load %arg5[%c0_17, %c0_18] : memref<128x128xf32, #tpu.memory_space<vmem>>, vector<128x128xf32>
    %cst_19 = arith.constant dense<0.000000e+00> : vector<16x128xf32>
    %77 = tpu.matmul %75, %76, %cst_19 {dimension_numbers = #tpu.dot_dimension_numbers<[1], [0], [0], [1], [0, 0, 1, 1], [], []>} : vector<16x128xf32>, vector<128x128xf32>, vector<16x128xf32> -> vector<16x128xf32>
    %c0_20 = arith.constant 0 : index
    %c0_21 = arith.constant 0 : index
    %78 = vector.load %arg6[%c0_20, %c0_21] : memref<1x128xf32, #tpu.memory_space<vmem>>, vector<1x128xf32>
    %79 = vector.broadcast %78 : vector<1x128xf32> to vector<16x128xf32>
    %80 = arith.addf %77, %79 : vector<16x128xf32>
    %81 = arith.addf %1, %80 : vector<16x128xf32>
    %c0_22 = arith.constant 0 : index
    %c0_23 = arith.constant 0 : index
    %82 = vector.load %arg7[%c0_22, %c0_23] : memref<1x128xf32, #tpu.memory_space<vmem>>, vector<1x128xf32>
    %c0_24 = arith.constant 0 : index
    %c0_25 = arith.constant 0 : index
    %83 = vector.load %arg8[%c0_24, %c0_25] : memref<1x128xf32, #tpu.memory_space<vmem>>, vector<1x128xf32>
    %cst_26 = arith.constant dense<0.000000e+00> : vector<16xf32>
    %84 = vector.multi_reduction <add>, %81, %cst_26 [1] : vector<16x128xf32> to vector<16xf32>
    %85 = vector.shape_cast %84 : vector<16xf32> to vector<16x1xf32>
    %cst_27 = arith.constant 1.280000e+02 : f32
    %86 = vector.broadcast %cst_27 : f32 to vector<16x1xf32>
    %87 = arith.divf %85, %86 : vector<16x1xf32>
    %88 = vector.broadcast %87 : vector<16x1xf32> to vector<16x128xf32>
    %89 = arith.subf %81, %88 : vector<16x128xf32>
    %90 = arith.mulf %89, %89 : vector<16x128xf32>
    %cst_28 = arith.constant dense<0.000000e+00> : vector<16xf32>
    %91 = vector.multi_reduction <add>, %90, %cst_28 [1] : vector<16x128xf32> to vector<16xf32>
    %92 = vector.shape_cast %91 : vector<16xf32> to vector<16x1xf32>
    %cst_29 = arith.constant 1.280000e+02 : f32
    %93 = vector.broadcast %cst_29 : f32 to vector<16x1xf32>
    %94 = arith.divf %92, %93 : vector<16x1xf32>
    %95 = vector.broadcast %87 : vector<16x1xf32> to vector<16x128xf32>
    %96 = arith.subf %81, %95 : vector<16x128xf32>
    %cst_30 = arith.constant 9.99999997E-7 : f32
    %97 = vector.broadcast %cst_30 : f32 to vector<16x1xf32>
    %98 = arith.addf %94, %97 : vector<16x1xf32>
    %99 = math.rsqrt %98 : vector<16x1xf32>
    %100 = vector.broadcast %99 : vector<16x1xf32> to vector<16x128xf32>
    %101 = arith.mulf %96, %100 : vector<16x128xf32>
    %102 = vector.broadcast %82 : vector<1x128xf32> to vector<16x128xf32>
    %103 = arith.mulf %101, %102 : vector<16x128xf32>
    %104 = vector.broadcast %83 : vector<1x128xf32> to vector<16x128xf32>
    %105 = arith.addf %103, %104 : vector<16x128xf32>
    %c0_31 = arith.constant 0 : index
    %c0_32 = arith.constant 0 : index
    %106 = vector.load %arg9[%c0_31, %c0_32] : memref<128x512xf32, #tpu.memory_space<vmem>>, vector<128x512xf32>
    %cst_33 = arith.constant dense<0.000000e+00> : vector<16x512xf32>
    %107 = tpu.matmul %105, %106, %cst_33 {dimension_numbers = #tpu.dot_dimension_numbers<[1], [0], [0], [1], [0, 0, 1, 1], [], []>} : vector<16x128xf32>, vector<128x512xf32>, vector<16x512xf32> -> vector<16x512xf32>
    %c0_34 = arith.constant 0 : index
    %c0_35 = arith.constant 0 : index
    %108 = vector.load %arg10[%c0_34, %c0_35] : memref<1x512xf32, #tpu.memory_space<vmem>>, vector<1x512xf32>
    %109 = vector.broadcast %108 : vector<1x512xf32> to vector<16x512xf32>
    %110 = arith.addf %107, %109 : vector<16x512xf32>
    %cst_36 = arith.constant 5.000000e-01 : f32
    %111 = vector.broadcast %cst_36 : f32 to vector<16x512xf32>
    %112 = arith.mulf %111, %110 : vector<16x512xf32>
    %cst_37 = arith.constant 0.707106769 : f32
    %113 = vector.broadcast %cst_37 : f32 to vector<16x512xf32>
    %114 = arith.mulf %110, %113 : vector<16x512xf32>
    %115 = math.erf %114 : vector<16x512xf32>
    %cst_38 = arith.constant 1.000000e+00 : f32
    %116 = vector.broadcast %cst_38 : f32 to vector<16x512xf32>
    %117 = arith.addf %116, %115 : vector<16x512xf32>
    %118 = arith.mulf %112, %117 : vector<16x512xf32>
    %c0_39 = arith.constant 0 : index
    %c0_40 = arith.constant 0 : index
    %119 = vector.load %arg11[%c0_39, %c0_40] : memref<512x128xf32, #tpu.memory_space<vmem>>, vector<512x128xf32>
    %cst_41 = arith.constant dense<0.000000e+00> : vector<16x128xf32>
    %120 = tpu.matmul %118, %119, %cst_41 {dimension_numbers = #tpu.dot_dimension_numbers<[1], [0], [0], [1], [0, 0, 1, 1], [], []>} : vector<16x512xf32>, vector<512x128xf32>, vector<16x128xf32> -> vector<16x128xf32>
    %c0_42 = arith.constant 0 : index
    %c0_43 = arith.constant 0 : index
    %121 = vector.load %arg12[%c0_42, %c0_43] : memref<1x128xf32, #tpu.memory_space<vmem>>, vector<1x128xf32>
    %122 = vector.broadcast %121 : vector<1x128xf32> to vector<16x128xf32>
    %123 = arith.addf %120, %122 : vector<16x128xf32>
    %124 = arith.addf %81, %123 : vector<16x128xf32>
    %125 = vector.shape_cast %124 : vector<16x128xf32> to vector<1x16x128xf32>
    %c0_44 = arith.constant 0 : index
    %c0_45 = arith.constant 0 : index
    %c0_46 = arith.constant 0 : index
    %126 = vector.load %arg13[%c0_44, %c0_45, %c0_46] : memref<1x16x128xf32, #tpu.memory_space<vmem>>, vector<1x16x128xf32>
    tpu.vector_store %arg13[%c0_44, %c0_45, %c0_46], %125 {strides = array<i32>} : memref<1x16x128xf32, #tpu.memory_space<vmem>>, vector<1x16x128xf32>,
    return
  }
  func.func @transform_0(%arg0: i32) -> (i32, i32, i32) {
    %c0_i32 = arith.constant 0 : i32
    %c0_i32_0 = arith.constant 0 : i32
    %c0_i32_1 = arith.constant 0 : i32
    return %arg0, %c0_i32, %c0_i32_0 : i32, i32, i32
  }
  func.func @transform_1(%arg0: i32) -> (i32, i32) {
    %c0_i32 = arith.constant 0 : i32
    %c0_i32_0 = arith.constant 0 : i32
    %c0_i32_1 = arith.constant 0 : i32
    return %c0_i32, %c0_i32_0 : i32, i32
  }
  func.func @transform_2(%arg0: i32) -> (i32, i32) {
    %c0_i32 = arith.constant 0 : i32
    %c0_i32_0 = arith.constant 0 : i32
    %c0_i32_1 = arith.constant 0 : i32
    return %c0_i32, %c0_i32_0 : i32, i32
  }
  func.func @transform_3(%arg0: i32) -> (i32, i32) {
    %c0_i32 = arith.constant 0 : i32
    %c0_i32_0 = arith.constant 0 : i32
    %c0_i32_1 = arith.constant 0 : i32
    return %c0_i32, %c0_i32_0 : i32, i32
  }
  func.func @transform_4(%arg0: i32) -> (i32, i32) {
    %c0_i32 = arith.constant 0 : i32
    %c0_i32_0 = arith.constant 0 : i32
    %c0_i32_1 = arith.constant 0 : i32
    return %c0_i32, %c0_i32_0 : i32, i32
  }
  func.func @transform_5(%arg0: i32) -> (i32, i32) {
    %c0_i32 = arith.constant 0 : i32
    %c0_i32_0 = arith.constant 0 : i32
    %c0_i32_1 = arith.constant 0 : i32
    return %c0_i32, %c0_i32_0 : i32, i32
  }
  func.func @transform_6(%arg0: i32) -> (i32, i32) {
    %c0_i32 = arith.constant 0 : i32
    %c0_i32_0 = arith.constant 0 : i32
    %c0_i32_1 = arith.constant 0 : i32
    return %c0_i32, %c0_i32_0 : i32, i32
  }
  func.func @transform_7(%arg0: i32) -> (i32, i32) {
    %c0_i32 = arith.constant 0 : i32
    %c0_i32_0 = arith.constant 0 : i32
    %c0_i32_1 = arith.constant 0 : i32
    return %c0_i32, %c0_i32_0 : i32, i32
  }
  func.func @transform_8(%arg0: i32) -> (i32, i32) {
    %c0_i32 = arith.constant 0 : i32
    %c0_i32_0 = arith.constant 0 : i32
    %c0_i32_1 = arith.constant 0 : i32
    return %c0_i32, %c0_i32_0 : i32, i32
  }
  func.func @transform_9(%arg0: i32) -> (i32, i32) {
    %c0_i32 = arith.constant 0 : i32
    %c0_i32_0 = arith.constant 0 : i32
    %c0_i32_1 = arith.constant 0 : i32
    return %c0_i32, %c0_i32_0 : i32, i32
  }
  func.func @transform_10(%arg0: i32) -> (i32, i32) {
    %c0_i32 = arith.constant 0 : i32
    %c0_i32_0 = arith.constant 0 : i32
    %c0_i32_1 = arith.constant 0 : i32
    return %c0_i32, %c0_i32_0 : i32, i32
  }
  func.func @transform_11(%arg0: i32) -> (i32, i32) {
    %c0_i32 = arith.constant 0 : i32
    %c0_i32_0 = arith.constant 0 : i32
    %c0_i32_1 = arith.constant 0 : i32
    return %c0_i32, %c0_i32_0 : i32, i32
  }
  func.func @transform_12(%arg0: i32) -> (i32, i32, i32) {
    %c0_i32 = arith.constant 0 : i32
    %c0_i32_0 = arith.constant 0 : i32
    %c0_i32_1 = arith.constant 0 : i32
    return %arg0, %c0_i32, %c0_i32_0 : i32, i32, i32
  }
}

</mosaic_0001>

<bundles_post_ra>
// kernel: tpu_custom_call.1
= control target key start
LH: loop header
LB: loop body
LE: loop exit
PB: predicated region body
PF: predicated region fallthrough
CT: control target
= control target key end

     0   :  { %s3852_s0 = inlined_call_operand.hbm [shape: f32[2,16,128], index: 0, kind: input, shape index: {}]   ;;  %s3853_s1 = inlined_call_operand.vmem [shape: f32[1,128], index: 1, kind: input, shape index: {}]   ;;  %s3854_s2 = inlined_call_operand.vmem [shape: f32[1,128], index: 2, kind: input, shape index: {}]   ;;  %s3855_s3 = inlined_call_operand.hbm [shape: f32[128,384], index: 3, kind: input, shape index: {}]   ;;  %s3856_s4 = inlined_call_operand.hbm [shape: f32[128,128], index: 4, kind: input, shape index: {}]   ;;  %s3857_s5 = inlined_call_operand.vmem [shape: f32[1,128], index: 5, kind: input, shape index: {}]   ;;  %s3858_s6 = inlined_call_operand.vmem [shape: f32[1,128], index: 6, kind: input, shape index: {}]   ;;  %s3859_s7 = inlined_call_operand.vmem [shape: f32[1,128], index: 7, kind: input, shape index: {}]   ;;  %s3860_s8 = inlined_call_operand.hbm [shape: f32[128,512], index: 8, kind: input, shape index: {}]   ;;  %s3861_s9 = inlined_call_operand.vmem [shape: f32[1,512], index: 9, kind: input, shape index: {}]   ;;  %s3862_s10 = inlined_call_operand.hbm [shape: f32[512,128], index: 10, kind: input, shape index: {}]   ;;  %s3863_s11 = inlined_call_operand.vmem [shape: f32[1,128], index: 11, kind: input, shape index: {}]   ;;  %s3864_s12 = inlined_call_operand.hbm [shape: f32[2,16,128], index: 12, kind: output, shape index: {}]  }
   0x1   :  { %3871 = sst [smem:[#allocation18_spill]] %s3855_s3 }
   0x2   :  { %3872 = sst [smem:[#allocation19_spill]] %s3861_s9 }
   0x3   :  { %3873 = sst [smem:[#allocation20_spill]] %s3863_s11 }
   0x4   :  { %3874 = sst [smem:[#allocation21_spill]] %s3864_s12 }
   0x5   :  { %17 = vsyncpa [#allocation3], 0 }
   0x6   :  { %19 = vsyncpa [#allocation3 + $0x1], 0 }
   0x7   :  { %20 = vsyncpa [#allocation6], 0 }
   0x8   :  { %21 = vsyncpa [#allocation9], 0 }
   0x9   :  { %22 = vsyncpa [#allocation4], 0 }
   0xa   :  { %24 = vsyncpa [#allocation4 + $0x1], 0  ;;  %s3418_s21 = smov 0   ;;  %s3420_s22 = smov 0  }
   0xb   :  { %s3422_s23 = smov 0   ;;  %s3424_s24 = smov 0  }
   0xc LB: > { %3875 = sst [smem:[#allocation16_spill]] %s3321_s21  ;;  %s3439_s25 = sadd.s32 4294967295, %s3333_s24   ;;  %s3333_s24 = sphi %s3424_s24, %s3904_s24   ;;  %s3329_s23 = sphi %s3422_s23, %s3903_s23   ;;  %s3325_s22 = sphi %s3420_s22, %s3902_s22   ;;  %s3321_s21 = sphi %s3418_s21, %s3901_s21  }
   0xd   : > { %s2329_s26 = sadd.s32 4294967294, %s3333_s24   ;;  %p50_p0 = scmp.ne.s32.totalorder %s3325_s22, %s3321_s21 }
   0xe   : > { %p3866_p1 = scmp.eq.s32.totalorder %s3439_s25, 0  ;;  %p311_p3 = scmp.eq.s32.totalorder %s2329_s26, 1 }
   0xf   : > { %p2330_p5 = scmp.ge.s32.totalorder %s3333_s24, 1  ;;  %p318_p7 = scmp.lt.s32.totalorder %s3333_s24, 3 }
  0x10   : > { %p3448_p4 = por %p3866_p1, %p50_p0  ;;  %p3453_p6 = por %p311_p3, %p50_p0 }
  0x11   : > { %p3458_p8 = pnand %p2330_p5, %p318_p7  ;;  %s3335_s30 = smov [#allocation5]  }
  0x12   : > { %s3876_s27 = scalar_select %p3448_p4, 1, 0 }
  0x13   : > { %s3877_s28 = scalar_select %p3453_p6, 1, 0 }
  0x14   : > { %s3879_s29 = scalar_select %p3458_p8, 1, 0 }
  0x15   : > { %3878 = sst [smem:[#allocation17_spill]] %s3877_s28  ;;  %s336_s13 = sshll.u32 %s3335_s30, 4  ;;  %s3462_s13 = int_to_ptr.vmem [resolvable:$true] %s336_s13 }
  0x16   : > { %p2937_p9 = pneg %p3458_p8  ;;  %s3336_s15 = smov [#allocation8]  }
  0x17   : > { %s371_s16 = sshll.u32 %s3336_s15, 4  ;;  %s3881_s3 = sld [smem:[#allocation18_spill]]  ;;  %s3473_s16 = int_to_ptr.vmem [resolvable:$true] %s371_s16 }
  0x18   : > { %p3469_p11 = pnand %p2937_p9, %p3866_p1 }
  0x1a   : > { %p3483_p13 = pneg %p3469_p11 }
  0x1d   : > { %s3117_s19 = scalar_lea.hbm %s3881_s3, 6144 }
  0x1e   : > { %p3118_p12 = scmp.ne.s32.totalorder %s3881_s3, %s3117_s19  ;;  %p3124_p5 = scmp.lt.u32.totalorder %s3117_s19, %s3881_s3 }
  0x20   : > { %p3120_p0 = pnand %p3483_p13, %p3118_p12 }
  0x22   : > { %p3121_p3 = pneg %p3120_p0 }
  0x24   : > { %p3126_p7 = pnand %p3124_p5, %p3121_p3 }
  0x26   : > { %3129 = shalt.err (!%p3126_p7)
}
  0x27   : > { %s3130_s17 = scalar_lea.vmem %s3462_s13, 6144  ;;  %p3138_p2 = scmp.lt.s32.totalorder %s3462_s13, %s3462_s13 }
  0x28   : > { %p3131_p9 = scmp.ne.s32.totalorder %s3462_s13, %s3130_s17  ;;  %p3139_p6 = scmp.lt.s32.totalorder %s3130_s17, %s3130_s17 }
  0x2a   : > { %p3133_p10 = pnand %p3131_p9, %p3483_p13  ;;  %p3140_p12 = por %p3139_p6, %p3138_p2 }
  0x2c   : > { %p3134_p1 = pneg %p3133_p10 }
  0x2e   : > { %p3141_p0 = pnand %p3140_p12, %p3134_p1 }
  0x30   : > { %3144 = shalt.err (!%p3141_p0)
}
  0x31   : > { %s3337_s18 = smov 384   ;;  %s3338_s28 = smov 24  }
  0x32   : > { %2940 = dma.hbm_to_vmem [thread:$0]  (!%p3469_p11), %s3881_s3, 6144, %s3462_s13, [#allocation6], %s3337_s18, %s3337_s18, %s3338_s28  }
  0x33   : > { %s3145_s21 = scalar_lea.hbm %s3860_s8, 8192 }
  0x34   : > { %p3146_p2 = scmp.ne.s32.totalorder %s3860_s8, %s3145_s21  ;;  %p3152_p10 = scmp.lt.u32.totalorder %s3145_s21, %s3860_s8 }
  0x36   : > { %p3148_p1 = pnand %p3146_p2, %p3483_p13 }
  0x38   : > { %p3149_p6 = pneg %p3148_p1 }
  0x3a   : > { %p3154_p3 = pnand %p3152_p10, %p3149_p6 }
  0x3c   : > { %3157 = shalt.err (!%p3154_p3)
}
  0x3d   : > { %s3158_s13 = scalar_lea.vmem %s3473_s16, 8192  ;;  %p3166_p12 = scmp.lt.s32.totalorder %s3473_s16, %s3473_s16 }
  0x3e   : > { %p3159_p5 = scmp.ne.s32.totalorder %s3473_s16, %s3158_s13  ;;  %p3167_p0 = scmp.lt.s32.totalorder %s3158_s13, %s3158_s13 }
  0x40   : > { %p3161_p7 = pnand %p3159_p5, %p3483_p13  ;;  %p3168_p2 = por %p3167_p0, %p3166_p12 }
  0x42   : > { %p3162_p9 = pneg %p3161_p7 }
  0x44   : > { %p3169_p1 = pnand %p3168_p2, %p3162_p9 }
  0x46   : > { %3172 = shalt.err (!%p3169_p1)
}
  0x47   : > { %s3339_s11 = smov 512   ;;  %s3340_s9 = smov 32  }
  0x48   : > { %2946 = dma.hbm_to_vmem [thread:$0]  (!%p3469_p11), %s3860_s8, 8192, %s3473_s16, [#allocation9], %s3339_s11, %s3339_s11, %s3340_s9  }
  0x49   : > { %s3341_s18 = smov [#allocation7]   ;;  %s3173_s26 = scalar_lea.hbm %s3856_s4, 2048 }
  0x4a   : > { %s349_s28 = sshll.u32 %s3341_s18, 4  ;;  %p3174_p6 = scmp.ne.s32.totalorder %s3856_s4, %s3173_s26  ;;  %s350_s28 = int_to_ptr.vmem [resolvable:$true] %s349_s28 }
  0x4b   : > { %p3180_p5 = scmp.lt.u32.totalorder %s3173_s26, %s3856_s4 }
  0x4c   : > { %p3176_p10 = pnand %p3174_p6, %p3483_p13 }
  0x4e   : > { %p3177_p3 = pneg %p3176_p10 }
  0x50   : > { %p3182_p7 = pnand %p3180_p5, %p3177_p3 }
  0x52   : > { %3185 = shalt.err (!%p3182_p7)
}
  0x53   : > { %s3186_s16 = scalar_lea.vmem %s350_s28, 2048  ;;  %p3194_p2 = scmp.lt.s32.totalorder %s350_s28, %s350_s28 }
  0x54   : > { %p3187_p9 = scmp.ne.s32.totalorder %s350_s28, %s3186_s16  ;;  %p3195_p1 = scmp.lt.s32.totalorder %s3186_s16, %s3186_s16 }
  0x56   : > { %p3189_p12 = pnand %p3187_p9, %p3483_p13  ;;  %p3196_p4 = por %p3195_p1, %p3194_p2 }
  0x58   : > { %p3190_p0 = pneg %p3189_p12 }
  0x5a   : > { %p3197_p8 = pnand %p3196_p4, %p3190_p0 }
  0x5c   : > { %3200 = shalt.err (!%p3197_p8)
}
  0x5d   : > { %s3342_s11 = smov 128   ;;  %s3343_s9 = smov 8  }
  0x5e   : > { %2943 = dma.hbm_to_vmem [thread:$0]  (!%p3469_p11), %s3856_s4, 2048, %s350_s28, [#allocation6], %s3342_s11, %s3342_s11, %s3343_s9  }
  0x5f   : > { %s3344_s21 = smov [#allocation10]   ;;  %s3201_s26 = scalar_lea.hbm %s3862_s10, 8192 }
  0x60   : > { %s387_s18 = sshll.u32 %s3344_s21, 4  ;;  %p3202_p4 = scmp.ne.s32.totalorder %s3862_s10, %s3201_s26  ;;  %s388_s18 = int_to_ptr.vmem [resolvable:$true] %s387_s18 }
  0x61   : > { %p3208_p10 = scmp.lt.u32.totalorder %s3201_s26, %s3862_s10 }
  0x62   : > { %p3204_p8 = pnand %p3202_p4, %p3483_p13 }
  0x64   : > { %p3205_p6 = pneg %p3204_p8 }
  0x66   : > { %p3210_p3 = pnand %p3208_p10, %p3205_p6 }
  0x68   : > { %3213 = shalt.err (!%p3210_p3)
}
  0x69   : > { %s3214_s28 = scalar_lea.vmem %s388_s18, 8192  ;;  %p3222_p12 = scmp.lt.s32.totalorder %s388_s18, %s388_s18 }
  0x6a   : > { %p3215_p5 = scmp.ne.s32.totalorder %s388_s18, %s3214_s28  ;;  %p3223_p0 = scmp.lt.s32.totalorder %s3214_s28, %s3214_s28 }
  0x6c   : > { %p3217_p7 = pnand %p3215_p5, %p3483_p13  ;;  %p3224_p2 = por %p3223_p0, %p3222_p12 }
  0x6e   : > { %p3218_p9 = pneg %p3217_p7 }
  0x70   : > { %p3225_p1 = pnand %p3224_p2, %p3218_p9 }
  0x72   : > { %3228 = shalt.err (!%p3225_p1)
}
  0x73   : > { %2949 = dma.hbm_to_vmem [thread:$0]  (!%p3469_p11), %s3862_s10, 8192, %s388_s18, [#allocation9], %s3342_s11, %s3342_s11, %s3343_s9  }
  0x74   : > { %s3570_s30 = sadd.s32 1, %s3333_s24   ;;  %s37_s14 = sadd.s32 1, %s3329_s23 }
  0x75   : > { %s34_s21 = ssub.s32 %s3333_s24, %s3570_s30  ;;  %p44_p13 = scmp.ne.s32.totalorder %s3329_s23, %s3325_s22 }
  0x76   : > { %p35_p4 = scmp.eq.s32.totalorder %s34_s21, 0  ;;  %p45_p8 = scmp.eq.s32.totalorder %s3333_s24, 0 }
  0x77   : > { %p3883_p6 = scmp.eq.s32.totalorder %s3439_s25, 1  ;;  %p2962_p3 = scmp.lt.s32.totalorder %s3333_s24, 2 }
  0x78   : > { %s3586_s20 = scalar_select %p35_p4, %s3329_s23, %s37_s14  }
  0x79   : > { %p3580_p10 = por %p3883_p6, %p44_p13  ;;  %p46_p5 = por %p45_p8, %p44_p13 }
  0x7a   : > { %s404_s26 = sand.u32 1, %s3329_s23   ;;  %s2381_s18 = sshll.u32 %s3333_s24, 8 }
  0x7b   : > { %s2336_s15 = sshll.u32 %s404_s26, 4  ;;  %s3593_s16 = scalar_lea.hbm %s3852_s0, %s2381_s18 }
  0x7c   : > { %s408_s28 = scalar_lea.vmem [#allocation2], %s2336_s15  ;;  %p3597_p11 = pnand %p2962_p3, %p46_p5 }
  0x7d   : > { %s415_s3 = sshll.u32 %s408_s28, 4  ;;  %s3601_s14 = scalar_lea.sflag [#allocation3], %s404_s26  ;;  %s3595_s3 = int_to_ptr.vmem [resolvable:$true] %s415_s3 }
  0x7e   : > { %s3229_s21 = scalar_lea.hbm %s3593_s16, 256  ;;  %p3231_p9 = pneg %p3597_p11 }
  0x7f   : > { %p3230_p7 = scmp.ne.s32.totalorder %s3593_s16, %s3229_s21  ;;  %s3234_s17 = scalar_lea.hbm %s3852_s0, 512 }
  0x80   : > { %p3235_p2 = scmp.lt.u32.totalorder %s3593_s16, %s3852_s0  ;;  %p3236_p1 = scmp.lt.u32.totalorder %s3234_s17, %s3229_s21 }
  0x81   : > { %p3232_p12 = pnand %p3231_p9, %p3230_p7  ;;  %p3238_p4 = scmp.lt.u32.totalorder %s3229_s21, %s3593_s16 }
  0x82   : > { %p3237_p13 = por %p3236_p1, %p3235_p2 }
  0x83   : > { %p3233_p0 = pneg %p3232_p12 }
  0x84   : > { %p3239_p8 = por %p3238_p4, %p3237_p13 }
  0x86   : > { %p3240_p6 = pnand %p3239_p8, %p3233_p0 }
  0x88   : > { %3243 = shalt.err (!%p3240_p6)
}
  0x89   : > { %s3244_s26 = scalar_lea.vmem %s3595_s3, 256  ;;  %s3345_s15 = smov [#allocation2]  }
  0x8a   : > { %p3245_p3 = scmp.ne.s32.totalorder %s3595_s3, %s3244_s26  ;;  %s3249_s18 = sshll.u32 %s3345_s15, 4  ;;  %s3250_s18 = int_to_ptr.vmem [resolvable:$false] %s3249_s18 }
  0x8b   : > { %s3251_s13 = scalar_lea.vmem %s3250_s18, 512  ;;  %p3252_p12 = scmp.lt.s32.totalorder %s3595_s3, %s3250_s18 }
  0x8c   : > { %p3247_p5 = pnand %p3245_p3, %p3231_p9  ;;  %p3253_p2 = scmp.lt.s32.totalorder %s3251_s13, %s3244_s26 }
  0x8e   : > { %p3248_p7 = pneg %p3247_p5  ;;  %p3254_p1 = por %p3253_p2, %p3252_p12 }
  0x90   : > { %p3255_p13 = pnand %p3254_p1, %p3248_p7 }
  0x92   : > { %3258 = shalt.err (!%p3255_p13)
}
  0x93   : > { %2953 = dma.hbm_to_vmem [thread:$0]  (!%p3597_p11), %s3593_s16, 256, %s3595_s3, %s3601_s14, %s3342_s11, %s3342_s11, %s3343_s9  }
  0x94   : > { %p3886_p9 = scmp.ne.s32.totalorder %s3879_s29, 0 }
  0x95   : > { %s3635_s21 = sand.u32 (!%p3886_p9), 1, %s3325_s22   ;;  %p3887_p0 = scmp.ne.s32.totalorder (!%p3886_p9), %s3876_s27, 0 }
  0x96   : > { %427 = sbr.rel (%p3886_p9) target bundleno = 2704 (0xa90), region = 68  ;;  %s2340_s17 = sshll.u32 (!%p3886_p9), %s3635_s21, 4 }
  0x97   : > { %s430_s28 = scalar_lea.sflag (!%p3886_p9), [#allocation3], %s3635_s21  ;;  %s433_s12 = scalar_lea.vmem (!%p3886_p9), [#allocation2], %s2340_s17 }
  0x9d   : > { %3304 = dma.done.wait (%p3887_p0), %s430_s28, 256  }
  0x9e   : > { %3306 = vsyncadd (%p3887_p0), %s430_s28, 4294967040  ;;  %p3888_p11 = scmp.eq.s32.totalorder %s3439_s25, 0 }
  0xa0   : > { %3308 = dma.done.wait (%p3888_p11), [#allocation6], 8192   ;;  %p3889_p4 = pmov %p3888_p11 }
  0xa2   : > { %3310 = vsyncadd (%p3889_p4), [#allocation6], 4294959104  ;;  %p3890_p8 = pmov %p3889_p4 }
  0xa3   : > { %p3891_p6 = pmov %p3889_p4 }
  0xa4   : > { %3312 = dma.done.wait (%p3890_p8), [#allocation9], 16384  }
  0xa5   : > { %3314 = vsyncadd (%p3891_p6), [#allocation9], 4294950912  ;;  %v3653_v0 = vld [vmem:[%s433_s12] sm:$0xff]  ;;  %v3656_v1 = vld [vmem:[%s433_s12 + $0x8] sm:$0xff]  ;;  %vm781_vm0 = vcmask 261120   ;;  %s3347_s16 = smov 96  }
  0xa6   : > { %494 = vadd.xlane.f32.xlu0 %v3653_v0  ;;  %v534_v2 = vld [vmem:[#allocation5 + $0x8] sm:$0xff]  ;;  %v537_v3 = vld [vmem:[#allocation5 + $0x20] sm:$0xff]  ;;  %v536_v6 = vld [vmem:[#allocation5 + $0x18] sm:$0xff]  ;;  %s3348_s3 = smov 64   ;;  %s3349_s14 = smov 32   ;;  %vm1114_vm2 = vcmask 130048  }
  0xa7   : > { %v533_v4 = vld [vmem:[#allocation5] sm:$0xff]  ;;  %v2653_v5 = vpack.c.bf16 %v537_v3, %v534_v2  ;;  %v540_v7 = vld [vmem:[#allocation5 + $0x38] sm:$0xff]  ;;  %v543_v8 = vld [vmem:[#allocation5 + $0x50] sm:$0xff]  ;;  %vm1553_vm3 = vcmask 523264   ;;  %vm1556_vm4 = vcmask 785408   ;;  %s3894_s11 = sld [smem:[#allocation19_spill]] }
  0xa8   : > { %v2655_v9 = vpack.c.bf16 %v536_v6, %v533_v4  ;;  %v2657_v10 = vpack.c.bf16 %v543_v8, %v540_v7  ;;  %v535_v11 = vld [vmem:[#allocation5 + $0x10] sm:$0xff]  ;;  %v538_v12 = vld [vmem:[#allocation5 + $0x28] sm:$0xff]  ;;  %v549_v17 = vld [vmem:[#allocation5 + $0x80] sm:$0xff]  ;;  %v3346_v6 = vmov 0.0   ;;  %s2382_s15 = sshll.u32 %s3439_s25, 8  ;;  %s3896_s28 = sld [smem:[#allocation21_spill]] }
  0xa9   : > { %v539_v13 = vld [vmem:[#allocation5 + $0x30] sm:$0xff]  ;;  %2654 = vmatprep.subr.bf16.mxu0 %v2653_v5  ;;  %v2685_v14 = vpack.c.bf16 %v538_v12, %v535_v11  ;;  %v542_v15 = vld [vmem:[#allocation5 + $0x48] sm:$0xff]  ;;  %v541_v19 = vld [vmem:[#allocation5 + $0x40] sm:$0xff]  ;;  %645 = vmatprep.mubr.f32.mxu0 %v3346_v6  ;;  %s3350_s25 = smov [#allocation11]  }
  0xaa   : > { %496 = vadd.xlane.f32.xlu0 %v3656_v1  ;;  %v546_v16 = vld [vmem:[#allocation5 + $0x68] sm:$0xff]  ;;  %2656 = vmatpush1.bf16.msra.mxu0 %v2655_v9  ;;  %v2659_v18 = vpack.c.bf16 %v542_v15, %v539_v13  ;;  %v544_v20 = vld [vmem:[#allocation5 + $0x58] sm:$0xff]  ;;  %v545_v23 = vld [vmem:[#allocation5 + $0x60] sm:$0xff]  ;;  %s3263_s29 = sshll.u32 %s3350_s25, 4  ;;  %s3264_s29 = int_to_ptr.vmem [resolvable:$false] %s3263_s29 }
  0xab   : > { %2658 = vmatprep.subr.bf16.mxu0 %v2657_v10  ;;  %2686 = vmatprep.subr.bf16.mxu1 %v2685_v14  ;;  %v2661_v21 = vpack.c.bf16 %v549_v17, %v546_v16  ;;  %v2689_v22 = vpack.c.bf16 %v544_v20, %v541_v19  ;;  %v548_v24 = vld [vmem:[#allocation5 + $0x78] sm:$0xff]  ;;  %v555_v35 = vld [vmem:[#allocation5 + $0xb0] sm:$0xff]  ;;  %v550_v38 = vld [vmem:[#allocation5 + $0x88] sm:$0xff] }
  0xac   : > { %2688 = vmatpush3.bf16.msra.mxu1 %v2685_v14  ;;  %v2663_v25 = vpack.c.bf16 %v548_v24, %v545_v23  ;;  %v552_v34 = vld [vmem:[#allocation5 + $0x98] sm:$0xff]  ;;  %v547_v36 = vld [vmem:[#allocation5 + $0x70] sm:$0xff]  ;;  %v554_v40 = vld [vmem:[#allocation5 + $0xa8] sm:$0xff] }
  0xad   : > { %2690 = vmatprep.subr.bf16.mxu1 %v2689_v22  ;;  %v2665_v37 = vpack.c.bf16 %v555_v35, %v552_v34  ;;  %v551_v39 = vld [vmem:[#allocation5 + $0x90] sm:$0xff]  ;;  %v2693_v41 = vpack.c.bf16 %v550_v38, %v547_v36  ;;  %v558_v43 = vld [vmem:[#allocation5 + $0xc8] sm:$0xff]  ;;  %v561_v44 = vld [vmem:[#allocation5 + $0xe0] sm:$0xff] }
  0xae   : > { %2660 = vmatpush1.bf16.msra.mxu0 %v2659_v18  ;;  %v2667_v42 = vpack.c.bf16 %v554_v40, %v551_v39  ;;  %v553_v45 = vld [vmem:[#allocation5 + $0xa0] sm:$0xff]  ;;  %v2669_v46 = vpack.c.bf16 %v561_v44, %v558_v43  ;;  %v556_v47 = vld [vmem:[#allocation5 + $0xb8] sm:$0xff]  ;;  %v567_v53 = vld [vmem:[#allocation5 + $0x110] sm:$0xff]  ;;  %s3807_s12 = scalar_lea.hbm %s3896_s28, %s2382_s15 }
  0xaf   : > { %2662 = vmatprep.subr.bf16.mxu0 %v2661_v21  ;;  %v557_v48 = vld [vmem:[#allocation5 + $0xc0] sm:$0xff]  ;;  %v560_v49 = vld [vmem:[#allocation5 + $0xd8] sm:$0xff]  ;;  %v2697_v50 = vpack.c.bf16 %v556_v47, %v553_v45  ;;  %v559_v54 = vld [vmem:[#allocation5 + $0xd0] sm:$0xff] }
  0xb0   : > { %2692 = vmatpush3.bf16.msra.mxu1 %v2689_v22  ;;  %v2671_v51 = vpack.c.bf16 %v560_v49, %v557_v48  ;;  %v564_v52 = vld [vmem:[#allocation5 + $0xf8] sm:$0xff]  ;;  %v562_v56 = vld [vmem:[#allocation5 + $0xe8] sm:$0xff]  ;;  %v563_v57 = vld [vmem:[#allocation5 + $0xf0] sm:$0xff] }
  0xb1   : > { %2694 = vmatprep.subr.bf16.mxu1 %v2693_v41  ;;  %v2673_v55 = vpack.c.bf16 %v567_v53, %v564_v52  ;;  %v566_v58 = vld [vmem:[#allocation5 + $0x108] sm:$0xff]  ;;  %v2701_v59 = vpack.c.bf16 %v562_v56, %v559_v54  ;;  %v573_v62 = vld [vmem:[#allocation5 + $0x140] sm:$0xff]  ;;  %v568_v3 = vld [vmem:[#allocation5 + $0x118] sm:$0xff] }
  0xb2   : > { %2664 = vmatpush1.bf16.msra.mxu0 %v2663_v25  ;;  %v2675_v60 = vpack.c.bf16 %v566_v58, %v563_v57  ;;  %v570_v61 = vld [vmem:[#allocation5 + $0x128] sm:$0xff]  ;;  %v565_v63 = vld [vmem:[#allocation5 + $0x100] sm:$0xff]  ;;  %v572_v5 = vld [vmem:[#allocation5 + $0x138] sm:$0xff] }
  0xb3   : > { %2666 = vmatprep.subr.bf16.mxu0 %v2665_v37  ;;  %v2677_v2 = vpack.c.bf16 %v573_v62, %v570_v61  ;;  %v569_v4 = vld [vmem:[#allocation5 + $0x120] sm:$0xff]  ;;  %v2705_v7 = vpack.c.bf16 %v568_v3, %v565_v63  ;;  %v576_v9 = vld [vmem:[#allocation5 + $0x158] sm:$0xff]  ;;  %v579_v10 = vld [vmem:[#allocation5 + $0x170] sm:$0xff] }
  0xb4   : > { %2696 = vmatpush3.bf16.msra.mxu1 %v2693_v41  ;;  %v2679_v8 = vpack.c.bf16 %v572_v5, %v569_v4  ;;  %v571_v11 = vld [vmem:[#allocation5 + $0x130] sm:$0xff]  ;;  %v2681_v12 = vpack.c.bf16 %v579_v10, %v576_v9  ;;  %v574_v13 = vld [vmem:[#allocation5 + $0x148] sm:$0xff]  ;;  %v577_v18 = vld [vmem:[#allocation5 + $0x160] sm:$0xff] }
  0xb5   : > { %2698 = vmatprep.subr.bf16.mxu1 %v2697_v50  ;;  %v575_v14 = vld [vmem:[#allocation5 + $0x150] sm:$0xff]  ;;  %v578_v15 = vld [vmem:[#allocation5 + $0x168] sm:$0xff]  ;;  %v2709_v16 = vpack.c.bf16 %v574_v13, %v571_v11  ;;  %v580_v19 = vld [vmem:[#allocation5 + $0x178] sm:$0xff] }
  0xb6   : > { %2668 = vmatpush1.bf16.msra.mxu0 %v2667_v42  ;;  %v2683_v17 = vpack.c.bf16 %v578_v15, %v575_v14  ;;  %v2713_v20 = vpack.c.bf16 %v580_v19, %v577_v18  ;;  %vm3683_vm1 = vmpackc.low %vm781_vm0, %vm781_vm0 }
  0xb7   : > { %2670 = vmatprep.subr.bf16.mxu0 %v2669_v46 }
  0xb8   : > { %2700 = vmatpush3.bf16.msra.mxu1 %v2697_v50 }
  0xb9   : > { %2702 = vmatprep.subr.bf16.mxu1 %v2701_v59 }
  0xba   : > { %2672 = vmatpush1.bf16.msra.mxu0 %v2671_v51 }
  0xbb   : > { %2674 = vmatprep.subr.bf16.mxu0 %v2673_v55 }
  0xbc   : > { %2704 = vmatpush3.bf16.msra.mxu1 %v2701_v59 }
  0xbd   : > { %2706 = vmatprep.subr.bf16.mxu1 %v2705_v7 }
  0xbe   : > { %2676 = vmatpush1.bf16.msra.mxu0 %v2675_v60 }
  0xbf   : > { %2678 = vmatprep.subr.bf16.mxu0 %v2677_v2 }
  0xc0   : > { %2708 = vmatpush3.bf16.msra.mxu1 %v2705_v7 }
  0xc1   : > { %2710 = vmatprep.subr.bf16.mxu1 %v2709_v16 }
  0xc2   : > { %2680 = vmatpush1.bf16.msra.mxu0 %v2679_v8 }
  0xc3   : > { %2682 = vmatprep.subr.bf16.mxu0 %v2681_v12 }
  0xc4   : > { %2712 = vmatpush3.bf16.msra.mxu1 %v2709_v16 }
  0xc5   : > { %2714 = vmatprep.subr.bf16.mxu1 %v2713_v20 }
  0xc6   : > { %2684 = vmatpush1.bf16.msra.mxu0 %v2683_v17 }
  0xc8   : > { %2716 = vmatpush3.bf16.msra.mxu1 %v2713_v20 }
 0x133   : > { %v495_v26 = vpop.xlane.xlu0 %494 }
 0x134   : > { %v499_v27 = vmul.f32 0.0078125, %v495_v26 }
 0x136   : > { %v3660_v28 = vsub.f32 %v3653_v0, %v499_v27 }
 0x137   : > { %v497_v29 = vpop.xlane.xlu0 %496 }
 0x138   : > { %v500_v30 = vmul.f32 0.0078125, %v497_v29  ;;  %v503_v31 = vmul.f32 %v3660_v28, %v3660_v28  ;;  %v2346_v29 = vld [vmem:[%s3853_s1] ss:$0 sm:$0xff] }
 0x13a   : > { %v3665_v32 = vsub.f32 %v3656_v1, %v500_v30  ;;  %505 = vadd.xlane.f32.xlu1 %v503_v31  ;;  %v2347_v31 = vld [vmem:[%s3854_s2] ss:$0 sm:$0xff] }
 0x13c   : > { %v504_v33 = vmul.f32 %v3665_v32, %v3665_v32 }
 0x13e   : > { %507 = vadd.xlane.f32.xlu1 %v504_v33 }
 0x1c7   : > { %v506_v21 = vpop.xlane.xlu1 %505 }
 0x1c8   : > { %v509_v22 = vmul.f32 0.0078125, %v506_v21 }
 0x1ca   : > { %v511_v23 = vadd.f32 1e-06, %v509_v22 }
 0x1cb   : > { %v508_v24 = vpop.xlane.xlu1 %507 }
 0x1cc   : > { %3061 = vrsqrt.f32 %v511_v23  ;;  %v510_v25 = vmul.f32 0.0078125, %v508_v24 }
 0x1ce   : > { %v512_v26 = vadd.f32 1e-06, %v510_v25 }
 0x1d0   : > { %3063 = vrsqrt.f32 %v512_v26 }
 0x1d6   : > { %v3062_v27 = vpop.eup %3061 }
 0x1d7   : > { %v515_v30 = vmul.f32 %v3062_v27, %v3660_v28 }
 0x1d9   : > { %v523_v33 = vmul.f32 %v2346_v29, %v515_v30 }
 0x1da   : > { %v3064_v34 = vpop.eup %3063 }
 0x1db   : > { %v531_v35 = vadd.f32 %v2347_v31, %v523_v33  ;;  %v516_v36 = vmul.f32 %v3064_v34, %v3665_v32 }
 0x1dd   : > { %646 = vmatmul.mubr.f32.vlgmr.msra.gmra.mrb[0].mxu0 %v531_v35  ;;  %2559 = vmatprep.mubr.f32.mxu1 %v531_v35  ;;  %v524_v37 = vmul.f32 %v2346_v29, %v516_v36 }
 0x1de   : > { %651 = vmatprep.mubr.f32.mxu0 %v3346_v6 }
 0x1df   : > { %v532_v38 = vadd.f32 %v2347_v31, %v524_v37 }
 0x1e1   : > { %652 = vmatmul.mubr.f32.gmra.mrb[2].mxu0 %v532_v38  ;;  %2560 = vmatmul.mubr.f32.vlgmr.msra.gmra.mrb[0].mxu1 %v532_v38 }
 0x2b0   : > { %v647_v39 = vpop.f32.mrb[0].mxu0 }
 0x2b1   : > { %v649_v28 = vpop.f32.mrb[1].mxu0  ;;  %735 = vrot.lane.b32.xlu1 %v647_v39, %s3347_s16  ;;  %2566 = vmatprep.mubr.msk.f32.mxu1 %vm781_vm0, %v647_v39 }
 0x2b4   : > { %v653_v40 = vpop.f32.mrb[2].mxu0  ;;  %v2561_v41 = vpop.f32.mrb[0].mxu1 }
 0x2b5   : > { %v655_v42 = vpop.f32.mrb[3].mxu0  ;;  %v724_v32 = vpop.f32.mrb[1].mxu1 }
 0x2b6   : > { %v2717_v43 = vpack.c.bf16 %v655_v42, %v649_v28  ;;  %v2741_v44 = vpack.c.bf16 %v2561_v41, %v724_v32  ;;  %v3021_v45 = vpack.i.bf16 %v655_v42, %v649_v28  ;;  %v3687_v47 = vpack.i.bf16 %v2561_v41, %v724_v32 }
 0x2b8   : > { %2742 = vmatprep.subr.bf16.mxu0 %v2741_v44  ;;  %3022 = vrot.lane.b32.xlu1 %v3021_v45, %s3348_s3 }
 0x2b9   : > { %3017 = vrot.lane.b32.xlu0 %v3021_v45, %s3347_s16  ;;  %2719 = vmatprep.subr.msk.bf16.mxu1 %vm3683_vm1, %v2717_v43 }
 0x2ba   : > { %2722 = vmatpush3.bf16.xpose.msk.msra.mxu1 %vm3683_vm1, %v2717_v43  ;;  %2744 = vmatpush3.bf16.msra.mxu0 %v2741_v44 }
 0x2bc   : > { %737 = vrot.lane.b32.xlu1 %v653_v40, %s3347_s16 }
 0x2bd   : > { %3027 = vrot.lane.b32.xlu0 %v3021_v45, %s3349_s14 }
 0x2c0   : > { %739 = vrot.lane.b32.xlu1 %v647_v39, %s3348_s3 }
 0x2c1   : > { %741 = vrot.lane.b32.xlu0 %v653_v40, %s3348_s3  ;;  %2567 = vmatmul.mubr.msk.f32.vlgmr.msra.gmra.mrb[2].mxu1 %vm781_vm0, %v653_v40 }
 0x2c4   : > { %743 = vrot.lane.b32.xlu1 %v647_v39, %s3349_s14 }
 0x2c5   : > { %745 = vrot.lane.b32.xlu0 %v653_v40, %s3349_s14 }
 0x323   : > { %v736_v48 = vpop.permute.xlu1 %735 }
 0x324   : > { %2573 = vmatprep.mubr.msk.f32.mxu1 %vm781_vm0, %v736_v48 }
 0x32a   : > { %v3023_v49 = vpop.permute.xlu1 %3022 }
 0x32b   : > { %v3018_v50 = vpop.permute.xlu0 %3017  ;;  %v3025_v53 = vunpack.i.h.bf16 %v3023_v49  ;;  %v3024_v54 = vunpack.i.l.bf16 %v3023_v49 }
 0x32c   : > { %v3020_v51 = vunpack.i.h.bf16 %v3018_v50  ;;  %v3019_v52 = vunpack.i.l.bf16 %v3018_v50 }
 0x32d   : > { %v2729_v56 = vpack.c.bf16 %v3025_v53, %v3024_v54 }
 0x32e   : > { %v2723_v55 = vpack.c.bf16 %v3020_v51, %v3019_v52  ;;  %v738_v58 = vpop.permute.xlu1 %737 }
 0x32f   : > { %v3028_v57 = vpop.permute.xlu0 %3027 }
 0x330   : > { %2725 = vmatprep.subr.msk.bf16.mxu1 %vm3683_vm1, %v2723_v55  ;;  %v3030_v59 = vunpack.i.h.bf16 %v3028_v57  ;;  %v3029_v60 = vunpack.i.l.bf16 %v3028_v57 }
 0x331   : > { %2728 = vmatpush3.bf16.xpose.msk.msra.mxu1 %vm3683_vm1, %v2723_v55 }
 0x332   : > { %2731 = vmatprep.subr.msk.bf16.mxu1 %vm3683_vm1, %v2729_v56  ;;  %v2735_v61 = vpack.c.bf16 %v3030_v59, %v3029_v60  ;;  %v740_v62 = vpop.permute.xlu1 %739 }
 0x333   : > { %v742_v63 = vpop.permute.xlu0 %741 }
 0x336   : > { %v744_v2 = vpop.permute.xlu1 %743 }
 0x337   : > { %v746_v3 = vpop.permute.xlu0 %745 }
 0x338   : > { %2574 = vmatmul.mubr.msk.f32.vlgmr.msra.gmra.mrb[4].mxu1 %vm781_vm0, %v738_v58 }
 0x339   : > { %2734 = vmatpush3.bf16.xpose.msk.msra.mxu1 %vm3683_vm1, %v2729_v56  ;;  %2580 = vmatprep.mubr.msk.f32.mxu1 %vm781_vm0, %v740_v62 }
 0x33a   : > { %2737 = vmatprep.subr.msk.bf16.mxu1 %vm3683_vm1, %v2735_v61 }
 0x340   : > { %2581 = vmatmul.mubr.msk.f32.vlgmr.msra.gmra.mrb[6].mxu1 %vm781_vm0, %v742_v63 }
 0x341   : > { %2740 = vmatpush3.bf16.xpose.msk.msra.mxu1 %vm3683_vm1, %v2735_v61  ;;  %2587 = vmatprep.mubr.msk.f32.mxu1 %vm781_vm0, %v744_v2 }
 0x348   : > { %2588 = vmatmul.mubr.msk.f32.vlgmr.msra.gmra.mrb[8].mxu1 %vm781_vm0, %v746_v3 }
 0x394   : > { %v2568_v4 = vpop.f32.mrb[2].mxu1 }
 0x395   : > { %v856_v5 = vpop.f32.mrb[3].mxu1  ;;  %v1118_v7 = vsel %vm1114_vm2, %v2568_v4, -inf }
 0x396   : > { %1119 = vmax.xlane.f32.xlu0 %v1118_v7  ;;  %v1115_v8 = vsel %vm1114_vm2, %v856_v5, -inf }
 0x397   : > { %1116 = vmax.xlane.f32.xlu1 %v1115_v8 }
 0x40b   : > { %v2575_v9 = vpop.f32.mrb[4].mxu1 }
 0x40c   : > { %v939_v10 = vpop.f32.mrb[5].mxu1  ;;  %v1124_v11 = vsel %vm1114_vm2, %v2575_v9, -inf }
 0x40d   : > { %1125 = vmax.xlane.f32.xlu0 %v1124_v11  ;;  %v1121_v12 = vsel %vm1114_vm2, %v939_v10, -inf }
 0x411   : > { %1122 = vmax.xlane.f32.xlu0 %v1121_v12 }
 0x413   : > { %v2582_v13 = vpop.f32.mrb[6].mxu1 }
 0x414   : > { %v1022_v14 = vpop.f32.mrb[7].mxu1  ;;  %v1130_v15 = vsel %vm1114_vm2, %v2582_v13, -inf }
 0x415   : > { %1131 = vmax.xlane.f32.xlu0 %v1130_v15  ;;  %v1127_v16 = vsel %vm1114_vm2, %v1022_v14, -inf }
 0x416   : > { %1128 = vmax.xlane.f32.xlu1 %v1127_v16 }
 0x41b   : > { %v2589_v17 = vpop.f32.mrb[8].mxu1 }
 0x41c   : > { %v1105_v18 = vpop.f32.mrb[9].mxu1  ;;  %v1136_v19 = vsel %vm1114_vm2, %v2589_v17, -inf }
 0x41d   : > { %1137 = vmax.xlane.f32.xlu0 %v1136_v19  ;;  %v1133_v20 = vsel %vm1114_vm2, %v1105_v18, -inf }
 0x41e   : > { %1134 = vmax.xlane.f32.xlu1 %v1133_v20 }
 0x423   : > { %v1120_v21 = vpop.xlane.xlu0 %1119 }
 0x424   : > { %v1140_v22 = vsub.f32 %v2568_v4, %v1120_v21  ;;  %v1117_v26 = vpop.xlane.xlu1 %1116 }
 0x425   : > { %v1139_v27 = vsub.f32 %v856_v5, %v1117_v26 }
 0x426   : > { %v1149_v23 = vmul.f32 1.442695, %v1140_v22 }
 0x427   : > { %v1147_v29 = vmul.f32 1.442695, %v1139_v27 }
 0x428   : > { %3065 = vpow2.f32 %v1149_v23 }
 0x429   : > { %3067 = vpow2.f32 %v1147_v29 }
 0x42f   : > { %3032 = vrot.lane.b32.xlu1 %v3687_v47, %s3347_s16 }
 0x432   : > { %v3730_v24 = vpop.eup %3065 }
 0x433   : > { %v1166_v25 = vsel %vm1114_vm2, %v3730_v24, 0.0  ;;  %v3068_v30 = vpop.eup %3067 }
 0x434   : > { %1167 = vadd.xlane.f32.xlu0 %v1166_v25  ;;  %v1163_v31 = vsel %vm1114_vm2, %v3068_v30, 0.0 }
 0x453   : > { %1164 = vadd.xlane.f32.xlu1 %v1163_v31 }
 0x49a   : > { %v1126_v33 = vpop.xlane.xlu0 %1125 }
 0x49b   : > { %v1142_v34 = vsub.f32 %v2575_v9, %v1126_v33 }
 0x49d   : > { %v1153_v35 = vmul.f32 1.442695, %v1142_v34 }
 0x49e   : > { %v1123_v36 = vpop.xlane.xlu0 %1122 }
 0x49f   : > { %3069 = vpow2.f32 %v1153_v35  ;;  %v1141_v37 = vsub.f32 %v939_v10, %v1123_v36 }
 0x4a1   : > { %v1151_v38 = vmul.f32 1.442695, %v1141_v37 }
 0x4a2   : > { %v1132_v39 = vpop.xlane.xlu0 %1131 }
 0x4a3   : > { %3071 = vpow2.f32 %v1151_v38  ;;  %v1144_v28 = vsub.f32 %v2582_v13, %v1132_v39  ;;  %v1129_v40 = vpop.xlane.xlu1 %1128  ;;  %v1559_v38 = vld [vmem:[#allocation7] sm:$0xff]  ;;  %v1560_v39 = vld [vmem:[#allocation7 + $0x8] sm:$0xff] }
 0x4a4   : > { %v1143_v41 = vsub.f32 %v1022_v14, %v1129_v40  ;;  %v2757_v40 = vpack.c.bf16 %v1560_v39, %v1559_v38  ;;  %v1706_v38 = vld [vmem:[#allocation8 + $0x38] sm:$0xff]  ;;  %v1699_v39 = vld [vmem:[#allocation8] sm:$0xff] }
 0x4a5   : > { %v1157_v42 = vmul.f32 1.442695, %v1144_v28  ;;  %v1561_v28 = vld [vmem:[#allocation7 + $0x10] sm:$0xff] }
 0x4a6   : > { %v1155_v32 = vmul.f32 1.442695, %v1143_v41  ;;  %v1562_v41 = vld [vmem:[#allocation7 + $0x18] sm:$0xff] }
 0x4a7   : > { %3073 = vpow2.f32 %v1157_v42  ;;  %v2761_v42 = vpack.c.bf16 %v1562_v41, %v1561_v28  ;;  %v1703_v28 = vld [vmem:[#allocation8 + $0x20] sm:$0xff] }
 0x4a8   : > { %3075 = vpow2.f32 %v1155_v32  ;;  %v1563_v32 = vld [vmem:[#allocation7 + $0x20] sm:$0xff]  ;;  %v2791_v41 = vpack.c.bf16 %v1703_v28, %v1699_v39  ;;  %v1737_v39 = vld [vmem:[#allocation8 + $0x130] sm:$0xff] }
 0x4a9   : > { %v3070_v43 = vpop.eup %3069 }
 0x4aa   : > { %v1138_v44 = vpop.xlane.xlu0 %1137  ;;  %v1172_v45 = vsel %vm1114_vm2, %v3070_v43, 0.0 }
 0x4ab   : > { %v1146_v46 = vsub.f32 %v2589_v17, %v1138_v44  ;;  %1173 = vadd.xlane.f32.xlu0 %v1172_v45  ;;  %v1135_v48 = vpop.xlane.xlu1 %1134  ;;  %v1565_v45 = vld [vmem:[#allocation7 + $0x30] sm:$0xff] }
 0x4ac   : > { %v1145_v49 = vsub.f32 %v1105_v18, %v1135_v48 }
 0x4ad   : > { %v3072_v50 = vpop.eup %3071  ;;  %v1161_v51 = vmul.f32 1.442695, %v1146_v46  ;;  %v1566_v46 = vld [vmem:[#allocation7 + $0x38] sm:$0xff] }
 0x4ae   : > { %v1159_v52 = vmul.f32 1.442695, %v1145_v49  ;;  %v1169_v53 = vsel %vm1114_vm2, %v3072_v50, 0.0  ;;  %v2769_v48 = vpack.c.bf16 %v1566_v46, %v1565_v45  ;;  %v1714_v45 = vld [vmem:[#allocation8 + $0x78] sm:$0xff] }
 0x4af   : > { %3077 = vpow2.f32 %v1161_v51  ;;  %1170 = vadd.xlane.f32.xlu1 %v1169_v53  ;;  %v3033_v54 = vpop.permute.xlu1 %3032  ;;  %v1567_v51 = vld [vmem:[#allocation7 + $0x40] sm:$0xff] }
 0x4b0   : > { %3079 = vpow2.f32 %v1159_v52  ;;  %v3035_v55 = vunpack.i.h.bf16 %v3033_v54  ;;  %v3034_v56 = vunpack.i.l.bf16 %v3033_v54  ;;  %v1568_v52 = vld [vmem:[#allocation7 + $0x48] sm:$0xff]  ;;  %v1569_v54 = vld [vmem:[#allocation7 + $0x50] sm:$0xff] }
 0x4b1   : > { %v3074_v57 = vpop.eup %3073  ;;  %v2773_v53 = vpack.c.bf16 %v1568_v52, %v1567_v51  ;;  %v1709_v51 = vld [vmem:[#allocation8 + $0x50] sm:$0xff] }
 0x4b2   : > { %v3076_v58 = vpop.eup %3075  ;;  %v2745_v59 = vpack.c.bf16 %v3035_v55, %v3034_v56  ;;  %v1178_v60 = vsel %vm1114_vm2, %v3074_v57, 0.0  ;;  %v1570_v55 = vld [vmem:[#allocation7 + $0x58] sm:$0xff]  ;;  %v1571_v56 = vld [vmem:[#allocation7 + $0x60] sm:$0xff] }
 0x4b3   : > { %1179 = vadd.xlane.f32.xlu0 %v1178_v60  ;;  %v1175_v61 = vsel %vm1114_vm2, %v3076_v58, 0.0 }
 0x4b4   : > { %1176 = vadd.xlane.f32.xlu1 %v1175_v61  ;;  %2746 = vmatprep.subr.bf16.mxu1 %v2745_v59 }
 0x4b5   : > { %2748 = vmatpush3.bf16.msra.mxu1 %v2745_v59 }
 0x4b9   : > { %v3078_v62 = vpop.eup %3077 }
 0x4ba   : > { %v3080_v63 = vpop.eup %3079  ;;  %v1184_v2 = vsel %vm1114_vm2, %v3078_v62, 0.0 }
 0x4bb   : > { %1185 = vadd.xlane.f32.xlu0 %v1184_v2  ;;  %v1181_v3 = vsel %vm1114_vm2, %v3080_v63, 0.0 }
 0x4bc   : > { %1182 = vadd.xlane.f32.xlu1 %v1181_v3 }
 0x4c1   : > { %v1168_v4 = vpop.xlane.xlu0 %1167 }
 0x4c2   : > { %3081 = vrcp.f32 %v1168_v4 }
 0x4cc   : > { %v3082_v7 = vpop.eup %3081 }
 0x4cd   : > { %3042 = vrot.lane.b32.xlu1 %v3687_v47, %s3349_s14  ;;  %v1196_v10 = vmul.f32 %v3082_v7, %v3730_v24 }
 0x4d1   : > { %3037 = vrot.lane.b32.xlu0 %v3687_v47, %s3348_s3 }
 0x4e0   : > { %v1165_v5 = vpop.xlane.xlu1 %1164 }
 0x4e1   : > { %3083 = vrcp.f32 %v1165_v5 }
 0x4eb   : > { %v3084_v8 = vpop.eup %3083 }
 0x4ec   : > { %v1195_v9 = vmul.f32 %v3084_v8, %v3068_v30 }
 0x4ee   : > { %2594 = vmatprep.mubr.msk.f32.mxu0 %vm1114_vm2, %v1195_v9 }
 0x4ef   : > { %2595 = vmatmul.mubr.msk.f32.vlgmr.msra.gmra.mrb[4].mxu0 %vm1114_vm2, %v1196_v10 }
 0x538   : > { %v1174_v11 = vpop.xlane.xlu0 %1173 }
 0x539   : > { %3085 = vrcp.f32 %v1174_v11 }
 0x53c   : > { %v1171_v12 = vpop.xlane.xlu1 %1170 }
 0x53d   : > { %3087 = vrcp.f32 %v1171_v12 }
 0x540   : > { %v1180_v47 = vpop.xlane.xlu0 %1179 }
 0x541   : > { %v1177_v13 = vpop.xlane.xlu1 %1176 }
 0x542   : > { %3089 = vrcp.f32 %v1177_v13 }
 0x543   : > { %v3086_v14 = vpop.eup %3085  ;;  %3091 = vrcp.f32 %v1180_v47 }
 0x544   : > { %v1198_v18 = vmul.f32 %v3086_v14, %v3070_v43  ;;  %v1564_v43 = vld [vmem:[#allocation7 + $0x28] sm:$0xff] }
 0x545   : > { %v2765_v44 = vpack.c.bf16 %v1564_v43, %v1563_v32  ;;  %v1705_v32 = vld [vmem:[#allocation8 + $0x30] sm:$0xff] }
 0x547   : > { %v3088_v15 = vpop.eup %3087 }
 0x548   : > { %v1186_v16 = vpop.xlane.xlu0 %1185  ;;  %v1197_v17 = vmul.f32 %v3088_v15, %v3072_v50 }
 0x549   : > { %3093 = vrcp.f32 %v1186_v16  ;;  %v1183_v19 = vpop.xlane.xlu1 %1182 }
 0x54a   : > { %3095 = vrcp.f32 %v1183_v19  ;;  %2601 = vmatprep.mubr.msk.f32.mxu1 %vm1114_vm2, %v1197_v17 }
 0x54b   : > { %2602 = vmatmul.mubr.msk.f32.vlgmr.msra.gmra.mrb[10].mxu1 %vm1114_vm2, %v1198_v18 }
 0x54c   : > { %v3090_v20 = vpop.eup %3089  ;;  %v3038_v21 = vpop.permute.xlu0 %3037 }
 0x54d   : > { %v3040_v22 = vunpack.i.h.bf16 %v3038_v21  ;;  %v3039_v23 = vunpack.i.l.bf16 %v3038_v21  ;;  %v3043_v24 = vpop.permute.xlu1 %3042  ;;  %v1199_v25 = vmul.f32 %v3090_v20, %v3076_v58  ;;  %v3092_v30 = vpop.eup %3091  ;;  %v1572_v58 = vld [vmem:[#allocation7 + $0x68] sm:$0xff] }
 0x54e   : > { %v3045_v26 = vunpack.i.h.bf16 %v3043_v24  ;;  %v3044_v27 = vunpack.i.l.bf16 %v3043_v24  ;;  %v1200_v34 = vmul.f32 %v3092_v30, %v3074_v57  ;;  %v2777_v57 = vpack.c.bf16 %v1570_v55, %v1569_v54  ;;  %v1716_v54 = vld [vmem:[#allocation8 + $0x88] sm:$0xff] }
 0x54f   : > { %v2749_v29 = vpack.c.bf16 %v3040_v22, %v3039_v23  ;;  %2608 = vmatprep.mubr.msk.f32.mxu0 %vm1114_vm2, %v1199_v25  ;;  %v2781_v59 = vpack.c.bf16 %v1572_v58, %v1571_v56  ;;  %v2372_v25 = vld [vmem:[%s3857_s5] ss:$0 sm:$0xff]  ;;  %v1720_v55 = vld [vmem:[#allocation8 + $0xa8] sm:$0xff]  ;;  %v1718_v58 = vld [vmem:[#allocation8 + $0x98] sm:$0xff] }
 0x550   : > { %v2753_v31 = vpack.c.bf16 %v3045_v26, %v3044_v27 }
 0x551   : > { %2750 = vmatprep.subr.bf16.mxu0 %v2749_v29 }
 0x552   : > { %2752 = vmatpush3.bf16.msra.mxu0 %v2749_v29  ;;  %2754 = vmatprep.subr.bf16.mxu1 %v2753_v31 }
 0x553   : > { %v3094_v33 = vpop.eup %3093  ;;  %2756 = vmatpush3.bf16.msra.mxu1 %v2753_v31  ;;  %2758 = vmatprep.subr.bf16.mxu0 %v2757_v40 }
 0x554   : > { %v3096_v35 = vpop.eup %3095  ;;  %v1202_v37 = vmul.f32 %v3094_v33, %v3078_v62  ;;  %v1573_v62 = vld [vmem:[#allocation7 + $0x70] sm:$0xff] }
 0x555   : > { %2609 = vmatmul.mubr.msk.f32.vlgmr.msra.gmra.mrb[6].mxu0 %vm1114_vm2, %v1200_v34  ;;  %v1201_v36 = vmul.f32 %v3096_v35, %v3080_v63  ;;  %v1574_v63 = vld [vmem:[#allocation7 + $0x78] sm:$0xff]  ;;  %v1700_v34 = vld [vmem:[#allocation8 + $0x8] sm:$0xff] }
 0x556   : > { %2760 = vmatpush3.bf16.msra.mxu0 %v2757_v40  ;;  %v2785_v3 = vpack.c.bf16 %v1574_v63, %v1573_v62  ;;  %v1704_v35 = vld [vmem:[#allocation8 + $0x28] sm:$0xff]  ;;  %v1719_v62 = vld [vmem:[#allocation8 + $0xa0] sm:$0xff]  ;;  %v1717_v63 = vld [vmem:[#allocation8 + $0x90] sm:$0xff] }
 0x557   : > { %2615 = vmatprep.mubr.msk.f32.mxu1 %vm1114_vm2, %v1201_v36  ;;  %2762 = vmatprep.subr.bf16.mxu0 %v2761_v42  ;;  %v1702_v36 = vld [vmem:[#allocation8 + $0x18] sm:$0xff] }
 0x558   : > { %2616 = vmatmul.mubr.msk.f32.vlgmr.msra.gmra.mrb[12].mxu1 %vm1114_vm2, %v1202_v37  ;;  %v2789_v37 = vpack.c.bf16 %v1704_v35, %v1700_v34  ;;  %v2821_v40 = vpack.c.bf16 %v1706_v38, %v1702_v36  ;;  %v1731_v34 = vld [vmem:[#allocation8 + $0x100] sm:$0xff]  ;;  %v1733_v38 = vld [vmem:[#allocation8 + $0x110] sm:$0xff] }
 0x559   : > { %1849 = vmatprep.mubr.f32.mxu1 %v3346_v6  ;;  %v1735_v35 = vld [vmem:[#allocation8 + $0x120] sm:$0xff]  ;;  %v2839_v28 = vpack.c.bf16 %v1737_v39, %v1733_v38  ;;  %v1997_v38 = vld [vmem:[#allocation10 + $0x90] sm:$0xff] }
 0x55a   : > { %2764 = vmatpush3.bf16.msra.mxu0 %v2761_v42  ;;  %v1701_v42 = vld [vmem:[#allocation8 + $0x10] sm:$0xff]  ;;  %2790 = vmatprep.subr.bf16.mxu1 %v2789_v37  ;;  %v2807_v37 = vpack.c.bf16 %v1735_v35, %v1731_v34  ;;  %v1979_v34 = vld [vmem:[#allocation10] sm:$0xff]  ;;  %v1980_v35 = vld [vmem:[#allocation10 + $0x8] sm:$0xff] }
 0x55b   : > { %2766 = vmatprep.subr.bf16.mxu0 %v2765_v44  ;;  %v2823_v43 = vpack.c.bf16 %v1705_v32, %v1701_v42  ;;  %2792 = vmatpush1.bf16.msra.mxu1 %v2791_v41  ;;  %v1744_v41 = vld [vmem:[#allocation8 + $0x168] sm:$0xff]  ;;  %v1742_v42 = vld [vmem:[#allocation8 + $0x158] sm:$0xff] }
 0x55e   : > { %2768 = vmatpush3.bf16.msra.mxu0 %v2765_v44  ;;  %v1710_v44 = vld [vmem:[#allocation8 + $0x58] sm:$0xff] }
 0x55f   : > { %2770 = vmatprep.subr.bf16.mxu0 %v2769_v48 }
 0x562   : > { %2772 = vmatpush3.bf16.msra.mxu0 %v2769_v48  ;;  %v2825_v48 = vpack.c.bf16 %v1714_v45, %v1710_v44 }
 0x563   : > { %2774 = vmatprep.subr.bf16.mxu0 %v2773_v53 }
 0x566   : > { %2776 = vmatpush3.bf16.msra.mxu0 %v2773_v53  ;;  %v1713_v53 = vld [vmem:[#allocation8 + $0x70] sm:$0xff] }
 0x567   : > { %2778 = vmatprep.subr.bf16.mxu0 %v2777_v57  ;;  %v2827_v56 = vpack.c.bf16 %v1713_v53, %v1709_v51  ;;  %v1752_v51 = vld [vmem:[#allocation8 + $0x1a8] sm:$0xff]  ;;  %v1754_v53 = vld [vmem:[#allocation8 + $0x1b8] sm:$0xff] }
 0x56a   : > { %2780 = vmatpush3.bf16.msra.mxu0 %v2777_v57  ;;  %v2797_v57 = vpack.c.bf16 %v1720_v55, %v1716_v54 }
 0x56b   : > { %2782 = vmatprep.subr.bf16.mxu0 %v2781_v59 }
 0x56e   : > { %2784 = vmatpush3.bf16.msra.mxu0 %v2781_v59  ;;  %v1722_v59 = vld [vmem:[#allocation8 + $0xb8] sm:$0xff] }
 0x56f   : > { %2786 = vmatprep.subr.bf16.mxu0 %v2785_v3 }
 0x572   : > { %2788 = vmatpush3.bf16.msra.mxu0 %v2785_v3 }
 0x573   : > { %2822 = vmatprep.subr.bf16.mxu0 %v2821_v40  ;;  %v1740_v40 = vld [vmem:[#allocation8 + $0x148] sm:$0xff] }
 0x574   : > { %v2809_v32 = vpack.c.bf16 %v1744_v41, %v1740_v40  ;;  %v2029_v40 = vld [vmem:[#allocation10 + $0x190] sm:$0xff]  ;;  %v2030_v41 = vld [vmem:[#allocation10 + $0x198] sm:$0xff] }
 0x5c2   : > { %v2596_v49 = vpop.f32.mrb[4].mxu0 }
 0x5c3   : > { %v1275_v50 = vpop.f32.mrb[5].mxu0 }
 0x61e   : > { %v2603_v60 = vpop.f32.mrb[10].mxu1 }
 0x61f   : > { %v1356_v61 = vpop.f32.mrb[11].mxu1 }
 0x620   : > { %v3046_v2 = vpack.i.bf16 %v2603_v60, %v1356_v61  ;;  %v1715_v60 = vld [vmem:[#allocation8 + $0x80] sm:$0xff]  ;;  %v2829_v61 = vpack.c.bf16 %v1722_v59, %v1718_v58  ;;  %v1749_v58 = vld [vmem:[#allocation8 + $0x190] sm:$0xff] }
 0x621   : > { %v2799_v3 = vpack.c.bf16 %v1719_v62, %v1715_v60  ;;  %v1753_v60 = vld [vmem:[#allocation8 + $0x1b0] sm:$0xff]  ;;  %v1760_v62 = vld [vmem:[#allocation8 + $0x1e8] sm:$0xff] }
 0x622   : > { %3047 = vrot.lane.b32.xlu1 %v3046_v2, %s3349_s14  ;;  %v1721_v2 = vld [vmem:[#allocation8 + $0xb0] sm:$0xff]  ;;  %s489_s14 = scalar_lea.vmem [#allocation11], %s2340_s17  ;;  %s2205_s17 = scalar_lea.sflag [#allocation4], %s3635_s21 }
 0x623   : > { %s2218_s26 = sshll.u32 %s489_s14, 4  ;;  %s3802_s26 = int_to_ptr.vmem [resolvable:$true] %s2218_s26 }
 0x624   : > { %s3259_s27 = scalar_lea.vmem %s3802_s26, 256  ;;  %p3266_p12 = scmp.lt.s32.totalorder %s3802_s26, %s3264_s29 }
 0x625   : > { %p3260_p3 = scmp.ne.s32.totalorder %s3802_s26, %s3259_s27 }
 0x627   : > { %p3261_p5 = pnand %p3260_p3, %p3580_p10 }
 0x628   : > { %v2610_v4 = vpop.f32.mrb[6].mxu0 }
 0x629   : > { %v1437_v5 = vpop.f32.mrb[7].mxu0  ;;  %p3262_p7 = pneg %p3261_p5 }
 0x62a   : > { %v3051_v7 = vpack.i.bf16 %v2610_v4, %v1437_v5  ;;  %v2831_v4 = vpack.c.bf16 %v1721_v2, %v1717_v63  ;;  %v2847_v63 = vpack.c.bf16 %v1753_v60, %v1749_v58  ;;  %v1984_v60 = vld [vmem:[#allocation10 + $0x28] sm:$0xff] }
 0x62b   : > { %v2617_v8 = vpop.f32.mrb[12].mxu1 }
 0x62c   : > { %3052 = vrot.lane.b32.xlu1 %v3051_v7, %s3348_s3  ;;  %v1518_v9 = vpop.f32.mrb[13].mxu1  ;;  %s3895_s3 = sld [smem:[#allocation20_spill]] }
 0x62d   : > { %v3056_v10 = vpack.i.bf16 %v2617_v8, %v1518_v9 }
 0x62f   : > { %3057 = vrot.lane.b32.xlu0 %v3056_v10, %s3347_s16 }
 0x694   : > { %v3048_v11 = vpop.permute.xlu1 %3047 }
 0x695   : > { %v3050_v12 = vunpack.i.h.bf16 %v3048_v11  ;;  %v3049_v13 = vunpack.i.l.bf16 %v3048_v11 }
 0x697   : > { %v1552_v17 = vsel %vm781_vm0, %v2596_v49, %v3050_v12  ;;  %v1551_v20 = vsel %vm781_vm0, %v1275_v50, %v3049_v13  ;;  %v1707_v49 = vld [vmem:[#allocation8 + $0x40] sm:$0xff] }
 0x698   : > { %v1711_v50 = vld [vmem:[#allocation8 + $0x60] sm:$0xff] }
 0x699   : > { %v2795_v52 = vpack.c.bf16 %v1711_v50, %v1707_v49  ;;  %v1748_v49 = vld [vmem:[#allocation8 + $0x188] sm:$0xff] }
 0x69a   : > { %v2813_v54 = vpack.c.bf16 %v1752_v51, %v1748_v49  ;;  %v2014_v49 = vld [vmem:[#allocation10 + $0x118] sm:$0xff] }
 0x69e   : > { %v3053_v47 = vpop.permute.xlu1 %3052 }
 0x69f   : > { %v3055_v14 = vunpack.i.h.bf16 %v3053_v47  ;;  %v3054_v15 = vunpack.i.l.bf16 %v3053_v47  ;;  %v1724_v47 = vld [vmem:[#allocation8 + $0xc8] sm:$0xff] }
 0x6a1   : > { %v3058_v16 = vpop.permute.xlu0 %3057  ;;  %v1554_v21 = vsel %vm1553_vm3, %v1551_v20, %v3054_v15  ;;  %v1555_v22 = vsel %vm1553_vm3, %v1552_v17, %v3055_v14  ;;  %v1728_v14 = vld [vmem:[#allocation8 + $0xe8] sm:$0xff]  ;;  %v1726_v15 = vld [vmem:[#allocation8 + $0xd8] sm:$0xff] }
 0x6a2   : > { %v3060_v18 = vunpack.i.h.bf16 %v3058_v16  ;;  %v3059_v19 = vunpack.i.l.bf16 %v3058_v16  ;;  %v2801_v16 = vpack.c.bf16 %v1728_v14, %v1724_v47  ;;  %v1730_v17 = vld [vmem:[#allocation8 + $0xf8] sm:$0xff]  ;;  %v1995_v14 = vld [vmem:[#allocation10 + $0x80] sm:$0xff] }
 0x6a3   : > { %v2833_v20 = vpack.c.bf16 %v1730_v17, %v1726_v15  ;;  %v1996_v15 = vld [vmem:[#allocation10 + $0x88] sm:$0xff] }
 0x6a4   : > { %v1557_v23 = vsel %vm1556_vm4, %v1554_v21, %v3059_v19  ;;  %v1558_v24 = vsel %vm1556_vm4, %v1555_v22, %v3060_v18  ;;  %v1723_v18 = vld [vmem:[#allocation8 + $0xc0] sm:$0xff]  ;;  %v1725_v22 = vld [vmem:[#allocation8 + $0xd0] sm:$0xff]  ;;  %v2853_v17 = vpack.c.bf16 %v1996_v15, %v1995_v14  ;;  %v2018_v14 = vld [vmem:[#allocation10 + $0x138] sm:$0xff] }
 0x6a5   : > { %2650 = vmatprep.mubr.f32.mxu0 %v1557_v23  ;;  %v1727_v19 = vld [vmem:[#allocation8 + $0xe0] sm:$0xff]  ;;  %v1729_v23 = vld [vmem:[#allocation8 + $0xf0] sm:$0xff] }
 0x6a6   : > { %2651 = vmatmul.mubr.f32.vlgmr.msra.gmra.mrb[8].mxu0 %v1558_v24  ;;  %v2803_v21 = vpack.c.bf16 %v1727_v19, %v1723_v18  ;;  %v2835_v24 = vpack.c.bf16 %v1729_v23, %v1725_v22  ;;  %v2028_v18 = vld [vmem:[#allocation10 + $0x188] sm:$0xff] }
 0x6a7   : > { %1926 = vmatprep.mubr.f32.mxu0 %v3346_v6  ;;  %2824 = vmatpush1.bf16.msra.mxu0 %v2823_v43  ;;  %v1739_v43 = vld [vmem:[#allocation8 + $0x140] sm:$0xff] }
 0x6a8   : > { %2826 = vmatprep.subr.bf16.mxu0 %v2825_v48  ;;  %v1745_v48 = vld [vmem:[#allocation8 + $0x170] sm:$0xff] }
 0x6ab   : > { %2828 = vmatpush1.bf16.msra.mxu0 %v2827_v56  ;;  %v1747_v56 = vld [vmem:[#allocation8 + $0x180] sm:$0xff] }
 0x6ac   : > { %2830 = vmatprep.subr.bf16.mxu0 %v2829_v61  ;;  %v1756_v61 = vld [vmem:[#allocation8 + $0x1c8] sm:$0xff] }
 0x6ad   : > { %v2817_v2 = vpack.c.bf16 %v1760_v62, %v1756_v61  ;;  %v2015_v61 = vld [vmem:[#allocation10 + $0x120] sm:$0xff]  ;;  %v2016_v62 = vld [vmem:[#allocation10 + $0x128] sm:$0xff] }
 0x6af   : > { %2832 = vmatpush1.bf16.msra.mxu0 %v2831_v4  ;;  %v1762_v4 = vld [vmem:[#allocation8 + $0x1f8] sm:$0xff] }
 0x6b0   : > { %2834 = vmatprep.subr.bf16.mxu0 %v2833_v20 }
 0x6b3   : > { %2836 = vmatpush1.bf16.msra.mxu0 %v2835_v24 }
 0x779   : > { %v2652_v26 = vpop.f32.mrb[8].mxu0 }
 0x77a   : > { %v1654_v27 = vadd.f32 %v2652_v26, %v2372_v25  ;;  %v1648_v29 = vpop.f32.mrb[9].mxu0  ;;  %v1736_v26 = vld [vmem:[#allocation8 + $0x128] sm:$0xff] }
 0x77b   : > { %v1649_v30 = vadd.f32 %v2372_v25, %v1648_v29  ;;  %v1732_v25 = vld [vmem:[#allocation8 + $0x108] sm:$0xff] }
 0x77c   : > { %v3765_v31 = vadd.f32 %v1654_v27, %v3656_v1  ;;  %v1708_v1 = vld [vmem:[#allocation8 + $0x48] sm:$0xff]  ;;  %v1734_v27 = vld [vmem:[#allocation8 + $0x118] sm:$0xff]  ;;  %v2805_v29 = vpack.c.bf16 %v1736_v26, %v1732_v25 }
 0x77d   : > { %v3768_v33 = vadd.f32 %v1649_v30, %v3653_v0  ;;  %v1712_v0 = vld [vmem:[#allocation8 + $0x68] sm:$0xff]  ;;  %v1738_v30 = vld [vmem:[#allocation8 + $0x138] sm:$0xff] }
 0x77e   : > { %1663 = vadd.xlane.f32.xlu0 %v3765_v31  ;;  %v2793_v46 = vpack.c.bf16 %v1712_v0, %v1708_v1  ;;  %v2837_v36 = vpack.c.bf16 %v1738_v30, %v1734_v27  ;;  %v1746_v1 = vld [vmem:[#allocation8 + $0x178] sm:$0xff]  ;;  %v1743_v0 = vld [vmem:[#allocation8 + $0x160] sm:$0xff] }
 0x77f   : > { %1661 = vadd.xlane.f32.xlu1 %v3768_v33  ;;  %v2841_v44 = vpack.c.bf16 %v1746_v1, %v1742_v42  ;;  %v2811_v45 = vpack.c.bf16 %v1743_v0, %v1739_v43  ;;  %v2373_v27 = vld [vmem:[%s3858_s6] ss:$0 sm:$0xff]  ;;  %v2855_v43 = vpack.c.bf16 %v1980_v35, %v1979_v34  ;;  %v2037_v34 = vld [vmem:[#allocation10 + $0x1d0] sm:$0xff] }
 0x780   : > { %2794 = vmatprep.subr.bf16.mxu1 %v2793_v46  ;;  %2838 = vmatprep.subr.bf16.mxu0 %v2837_v36  ;;  %v1741_v46 = vld [vmem:[#allocation8 + $0x150] sm:$0xff]  ;;  %v2011_v36 = vld [vmem:[#allocation10 + $0x100] sm:$0xff] }
 0x781   : > { %2796 = vmatpush1.bf16.msra.mxu1 %v2795_v52  ;;  %2840 = vmatpush1.bf16.msra.mxu0 %v2839_v28  ;;  %v2843_v50 = vpack.c.bf16 %v1745_v48, %v1741_v46  ;;  %v1750_v52 = vld [vmem:[#allocation8 + $0x198] sm:$0xff]  ;;  %v2889_v48 = vpack.c.bf16 %v2030_v41, %v2029_v40  ;;  %v2021_v40 = vld [vmem:[#allocation10 + $0x150] sm:$0xff] }
 0x782   : > { %2798 = vmatprep.subr.bf16.mxu1 %v2797_v57  ;;  %2842 = vmatprep.subr.bf16.mxu0 %v2841_v44  ;;  %v2845_v55 = vpack.c.bf16 %v1754_v53, %v1750_v52  ;;  %v1751_v57 = vld [vmem:[#allocation8 + $0x1a0] sm:$0xff]  ;;  %v1998_v28 = vld [vmem:[#allocation10 + $0x98] sm:$0xff]  ;;  %v1981_v44 = vld [vmem:[#allocation10 + $0x10] sm:$0xff] }
 0x783   : > { %v2815_v59 = vpack.c.bf16 %v1751_v57, %v1747_v56  ;;  %v2857_v46 = vpack.c.bf16 %v1998_v28, %v1997_v38  ;;  %v2000_v52 = vld [vmem:[#allocation10 + $0xa8] sm:$0xff]  ;;  %v2031_v53 = vld [vmem:[#allocation10 + $0x1a0] sm:$0xff]  ;;  %v1990_v38 = vld [vmem:[#allocation10 + $0x58] sm:$0xff] }
 0x784   : > { %v1983_v57 = vld [vmem:[#allocation10 + $0x20] sm:$0xff]  ;;  %v2022_v41 = vld [vmem:[#allocation10 + $0x158] sm:$0xff] }
 0x785   : > { %2800 = vmatpush1.bf16.msra.mxu1 %v2799_v3  ;;  %2844 = vmatpush1.bf16.msra.mxu0 %v2843_v50  ;;  %v1758_v3 = vld [vmem:[#allocation8 + $0x1d8] sm:$0xff]  ;;  %v1999_v50 = vld [vmem:[#allocation10 + $0xa0] sm:$0xff] }
 0x786   : > { %2802 = vmatprep.subr.bf16.mxu1 %v2801_v16  ;;  %2846 = vmatprep.subr.bf16.mxu0 %v2845_v55  ;;  %v2027_v16 = vld [vmem:[#allocation10 + $0x180] sm:$0xff]  ;;  %v2861_v58 = vpack.c.bf16 %v2000_v52, %v1999_v50  ;;  %v2024_v50 = vld [vmem:[#allocation10 + $0x168] sm:$0xff]  ;;  %v2009_v52 = vld [vmem:[#allocation10 + $0xf0] sm:$0xff] }
 0x787   : > { %v2885_v19 = vpack.c.bf16 %v2028_v18, %v2027_v16  ;;  %v2003_v16 = vld [vmem:[#allocation10 + $0xc0] sm:$0xff] }
 0x788   : > { %v2035_v18 = vld [vmem:[#allocation10 + $0x1c0] sm:$0xff] }
 0x789   : > { %2804 = vmatpush1.bf16.msra.mxu1 %v2803_v21  ;;  %2848 = vmatpush1.bf16.msra.mxu0 %v2847_v63  ;;  %v2863_v63 = vpack.c.bf16 %v1984_v60, %v1983_v57  ;;  %v1994_v57 = vld [vmem:[#allocation10 + $0x78] sm:$0xff]  ;;  %v2025_v60 = vld [vmem:[#allocation10 + $0x170] sm:$0xff] }
 0x78a   : > { %2806 = vmatprep.subr.bf16.mxu1 %v2805_v29  ;;  %v2374_v29 = vld [vmem:[%s3859_s7] ss:$0 sm:$0xff] }
 0x78d   : > { %2808 = vmatpush1.bf16.msra.mxu1 %v2807_v37  ;;  %v2012_v37 = vld [vmem:[#allocation10 + $0x108] sm:$0xff] }
 0x78e   : > { %2810 = vmatprep.subr.bf16.mxu1 %v2809_v32  ;;  %v2887_v0 = vpack.c.bf16 %v2012_v37, %v2011_v36  ;;  %v2038_v36 = vld [vmem:[#allocation10 + $0x1d8] sm:$0xff]  ;;  %v1989_v37 = vld [vmem:[#allocation10 + $0x50] sm:$0xff] }
 0x78f   : > { %v2875_v28 = vpack.c.bf16 %v1990_v38, %v1989_v37 }
 0x791   : > { %2812 = vmatpush1.bf16.msra.mxu1 %v2811_v45  ;;  %v1982_v45 = vld [vmem:[#allocation10 + $0x18] sm:$0xff] }
 0x792   : > { %2814 = vmatprep.subr.bf16.mxu1 %v2813_v54  ;;  %v2032_v54 = vld [vmem:[#allocation10 + $0x1a8] sm:$0xff]  ;;  %v2859_v55 = vpack.c.bf16 %v1982_v45, %v1981_v44  ;;  %v1991_v45 = vld [vmem:[#allocation10 + $0x60] sm:$0xff] }
 0x793   : > { %v2040_v44 = vld [vmem:[#allocation10 + $0x1e8] sm:$0xff] }
 0x795   : > { %2816 = vmatpush1.bf16.msra.mxu1 %v2815_v59  ;;  %v2893_v59 = vpack.c.bf16 %v2032_v54, %v2031_v53  ;;  %v2010_v53 = vld [vmem:[#allocation10 + $0xf8] sm:$0xff]  ;;  %v2041_v54 = vld [vmem:[#allocation10 + $0x1f0] sm:$0xff] }
 0x796   : > { %2818 = vmatprep.subr.bf16.mxu1 %v2817_v2  ;;  %v2895_v2 = vpack.c.bf16 %v2016_v62, %v2015_v61  ;;  %v2026_v61 = vld [vmem:[#allocation10 + $0x178] sm:$0xff] }
 0x797   : > { %v2915_v62 = vpack.c.bf16 %v2026_v61, %v2025_v60 }
 0x80b   : > { %v1664_v5 = vpop.xlane.xlu0 %1663 }
 0x80c   : > { %v1662_v7 = vpop.xlane.xlu1 %1661  ;;  %v1666_v8 = vmul.f32 0.0078125, %v1664_v5  ;;  %v1755_v5 = vld [vmem:[#allocation8 + $0x1c0] sm:$0xff] }
 0x80d   : > { %v1665_v9 = vmul.f32 0.0078125, %v1662_v7  ;;  %v2849_v7 = vpack.c.bf16 %v1762_v4, %v1758_v3  ;;  %v2002_v3 = vld [vmem:[#allocation10 + $0xb8] sm:$0xff]  ;;  %v2033_v4 = vld [vmem:[#allocation10 + $0x1b0] sm:$0xff] }
 0x80e   : > { %v3776_v11 = vsub.f32 %v3765_v31, %v1666_v8  ;;  %v1759_v8 = vld [vmem:[#allocation8 + $0x1e0] sm:$0xff] }
 0x80f   : > { %v3773_v10 = vsub.f32 %v3768_v33, %v1665_v9  ;;  %v1757_v9 = vld [vmem:[#allocation8 + $0x1d0] sm:$0xff]  ;;  %2850 = vmatprep.subr.bf16.mxu0 %v2849_v7  ;;  %v2034_v7 = vld [vmem:[#allocation10 + $0x1b8] sm:$0xff] }
 0x810   : > { %v1670_v13 = vmul.f32 %v3776_v11, %v3776_v11 }
 0x811   : > { %v1669_v12 = vmul.f32 %v3773_v10, %v3773_v10 }
 0x813   : > { %1671 = vadd.xlane.f32.xlu0 %v1669_v12  ;;  %v1761_v12 = vld [vmem:[#allocation8 + $0x1f0] sm:$0xff] }
 0x814   : > { %v2851_v47 = vpack.c.bf16 %v1761_v12, %v1757_v9  ;;  %v1986_v9 = vld [vmem:[#allocation10 + $0x38] sm:$0xff]  ;;  %v2897_v12 = vpack.c.bf16 %v2034_v7, %v2033_v4  ;;  %v1763_v4 = vld [vmem:[%s3894_s11] sm:$0xf]  ;;  %s3265_s11 = scalar_lea.vmem %s3264_s29, 512 }
 0x815   : > { %p3267_p2 = scmp.lt.s32.totalorder %s3265_s11, %s3259_s27 }
 0x816   : > { %2852 = vmatpush1.bf16.msra.mxu0 %v2851_v47  ;;  %v2017_v47 = vld [vmem:[#allocation10 + $0x130] sm:$0xff] }
 0x817   : > { %1673 = vadd.xlane.f32.xlu0 %v1670_v13  ;;  %v2819_v13 = vpack.c.bf16 %v1759_v8, %v1755_v5  ;;  %2886 = vmatprep.subr.bf16.mxu0 %v2885_v19  ;;  %v1985_v8 = vld [vmem:[#allocation10 + $0x30] sm:$0xff]  ;;  %v2899_v15 = vpack.c.bf16 %v2018_v14, %v2017_v47  ;;  %p3268_p1 = por %p3267_p2, %p3266_p12 }
 0x819   : > { %2820 = vmatpush1.bf16.msra.mxu1 %v2819_v13  ;;  %v2867_v13 = vpack.c.bf16 %v1986_v9, %v1985_v8  ;;  %p3269_p13 = pnand %p3268_p1, %p3262_p7 }
 0x81a   : > { %2854 = vmatprep.subr.bf16.mxu1 %v2853_v17  ;;  %v2004_v17 = vld [vmem:[#allocation10 + $0xc8] sm:$0xff] }
 0x81b   : > { %v2869_v19 = vpack.c.bf16 %v2004_v17, %v2003_v16 }
 0x8a0   : > { %v1672_v20 = vpop.xlane.xlu0 %1671 }
 0x8a1   : > { %v1675_v21 = vmul.f32 0.0078125, %v1672_v20  ;;  %v2036_v20 = vld [vmem:[#allocation10 + $0x1c8] sm:$0xff] }
 0x8a3   : > { %v1677_v22 = vadd.f32 1e-06, %v1675_v21  ;;  %v1987_v21 = vld [vmem:[#allocation10 + $0x40] sm:$0xff] }
 0x8a4   : > { %v1674_v23 = vpop.xlane.xlu0 %1673 }
 0x8a5   : > { %3097 = vrsqrt.f32 %v1677_v22  ;;  %v1676_v24 = vmul.f32 0.0078125, %v1674_v23  ;;  %v1988_v22 = vld [vmem:[#allocation10 + $0x48] sm:$0xff]  ;;  %v2901_v23 = vpack.c.bf16 %v2036_v20, %v2035_v18 }
 0x8a7   : > { %v1678_v25 = vadd.f32 1e-06, %v1676_v24  ;;  %v2871_v24 = vpack.c.bf16 %v1988_v22, %v1987_v21 }
 0x8a9   : > { %3099 = vrsqrt.f32 %v1678_v25  ;;  %v2019_v25 = vld [vmem:[#allocation10 + $0x140] sm:$0xff] }
 0x8af   : > { %v3098_v26 = vpop.eup %3097 }
 0x8b0   : > { %v1681_v30 = vmul.f32 %v3098_v26, %v3773_v10  ;;  %v2013_v10 = vld [vmem:[#allocation10 + $0x110] sm:$0xff]  ;;  %v2020_v26 = vld [vmem:[#allocation10 + $0x148] sm:$0xff] }
 0x8b1   : > { %v2891_v56 = vpack.c.bf16 %v2014_v49, %v2013_v10  ;;  %v2023_v49 = vld [vmem:[#allocation10 + $0x160] sm:$0xff] }
 0x8b2   : > { %v1689_v39 = vmul.f32 %v2373_v27, %v1681_v30  ;;  %v2006_v30 = vld [vmem:[#allocation10 + $0xd8] sm:$0xff] }
 0x8b3   : > { %v3100_v42 = vpop.eup %3099 }
 0x8b4   : > { %v1697_v32 = vadd.f32 %v2374_v29, %v1689_v39  ;;  %v1682_v1 = vmul.f32 %v3100_v42, %v3776_v11  ;;  %v2905_v39 = vpack.c.bf16 %v2038_v36, %v2037_v34  ;;  %v2907_v42 = vpack.c.bf16 %v2022_v41, %v2021_v40 }
 0x8b6   : > { %1850 = vmatmul.mubr.f32.vlgmr.msra.gmra.mrb[14].mxu1 %v1697_v32  ;;  %1927 = vmatmul.mubr.f32.vlgmr.msra.gmra.mrb[10].mxu0 %v1697_v32  ;;  %v1690_v51 = vmul.f32 %v2373_v27, %v1682_v1  ;;  %v2903_v27 = vpack.c.bf16 %v2020_v26, %v2019_v25  ;;  %v2007_v32 = vld [vmem:[#allocation10 + $0xe0] sm:$0xff]  ;;  %v2008_v1 = vld [vmem:[#allocation10 + $0xe8] sm:$0xff] }
 0x8b7   : > { %1855 = vmatprep.mubr.f32.mxu1 %v3346_v6  ;;  %1932 = vmatprep.mubr.f32.mxu0 %v3346_v6  ;;  %v2001_v6 = vld [vmem:[#allocation10 + $0xb0] sm:$0xff] }
 0x8b8   : > { %v1698_v11 = vadd.f32 %v2374_v29, %v1690_v51  ;;  %2856 = vmatpush3.bf16.msra.mxu1 %v2855_v43  ;;  %2888 = vmatpush3.bf16.msra.mxu0 %v2887_v0  ;;  %v2865_v5 = vpack.c.bf16 %v2002_v3, %v2001_v6  ;;  %v2005_v29 = vld [vmem:[#allocation10 + $0xd0] sm:$0xff]  ;;  %v2039_v43 = vld [vmem:[#allocation10 + $0x1e0] sm:$0xff]  ;;  %v2877_v0 = vpack.c.bf16 %v2008_v1, %v2007_v32 }
 0x8b9   : > { %2858 = vmatprep.subr.bf16.mxu1 %v2857_v46  ;;  %2890 = vmatprep.subr.bf16.mxu0 %v2889_v48  ;;  %v2873_v35 = vpack.c.bf16 %v2006_v30, %v2005_v29  ;;  %v1992_v46 = vld [vmem:[#allocation10 + $0x68] sm:$0xff]  ;;  %v2909_v48 = vpack.c.bf16 %v2040_v44, %v2039_v43  ;;  %v2911_v51 = vpack.c.bf16 %v2024_v50, %v2023_v49 }
 0x8ba   : > { %1856 = vmatmul.mubr.f32.gmra.mrb[16].mxu1 %v1698_v11  ;;  %1933 = vmatmul.mubr.f32.gmra.mrb[12].mxu0 %v1698_v11  ;;  %v2879_v10 = vpack.c.bf16 %v1992_v46, %v1991_v45  ;;  %v2881_v11 = vpack.c.bf16 %v2010_v53, %v2009_v52 }
 0x8bc   : > { %2860 = vmatpush3.bf16.msra.mxu1 %v2859_v55  ;;  %2892 = vmatpush3.bf16.msra.mxu0 %v2891_v56  ;;  %v2042_v55 = vld [vmem:[#allocation10 + $0x1f8] sm:$0xff]  ;;  %v1993_v56 = vld [vmem:[#allocation10 + $0x70] sm:$0xff] }
 0x8bd   : > { %2862 = vmatprep.subr.bf16.mxu1 %v2861_v58  ;;  %2894 = vmatprep.subr.bf16.mxu0 %v2893_v59  ;;  %v2913_v58 = vpack.c.bf16 %v2042_v55, %v2041_v54  ;;  %v2883_v59 = vpack.c.bf16 %v1994_v57, %v1993_v56 }
 0x8c0   : > { %2864 = vmatpush3.bf16.msra.mxu1 %v2863_v63  ;;  %2896 = vmatpush3.bf16.msra.mxu0 %v2895_v2  ;;  %v1765_v63 = vlaneseq }
 0x8c1   : > { %2866 = vmatprep.subr.bf16.mxu1 %v2865_v5  ;;  %2898 = vmatprep.subr.bf16.mxu0 %v2897_v12 }
 0x8c2   : > { %v1766_v2 = vshrl.u32 %v1765_v63, 7 }
 0x8c4   : > { %2868 = vmatpush3.bf16.msra.mxu1 %v2867_v13  ;;  %2900 = vmatpush3.bf16.msra.mxu0 %v2899_v15  ;;  %v1767_v6 = vsub.s32 0, %v1766_v2  ;;  %v1775_v3 = vsub.s32 2, %v1766_v2  ;;  %v1771_v5 = vsub.s32 1, %v1766_v2  ;;  %v1779_v7 = vsub.s32 3, %v1766_v2 }
 0x8c5   : > { %2870 = vmatprep.subr.bf16.mxu1 %v2869_v19  ;;  %2902 = vmatprep.subr.bf16.mxu0 %v2901_v23 }
 0x8c6   : > { %v1768_v8 = vrot.slane %v1763_v4, %v1767_v6  ;;  %v1776_v9 = vrot.slane %v1763_v4, %v1775_v3  ;;  %v1772_v12 = vrot.slane %v1763_v4, %v1771_v5  ;;  %v1780_v13 = vrot.slane %v1763_v4, %v1779_v7 }
 0x8c8   : > { %2872 = vmatpush3.bf16.msra.mxu1 %v2871_v24  ;;  %2904 = vmatpush3.bf16.msra.mxu0 %v2903_v27 }
 0x8c9   : > { %2874 = vmatprep.subr.bf16.mxu1 %v2873_v35  ;;  %2906 = vmatprep.subr.bf16.mxu0 %v2905_v39 }
 0x8cc   : > { %2876 = vmatpush3.bf16.msra.mxu1 %v2875_v28  ;;  %2908 = vmatpush3.bf16.msra.mxu0 %v2907_v42 }
 0x8cd   : > { %2878 = vmatprep.subr.bf16.mxu1 %v2877_v0  ;;  %2910 = vmatprep.subr.bf16.mxu0 %v2909_v48 }
 0x8d0   : > { %2880 = vmatpush3.bf16.msra.mxu1 %v2879_v10  ;;  %2912 = vmatpush3.bf16.msra.mxu0 %v2911_v51 }
 0x8d1   : > { %2882 = vmatprep.subr.bf16.mxu1 %v2881_v11  ;;  %2914 = vmatprep.subr.bf16.mxu0 %v2913_v58 }
 0x8d4   : > { %2884 = vmatpush3.bf16.msra.mxu1 %v2883_v59  ;;  %2916 = vmatpush3.bf16.msra.mxu0 %v2915_v62 }
 0x989   : > { %v1851_v47 = vpop.f32.mrb[14].mxu1  ;;  %v1928_v14 = vpop.f32.mrb[10].mxu0 }
 0x98a   : > { %v1852_v15 = vadd.f32 %v1851_v47, %v1768_v8  ;;  %v1929_v16 = vadd.f32 %v1928_v14, %v1776_v9  ;;  %v1853_v17 = vpop.f32.mrb[15].mxu1  ;;  %v1930_v18 = vpop.f32.mrb[11].mxu0 }
 0x98b   : > { %v1854_v19 = vadd.f32 %v1853_v17, %v1772_v12  ;;  %v1931_v20 = vadd.f32 %v1930_v18, %v1780_v13 }
 0x98c   : > { %v1947_v21 = vmul.f32 0.70710677, %v1852_v15  ;;  %v1949_v22 = vmul.f32 0.70710677, %v1929_v16  ;;  %v1939_v45 = vmul.f32 0.5, %v1852_v15  ;;  %v1941_v49 = vmul.f32 0.5, %v1929_v16 }
 0x98d   : > { %v1948_v23 = vmul.f32 0.70710677, %v1854_v19  ;;  %v1950_v24 = vmul.f32 0.70710677, %v1931_v20  ;;  %v1857_v25 = vpop.f32.mrb[16].mxu1  ;;  %v1934_v26 = vpop.f32.mrb[12].mxu0 }
 0x98e   : > { %3101 = verf.f32 %v1947_v21  ;;  %v1858_v27 = vadd.f32 %v1857_v25, %v1768_v8  ;;  %v1935_v29 = vadd.f32 %v1934_v26, %v1776_v9  ;;  %v1859_v30 = vpop.f32.mrb[17].mxu1  ;;  %v1936_v34 = vpop.f32.mrb[13].mxu0  ;;  %v1940_v0 = vmul.f32 0.5, %v1854_v19  ;;  %v2375_v8 = vld [vmem:[%s3895_s3] ss:$0 sm:$0xff] }
 0x98f   : > { %3103 = verf.f32 %v1949_v22  ;;  %v1860_v35 = vadd.f32 %v1859_v30, %v1772_v12  ;;  %v1937_v36 = vadd.f32 %v1936_v34, %v1780_v13  ;;  %v1942_v46 = vmul.f32 0.5, %v1931_v20 }
 0x990   : > { %3105 = verf.f32 %v1948_v23  ;;  %v1951_v37 = vmul.f32 0.70710677, %v1858_v27  ;;  %v1953_v38 = vmul.f32 0.70710677, %v1935_v29  ;;  %v1943_v60 = vmul.f32 0.5, %v1858_v27 }
 0x991   : > { %3107 = verf.f32 %v1950_v24  ;;  %v1952_v39 = vmul.f32 0.70710677, %v1860_v35  ;;  %v1954_v28 = vmul.f32 0.70710677, %v1937_v36  ;;  %v1944_v58 = vmul.f32 0.5, %v1860_v35 }
 0x992   : > { %3109 = verf.f32 %v1951_v37  ;;  %v1946_v61 = vmul.f32 0.5, %v1937_v36  ;;  %v1945_v63 = vmul.f32 0.5, %v1935_v29 }
 0x993   : > { %3111 = verf.f32 %v1953_v38 }
 0x994   : > { %3113 = verf.f32 %v1952_v39 }
 0x995   : > { %3115 = verf.f32 %v1954_v28 }
 0x998   : > { %v3102_v40 = vpop.eup %3101 }
 0x999   : > { %v3104_v41 = vpop.eup %3103  ;;  %v1963_v32 = vadd.f32 1.0, %v3102_v40 }
 0x99a   : > { %v3106_v42 = vpop.eup %3105  ;;  %v1965_v43 = vadd.f32 1.0, %v3104_v41 }
 0x99b   : > { %v3108_v1 = vpop.eup %3107  ;;  %v1964_v44 = vadd.f32 1.0, %v3106_v42  ;;  %v1971_v52 = vmul.f32 %v1963_v32, %v1939_v45 }
 0x99c   : > { %v1966_v48 = vadd.f32 1.0, %v3108_v1  ;;  %v3110_v10 = vpop.eup %3109  ;;  %v1973_v11 = vmul.f32 %v1965_v43, %v1941_v49 }
 0x99d   : > { %v1972_v50 = vmul.f32 %v1964_v44, %v1940_v0  ;;  %v3112_v51 = vpop.eup %3111  ;;  %v1967_v55 = vadd.f32 1.0, %v3110_v10 }
 0x99e   : > { %v1974_v53 = vmul.f32 %v1966_v48, %v1942_v46  ;;  %v3114_v54 = vpop.eup %3113  ;;  %v1969_v57 = vadd.f32 1.0, %v3112_v51 }
 0x99f   : > { %2114 = vmatprep.mubr.f32.mxu1 %v1972_v50  ;;  %v3116_v56 = vpop.eup %3115  ;;  %v1968_v59 = vadd.f32 1.0, %v3114_v54  ;;  %v1975_v3 = vmul.f32 %v1967_v55, %v1943_v60 }
 0x9a0   : > { %2189 = vmatprep.mubr.f32.mxu0 %v1974_v53  ;;  %2115 = vmatmul.mubr.f32.vlgmr.msra.gmra.mrb[18].mxu1 %v1971_v52  ;;  %v1970_v62 = vadd.f32 1.0, %v3116_v56  ;;  %v1977_v4 = vmul.f32 %v1969_v57, %v1945_v63 }
 0x9a1   : > { %2190 = vmatmul.mubr.f32.vlgmr.msra.gmra.mrb[14].mxu0 %v1973_v11  ;;  %v1976_v2 = vmul.f32 %v1968_v59, %v1944_v58 }
 0x9a2   : > { %v1978_v6 = vmul.f32 %v1970_v62, %v1946_v61 }
 0x9a3   : > { %2119 = vmatprep.mubr.f32.mxu1 %v1976_v2 }
 0x9a4   : > { %2194 = vmatprep.mubr.f32.mxu0 %v1978_v6  ;;  %2120 = vmatmul.mubr.f32.gmra.mrb[20].mxu1 %v1975_v3 }
 0x9a5   : > { %2195 = vmatmul.mubr.f32.gmra.mrb[16].mxu0 %v1977_v4 }
 0xa73   : > { %v2483_v5 = vpop.f32.mrb[18].mxu1 }
 0xa74   : > { %v2521_v7 = vpop.f32.mrb[14].mxu0  ;;  %v2484_v9 = vpop.f32.mrb[19].mxu1 }
 0xa75   : > { %v2485_v12 = vadd.f32 %v2484_v9, %v2483_v5  ;;  %v2522_v13 = vpop.f32.mrb[15].mxu0 }
 0xa76   : > { %v2523_v47 = vadd.f32 %v2522_v13, %v2521_v7 }
 0xa77   : > { %v2117_v14 = vadd.f32 %v2485_v12, %v2375_v8  ;;  %v2486_v15 = vpop.f32.mrb[20].mxu1 }
 0xa78   : > { %v2524_v17 = vpop.f32.mrb[16].mxu0  ;;  %v2487_v18 = vpop.f32.mrb[21].mxu1 }
 0xa79   : > { %v2192_v16 = vadd.f32 %v2523_v47, %v2117_v14  ;;  %v2488_v19 = vadd.f32 %v2487_v18, %v2486_v15  ;;  %v2525_v20 = vpop.f32.mrb[17].mxu0 }
 0xa7a   : > { %v2526_v22 = vadd.f32 %v2525_v20, %v2524_v17 }
 0xa7b   : > { %v2200_v21 = vadd.f32 %v2192_v16, %v3768_v33  ;;  %v2122_v23 = vadd.f32 %v2488_v19, %v2375_v8 }
 0xa7d   : > { %2202 = vst [vmem:[%s489_s14] sm:$0xff] %v2200_v21  ;;  %v2197_v24 = vadd.f32 %v2526_v22, %v2122_v23 }
 0xa7f   : > { %v2201_v33 = vadd.f32 %v2197_v24, %v3765_v31 }
 0xa81   : > { %2203 = vst [vmem:[%s489_s14 + $0x8] sm:$0xff] %v2201_v33 }
 0xa82   : > { %3272 = shalt.err (!%p3269_p13)
}
 0xa83   : > { %s3273_s9 = scalar_lea.hbm %s3807_s12, 256  ;;  %s3277_s14 = scalar_lea.hbm %s3896_s28, 512 }
 0xa84   : > { %p3274_p9 = scmp.ne.s32.totalorder %s3807_s12, %s3273_s9  ;;  %p3278_p4 = scmp.lt.u32.totalorder %s3807_s12, %s3896_s28 }
 0xa85   : > { %p3279_p8 = scmp.lt.u32.totalorder %s3277_s14, %s3273_s9  ;;  %p3281_p3 = scmp.lt.u32.totalorder %s3273_s9, %s3807_s12 }
 0xa86   : > { %p3275_p0 = pnand %p3274_p9, %p3580_p10 }
 0xa87   : > { %p3280_p6 = por %p3279_p8, %p3278_p4 }
 0xa88   : > { %p3276_p11 = pneg %p3275_p0 }
 0xa89   : > { %p3282_p5 = por %p3281_p3, %p3280_p6 }
 0xa8b   : > { %p3283_p7 = pnand %p3282_p5, %p3276_p11 }
 0xa8d   : > { %3286 = shalt.err (!%p3283_p7)
}
 0xa8e   : > { %s3351_s13 = smov 128   ;;  %s3352_s27 = smov 8  }
 0xa8f   : > { %2935 = dma.vmem_to_hbm [thread:$0]  (%p3580_p10), %s3802_s26, 256, %s3807_s12, %s2205_s17, %s3351_s13, %s3351_s13, %s3352_s27  }
 0xa90 PF: > { %s3897_s25 = sld [smem:[#allocation16_spill]]  ;;  %s3898_s29 = sld [smem:[#allocation17_spill]] }
 0xa91   : > { %p3900_p2 = scmp.ge.s32.totalorder %s3333_s24, 2 }
 0xa96   : > { %s2233_s11 = sand.u32 1, %s3897_s25   ;;  %p3899_p12 = scmp.ne.s32.totalorder %s3898_s29, 0 }
 0xa97   : > { %s2234_s9 = scalar_lea.sflag [#allocation4], %s2233_s11 }
 0xa98   : > { %p2955_p1 = pnand %p3900_p2, %p3899_p12 }
 0xa9a   : > { %3316 = dma.done.wait (!%p2955_p1), %s2234_s9, 256  }
 0xa9b   : > { %3318 = vsyncadd (!%p2955_p1), %s2234_s9, 4294967040  ;;  %p27_p13 = scmp.ge.s32.totalorder %s3570_s30, 4   ;;  %s3901_s21 = smov %s3325_s22 }
 0xa9c   : > { %s3902_s22 = smov %s3329_s23  ;;  %s3903_s23 = smov %s3586_s20 }
 0xa9d   : > { %s3904_s24 = smov %s3570_s30  ;;  %29 = sbr.rel (!%p27_p13) target bundleno = 12 (0xc), region = 129 }
 0xaa4   :  { %2239 = vsyncpa [#allocation3], 1 }
 0xaa5   :  { %2241 = vsyncpa [#allocation3 + $0x1], 1 }
 0xaa6   :  { %2242 = vsyncpa [#allocation6], 1 }
 0xaa7   :  { %2243 = vsyncpa [#allocation9], 1 }
 0xaa8   :  { %2244 = vsyncpa [#allocation4], 1 }
 0xaa9   :  { %2246 = vsyncpa [#allocation4 + $0x1], 1 }

// kernel: tpu_custom_call.1
= control target key start
LH: loop header
LB: loop body
LE: loop exit
PB: predicated region body
PF: predicated region fallthrough
CT: control target
= control target key end

     0   :  { %s3852_s0 = inlined_call_operand.hbm [shape: f32[2,16,128], index: 0, kind: input, shape index: {}]   ;;  %s3853_s1 = inlined_call_operand.vmem [shape: f32[1,128], index: 1, kind: input, shape index: {}]   ;;  %s3854_s2 = inlined_call_operand.vmem [shape: f32[1,128], index: 2, kind: input, shape index: {}]   ;;  %s3855_s3 = inlined_call_operand.hbm [shape: f32[128,384], index: 3, kind: input, shape index: {}]   ;;  %s3856_s4 = inlined_call_operand.hbm [shape: f32[128,128], index: 4, kind: input, shape index: {}]   ;;  %s3857_s5 = inlined_call_operand.vmem [shape: f32[1,128], index: 5, kind: input, shape index: {}]   ;;  %s3858_s6 = inlined_call_operand.vmem [shape: f32[1,128], index: 6, kind: input, shape index: {}]   ;;  %s3859_s7 = inlined_call_operand.vmem [shape: f32[1,128], index: 7, kind: input, shape index: {}]   ;;  %s3860_s8 = inlined_call_operand.hbm [shape: f32[128,512], index: 8, kind: input, shape index: {}]   ;;  %s3861_s9 = inlined_call_operand.vmem [shape: f32[1,512], index: 9, kind: input, shape index: {}]   ;;  %s3862_s10 = inlined_call_operand.hbm [shape: f32[512,128], index: 10, kind: input, shape index: {}]   ;;  %s3863_s11 = inlined_call_operand.vmem [shape: f32[1,128], index: 11, kind: input, shape index: {}]   ;;  %s3864_s12 = inlined_call_operand.hbm [shape: f32[2,16,128], index: 12, kind: output, shape index: {}]  }
   0x1   :  { %3871 = sst [smem:[#allocation18_spill]] %s3855_s3 }
   0x2   :  { %3872 = sst [smem:[#allocation19_spill]] %s3861_s9 }
   0x3   :  { %3873 = sst [smem:[#allocation20_spill]] %s3863_s11 }
   0x4   :  { %3874 = sst [smem:[#allocation21_spill]] %s3864_s12 }
   0x5   :  { %17 = vsyncpa [#allocation3], 0 }
   0x6   :  { %19 = vsyncpa [#allocation3 + $0x1], 0 }
   0x7   :  { %20 = vsyncpa [#allocation6], 0 }
   0x8   :  { %21 = vsyncpa [#allocation9], 0 }
   0x9   :  { %22 = vsyncpa [#allocation4], 0 }
   0xa   :  { %24 = vsyncpa [#allocation4 + $0x1], 0  ;;  %s3418_s21 = smov 0   ;;  %s3420_s22 = smov 0  }
   0xb   :  { %s3422_s23 = smov 0   ;;  %s3424_s24 = smov 0  }
   0xc LB: > { %3875 = sst [smem:[#allocation16_spill]] %s3321_s21  ;;  %s3439_s25 = sadd.s32 4294967295, %s3333_s24   ;;  %s3333_s24 = sphi %s3424_s24, %s3904_s24   ;;  %s3329_s23 = sphi %s3422_s23, %s3903_s23   ;;  %s3325_s22 = sphi %s3420_s22, %s3902_s22   ;;  %s3321_s21 = sphi %s3418_s21, %s3901_s21  }
   0xd   : > { %s2329_s26 = sadd.s32 4294967294, %s3333_s24   ;;  %p50_p0 = scmp.ne.s32.totalorder %s3325_s22, %s3321_s21 }
   0xe   : > { %p3866_p1 = scmp.eq.s32.totalorder %s3439_s25, 0  ;;  %p311_p3 = scmp.eq.s32.totalorder %s2329_s26, 1 }
   0xf   : > { %p2330_p5 = scmp.ge.s32.totalorder %s3333_s24, 1  ;;  %p318_p7 = scmp.lt.s32.totalorder %s3333_s24, 3 }
  0x10   : > { %p3448_p4 = por %p3866_p1, %p50_p0  ;;  %p3453_p6 = por %p311_p3, %p50_p0 }
  0x11   : > { %p3458_p8 = pnand %p2330_p5, %p318_p7  ;;  %s3335_s30 = smov [#allocation5]  }
  0x12   : > { %s3876_s27 = scalar_select %p3448_p4, 1, 0 }
  0x13   : > { %s3877_s28 = scalar_select %p3453_p6, 1, 0 }
  0x14   : > { %s3879_s29 = scalar_select %p3458_p8, 1, 0 }
  0x15   : > { %3878 = sst [smem:[#allocation17_spill]] %s3877_s28  ;;  %s336_s13 = sshll.u32 %s3335_s30, 4  ;;  %s3462_s13 = int_to_ptr.vmem [resolvable:$true] %s336_s13 }
  0x16   : > { %p2937_p9 = pneg %p3458_p8  ;;  %s3336_s15 = smov [#allocation8]  }
  0x17   : > { %s371_s16 = sshll.u32 %s3336_s15, 4  ;;  %s3881_s3 = sld [smem:[#allocation18_spill]]  ;;  %s3473_s16 = int_to_ptr.vmem [resolvable:$true] %s371_s16 }
  0x18   : > { %p3469_p11 = pnand %p2937_p9, %p3866_p1 }
  0x1a   : > { %p3483_p13 = pneg %p3469_p11 }
  0x1d   : > { %s3117_s19 = scalar_lea.hbm %s3881_s3, 6144 }
  0x1e   : > { %p3118_p12 = scmp.ne.s32.totalorder %s3881_s3, %s3117_s19  ;;  %p3124_p5 = scmp.lt.u32.totalorder %s3117_s19, %s3881_s3 }
  0x20   : > { %p3120_p0 = pnand %p3483_p13, %p3118_p12 }
  0x22   : > { %p3121_p3 = pneg %p3120_p0 }
  0x24   : > { %p3126_p7 = pnand %p3124_p5, %p3121_p3 }
  0x26   : > { %3129 = shalt.err (!%p3126_p7)
}
  0x27   : > { %s3130_s17 = scalar_lea.vmem %s3462_s13, 6144  ;;  %p3138_p2 = scmp.lt.s32.totalorder %s3462_s13, %s3462_s13 }
  0x28   : > { %p3131_p9 = scmp.ne.s32.totalorder %s3462_s13, %s3130_s17  ;;  %p3139_p6 = scmp.lt.s32.totalorder %s3130_s17, %s3130_s17 }
  0x2a   : > { %p3133_p10 = pnand %p3131_p9, %p3483_p13  ;;  %p3140_p12 = por %p3139_p6, %p3138_p2 }
  0x2c   : > { %p3134_p1 = pneg %p3133_p10 }
  0x2e   : > { %p3141_p0 = pnand %p3140_p12, %p3134_p1 }
  0x30   : > { %3144 = shalt.err (!%p3141_p0)
}
  0x31   : > { %s3337_s18 = smov 384   ;;  %s3338_s28 = smov 24  }
  0x32   : > { %2940 = dma.hbm_to_vmem [thread:$0]  (!%p3469_p11), %s3881_s3, 6144, %s3462_s13, [#allocation6], %s3337_s18, %s3337_s18, %s3338_s28  }
  0x33   : > { %s3145_s21 = scalar_lea.hbm %s3860_s8, 8192 }
  0x34   : > { %p3146_p2 = scmp.ne.s32.totalorder %s3860_s8, %s3145_s21  ;;  %p3152_p10 = scmp.lt.u32.totalorder %s3145_s21, %s3860_s8 }
  0x36   : > { %p3148_p1 = pnand %p3146_p2, %p3483_p13 }
  0x38   : > { %p3149_p6 = pneg %p3148_p1 }
  0x3a   : > { %p3154_p3 = pnand %p3152_p10, %p3149_p6 }
  0x3c   : > { %3157 = shalt.err (!%p3154_p3)
}
  0x3d   : > { %s3158_s13 = scalar_lea.vmem %s3473_s16, 8192  ;;  %p3166_p12 = scmp.lt.s32.totalorder %s3473_s16, %s3473_s16 }
  0x3e   : > { %p3159_p5 = scmp.ne.s32.totalorder %s3473_s16, %s3158_s13  ;;  %p3167_p0 = scmp.lt.s32.totalorder %s3158_s13, %s3158_s13 }
  0x40   : > { %p3161_p7 = pnand %p3159_p5, %p3483_p13  ;;  %p3168_p2 = por %p3167_p0, %p3166_p12 }
  0x42   : > { %p3162_p9 = pneg %p3161_p7 }
  0x44   : > { %p3169_p1 = pnand %p3168_p2, %p3162_p9 }
  0x46   : > { %3172 = shalt.err (!%p3169_p1)
}
  0x47   : > { %s3339_s11 = smov 512   ;;  %s3340_s9 = smov 32  }
  0x48   : > { %2946 = dma.hbm_to_vmem [thread:$0]  (!%p3469_p11), %s3860_s8, 8192, %s3473_s16, [#allocation9], %s3339_s11, %s3339_s11, %s3340_s9  }
  0x49   : > { %s3341_s18 = smov [#allocation7]   ;;  %s3173_s26 = scalar_lea.hbm %s3856_s4, 2048 }
  0x4a   : > { %s349_s28 = sshll.u32 %s3341_s18, 4  ;;  %p3174_p6 = scmp.ne.s32.totalorder %s3856_s4, %s3173_s26  ;;  %s350_s28 = int_to_ptr.vmem [resolvable:$true] %s349_s28 }
  0x4b   : > { %p3180_p5 = scmp.lt.u32.totalorder %s3173_s26, %s3856_s4 }
  0x4c   : > { %p3176_p10 = pnand %p3174_p6, %p3483_p13 }
  0x4e   : > { %p3177_p3 = pneg %p3176_p10 }
  0x50   : > { %p3182_p7 = pnand %p3180_p5, %p3177_p3 }
  0x52   : > { %3185 = shalt.err (!%p3182_p7)
}
  0x53   : > { %s3186_s16 = scalar_lea.vmem %s350_s28, 2048  ;;  %p3194_p2 = scmp.lt.s32.totalorder %s350_s28, %s350_s28 }
  0x54   : > { %p3187_p9 = scmp.ne.s32.totalorder %s350_s28, %s3186_s16  ;;  %p3195_p1 = scmp.lt.s32.totalorder %s3186_s16, %s3186_s16 }
  0x56   : > { %p3189_p12 = pnand %p3187_p9, %p3483_p13  ;;  %p3196_p4 = por %p3195_p1, %p3194_p2 }
  0x58   : > { %p3190_p0 = pneg %p3189_p12 }
  0x5a   : > { %p3197_p8 = pnand %p3196_p4, %p3190_p0 }
  0x5c   : > { %3200 = shalt.err (!%p3197_p8)
}
  0x5d   : > { %s3342_s11 = smov 128   ;;  %s3343_s9 = smov 8  }
  0x5e   : > { %2943 = dma.hbm_to_vmem [thread:$0]  (!%p3469_p11), %s3856_s4, 2048, %s350_s28, [#allocation6], %s3342_s11, %s3342_s11, %s3343_s9  }
  0x5f   : > { %s3344_s21 = smov [#allocation10]   ;;  %s3201_s26 = scalar_lea.hbm %s3862_s10, 8192 }
  0x60   : > { %s387_s18 = sshll.u32 %s3344_s21, 4  ;;  %p3202_p4 = scmp.ne.s32.totalorder %s3862_s10, %s3201_s26  ;;  %s388_s18 = int_to_ptr.vmem [resolvable:$true] %s387_s18 }
  0x61   : > { %p3208_p10 = scmp.lt.u32.totalorder %s3201_s26, %s3862_s10 }
  0x62   : > { %p3204_p8 = pnand %p3202_p4, %p3483_p13 }
  0x64   : > { %p3205_p6 = pneg %p3204_p8 }
  0x66   : > { %p3210_p3 = pnand %p3208_p10, %p3205_p6 }
  0x68   : > { %3213 = shalt.err (!%p3210_p3)
}
  0x69   : > { %s3214_s28 = scalar_lea.vmem %s388_s18, 8192  ;;  %p3222_p12 = scmp.lt.s32.totalorder %s388_s18, %s388_s18 }
  0x6a   : > { %p3215_p5 = scmp.ne.s32.totalorder %s388_s18, %s3214_s28  ;;  %p3223_p0 = scmp.lt.s32.totalorder %s3214_s28, %s3214_s28 }
  0x6c   : > { %p3217_p7 = pnand %p3215_p5, %p3483_p13  ;;  %p3224_p2 = por %p3223_p0, %p3222_p12 }
  0x6e   : > { %p3218_p9 = pneg %p3217_p7 }
  0x70   : > { %p3225_p1 = pnand %p3224_p2, %p3218_p9 }
  0x72   : > { %3228 = shalt.err (!%p3225_p1)
}
  0x73   : > { %2949 = dma.hbm_to_vmem [thread:$0]  (!%p3469_p11), %s3862_s10, 8192, %s388_s18, [#allocation9], %s3342_s11, %s3342_s11, %s3343_s9  }
  0x74   : > { %s3570_s30 = sadd.s32 1, %s3333_s24   ;;  %s37_s14 = sadd.s32 1, %s3329_s23 }
  0x75   : > { %s34_s21 = ssub.s32 %s3333_s24, %s3570_s30  ;;  %p44_p13 = scmp.ne.s32.totalorder %s3329_s23, %s3325_s22 }
  0x76   : > { %p35_p4 = scmp.eq.s32.totalorder %s34_s21, 0  ;;  %p45_p8 = scmp.eq.s32.totalorder %s3333_s24, 0 }
  0x77   : > { %p3883_p6 = scmp.eq.s32.totalorder %s3439_s25, 1  ;;  %p2962_p3 = scmp.lt.s32.totalorder %s3333_s24, 2 }
  0x78   : > { %s3586_s20 = scalar_select %p35_p4, %s3329_s23, %s37_s14  }
  0x79   : > { %p3580_p10 = por %p3883_p6, %p44_p13  ;;  %p46_p5 = por %p45_p8, %p44_p13 }
  0x7a   : > { %s404_s26 = sand.u32 1, %s3329_s23   ;;  %s2381_s18 = sshll.u32 %s3333_s24, 8 }
  0x7b   : > { %s2336_s15 = sshll.u32 %s404_s26, 4  ;;  %s3593_s16 = scalar_lea.hbm %s3852_s0, %s2381_s18 }
  0x7c   : > { %s408_s28 = scalar_lea.vmem [#allocation2], %s2336_s15  ;;  %p3597_p11 = pnand %p2962_p3, %p46_p5 }
  0x7d   : > { %s415_s3 = sshll.u32 %s408_s28, 4  ;;  %s3601_s14 = scalar_lea.sflag [#allocation3], %s404_s26  ;;  %s3595_s3 = int_to_ptr.vmem [resolvable:$true] %s415_s3 }
  0x7e   : > { %s3229_s21 = scalar_lea.hbm %s3593_s16, 256  ;;  %p3231_p9 = pneg %p3597_p11 }
  0x7f   : > { %p3230_p7 = scmp.ne.s32.totalorder %s3593_s16, %s3229_s21  ;;  %s3234_s17 = scalar_lea.hbm %s3852_s0, 512 }
  0x80   : > { %p3235_p2 = scmp.lt.u32.totalorder %s3593_s16, %s3852_s0  ;;  %p3236_p1 = scmp.lt.u32.totalorder %s3234_s17, %s3229_s21 }
  0x81   : > { %p3232_p12 = pnand %p3231_p9, %p3230_p7  ;;  %p3238_p4 = scmp.lt.u32.totalorder %s3229_s21, %s3593_s16 }
  0x82   : > { %p3237_p13 = por %p3236_p1, %p3235_p2 }
  0x83   : > { %p3233_p0 = pneg %p3232_p12 }
  0x84   : > { %p3239_p8 = por %p3238_p4, %p3237_p13 }
  0x86   : > { %p3240_p6 = pnand %p3239_p8, %p3233_p0 }
  0x88   : > { %3243 = shalt.err (!%p3240_p6)
}
  0x89   : > { %s3244_s26 = scalar_lea.vmem %s3595_s3, 256  ;;  %s3345_s15 = smov [#allocation2]  }
  0x8a   : > { %p3245_p3 = scmp.ne.s32.totalorder %s3595_s3, %s3244_s26  ;;  %s3249_s18 = sshll.u32 %s3345_s15, 4  ;;  %s3250_s18 = int_to_ptr.vmem [resolvable:$false] %s3249_s18 }
  0x8b   : > { %s3251_s13 = scalar_lea.vmem %s3250_s18, 512  ;;  %p3252_p12 = scmp.lt.s32.totalorder %s3595_s3, %s3250_s18 }
  0x8c   : > { %p3247_p5 = pnand %p3245_p3, %p3231_p9  ;;  %p3253_p2 = scmp.lt.s32.totalorder %s3251_s13, %s3244_s26 }
  0x8e   : > { %p3248_p7 = pneg %p3247_p5  ;;  %p3254_p1 = por %p3253_p2, %p3252_p12 }
  0x90   : > { %p3255_p13 = pnand %p3254_p1, %p3248_p7 }
  0x92   : > { %3258 = shalt.err (!%p3255_p13)
}
  0x93   : > { %2953 = dma.hbm_to_vmem [thread:$0]  (!%p3597_p11), %s3593_s16, 256, %s3595_s3, %s3601_s14, %s3342_s11, %s3342_s11, %s3343_s9  }
  0x94   : > { %p3886_p9 = scmp.ne.s32.totalorder %s3879_s29, 0 }
  0x95   : > { %s3635_s21 = sand.u32 (!%p3886_p9), 1, %s3325_s22   ;;  %p3887_p0 = scmp.ne.s32.totalorder (!%p3886_p9), %s3876_s27, 0 }
  0x96   : > { %427 = sbr.rel (%p3886_p9) target bundleno = 2704 (0xa90), region = 68  ;;  %s2340_s17 = sshll.u32 (!%p3886_p9), %s3635_s21, 4 }
  0x97   : > { %s430_s28 = scalar_lea.sflag (!%p3886_p9), [#allocation3], %s3635_s21  ;;  %s433_s12 = scalar_lea.vmem (!%p3886_p9), [#allocation2], %s2340_s17 }
  0x9d   : > { %3304 = dma.done.wait (%p3887_p0), %s430_s28, 256  }
  0x9e   : > { %3306 = vsyncadd (%p3887_p0), %s430_s28, 4294967040  ;;  %p3888_p11 = scmp.eq.s32.totalorder %s3439_s25, 0 }
  0xa0   : > { %3308 = dma.done.wait (%p3888_p11), [#allocation6], 8192   ;;  %p3889_p4 = pmov %p3888_p11 }
  0xa2   : > { %3310 = vsyncadd (%p3889_p4), [#allocation6], 4294959104  ;;  %p3890_p8 = pmov %p3889_p4 }
  0xa3   : > { %p3891_p6 = pmov %p3889_p4 }
  0xa4   : > { %3312 = dma.done.wait (%p3890_p8), [#allocation9], 16384  }
  0xa5   : > { %3314 = vsyncadd (%p3891_p6), [#allocation9], 4294950912  ;;  %v3653_v0 = vld [vmem:[%s433_s12] sm:$0xff]  ;;  %v3656_v1 = vld [vmem:[%s433_s12 + $0x8] sm:$0xff]  ;;  %vm781_vm0 = vcmask 261120   ;;  %s3347_s16 = smov 96  }
  0xa6   : > { %494 = vadd.xlane.f32.xlu0 %v3653_v0  ;;  %v534_v2 = vld [vmem:[#allocation5 + $0x8] sm:$0xff]  ;;  %v537_v3 = vld [vmem:[#allocation5 + $0x20] sm:$0xff]  ;;  %v536_v6 = vld [vmem:[#allocation5 + $0x18] sm:$0xff]  ;;  %s3348_s3 = smov 64   ;;  %s3349_s14 = smov 32   ;;  %vm1114_vm2 = vcmask 130048  }
  0xa7   : > { %v533_v4 = vld [vmem:[#allocation5] sm:$0xff]  ;;  %v2653_v5 = vpack.c.bf16 %v537_v3, %v534_v2  ;;  %v540_v7 = vld [vmem:[#allocation5 + $0x38] sm:$0xff]  ;;  %v543_v8 = vld [vmem:[#allocation5 + $0x50] sm:$0xff]  ;;  %vm1553_vm3 = vcmask 523264   ;;  %vm1556_vm4 = vcmask 785408   ;;  %s3894_s11 = sld [smem:[#allocation19_spill]] }
  0xa8   : > { %v2655_v9 = vpack.c.bf16 %v536_v6, %v533_v4  ;;  %v2657_v10 = vpack.c.bf16 %v543_v8, %v540_v7  ;;  %v535_v11 = vld [vmem:[#allocation5 + $0x10] sm:$0xff]  ;;  %v538_v12 = vld [vmem:[#allocation5 + $0x28] sm:$0xff]  ;;  %v549_v17 = vld [vmem:[#allocation5 + $0x80] sm:$0xff]  ;;  %v3346_v6 = vmov 0.0   ;;  %s2382_s15 = sshll.u32 %s3439_s25, 8  ;;  %s3896_s28 = sld [smem:[#allocation21_spill]] }
  0xa9   : > { %v539_v13 = vld [vmem:[#allocation5 + $0x30] sm:$0xff]  ;;  %2654 = vmatprep.subr.bf16.mxu0 %v2653_v5  ;;  %v2685_v14 = vpack.c.bf16 %v538_v12, %v535_v11  ;;  %v542_v15 = vld [vmem:[#allocation5 + $0x48] sm:$0xff]  ;;  %v541_v19 = vld [vmem:[#allocation5 + $0x40] sm:$0xff]  ;;  %645 = vmatprep.mubr.f32.mxu0 %v3346_v6  ;;  %s3350_s25 = smov [#allocation11]  }
  0xaa   : > { %496 = vadd.xlane.f32.xlu0 %v3656_v1  ;;  %v546_v16 = vld [vmem:[#allocation5 + $0x68] sm:$0xff]  ;;  %2656 = vmatpush1.bf16.msra.mxu0 %v2655_v9  ;;  %v2659_v18 = vpack.c.bf16 %v542_v15, %v539_v13  ;;  %v544_v20 = vld [vmem:[#allocation5 + $0x58] sm:$0xff]  ;;  %v545_v23 = vld [vmem:[#allocation5 + $0x60] sm:$0xff]  ;;  %s3263_s29 = sshll.u32 %s3350_s25, 4  ;;  %s3264_s29 = int_to_ptr.vmem [resolvable:$false] %s3263_s29 }
  0xab   : > { %2658 = vmatprep.subr.bf16.mxu0 %v2657_v10  ;;  %2686 = vmatprep.subr.bf16.mxu1 %v2685_v14  ;;  %v2661_v21 = vpack.c.bf16 %v549_v17, %v546_v16  ;;  %v2689_v22 = vpack.c.bf16 %v544_v20, %v541_v19  ;;  %v548_v24 = vld [vmem:[#allocation5 + $0x78] sm:$0xff]  ;;  %v555_v35 = vld [vmem:[#allocation5 + $0xb0] sm:$0xff]  ;;  %v550_v38 = vld [vmem:[#allocation5 + $0x88] sm:$0xff] }
  0xac   : > { %2688 = vmatpush3.bf16.msra.mxu1 %v2685_v14  ;;  %v2663_v25 = vpack.c.bf16 %v548_v24, %v545_v23  ;;  %v552_v34 = vld [vmem:[#allocation5 + $0x98] sm:$0xff]  ;;  %v547_v36 = vld [vmem:[#allocation5 + $0x70] sm:$0xff]  ;;  %v554_v40 = vld [vmem:[#allocation5 + $0xa8] sm:$0xff] }
  0xad   : > { %2690 = vmatprep.subr.bf16.mxu1 %v2689_v22  ;;  %v2665_v37 = vpack.c.bf16 %v555_v35, %v552_v34  ;;  %v551_v39 = vld [vmem:[#allocation5 + $0x90] sm:$0xff]  ;;  %v2693_v41 = vpack.c.bf16 %v550_v38, %v547_v36  ;;  %v558_v43 = vld [vmem:[#allocation5 + $0xc8] sm:$0xff]  ;;  %v561_v44 = vld [vmem:[#allocation5 + $0xe0] sm:$0xff] }
  0xae   : > { %2660 = vmatpush1.bf16.msra.mxu0 %v2659_v18  ;;  %v2667_v42 = vpack.c.bf16 %v554_v40, %v551_v39  ;;  %v553_v45 = vld [vmem:[#allocation5 + $0xa0] sm:$0xff]  ;;  %v2669_v46 = vpack.c.bf16 %v561_v44, %v558_v43  ;;  %v556_v47 = vld [vmem:[#allocation5 + $0xb8] sm:$0xff]  ;;  %v567_v53 = vld [vmem:[#allocation5 + $0x110] sm:$0xff]  ;;  %s3807_s12 = scalar_lea.hbm %s3896_s28, %s2382_s15 }
  0xaf   : > { %2662 = vmatprep.subr.bf16.mxu0 %v2661_v21  ;;  %v557_v48 = vld [vmem:[#allocation5 + $0xc0] sm:$0xff]  ;;  %v560_v49 = vld [vmem:[#allocation5 + $0xd8] sm:$0xff]  ;;  %v2697_v50 = vpack.c.bf16 %v556_v47, %v553_v45  ;;  %v559_v54 = vld [vmem:[#allocation5 + $0xd0] sm:$0xff] }
  0xb0   : > { %2692 = vmatpush3.bf16.msra.mxu1 %v2689_v22  ;;  %v2671_v51 = vpack.c.bf16 %v560_v49, %v557_v48  ;;  %v564_v52 = vld [vmem:[#allocation5 + $0xf8] sm:$0xff]  ;;  %v562_v56 = vld [vmem:[#allocation5 + $0xe8] sm:$0xff]  ;;  %v563_v57 = vld [vmem:[#allocation5 + $0xf0] sm:$0xff] }
  0xb1   : > { %2694 = vmatprep.subr.bf16.mxu1 %v2693_v41  ;;  %v2673_v55 = vpack.c.bf16 %v567_v53, %v564_v52  ;;  %v566_v58 = vld [vmem:[#allocation5 + $0x108] sm:$0xff]  ;;  %v2701_v59 = vpack.c.bf16 %v562_v56, %v559_v54  ;;  %v573_v62 = vld [vmem:[#allocation5 + $0x140] sm:$0xff]  ;;  %v568_v3 = vld [vmem:[#allocation5 + $0x118] sm:$0xff] }
  0xb2   : > { %2664 = vmatpush1.bf16.msra.mxu0 %v2663_v25  ;;  %v2675_v60 = vpack.c.bf16 %v566_v58, %v563_v57  ;;  %v570_v61 = vld [vmem:[#allocation5 + $0x128] sm:$0xff]  ;;  %v565_v63 = vld [vmem:[#allocation5 + $0x100] sm:$0xff]  ;;  %v572_v5 = vld [vmem:[#allocation5 + $0x138] sm:$0xff] }
  0xb3   : > { %2666 = vmatprep.subr.bf16.mxu0 %v2665_v37  ;;  %v2677_v2 = vpack.c.bf16 %v573_v62, %v570_v61  ;;  %v569_v4 = vld [vmem:[#allocation5 + $0x120] sm:$0xff]  ;;  %v2705_v7 = vpack.c.bf16 %v568_v3, %v565_v63  ;;  %v576_v9 = vld [vmem:[#allocation5 + $0x158] sm:$0xff]  ;;  %v579_v10 = vld [vmem:[#allocation5 + $0x170] sm:$0xff] }
  0xb4   : > { %2696 = vmatpush3.bf16.msra.mxu1 %v2693_v41  ;;  %v2679_v8 = vpack.c.bf16 %v572_v5, %v569_v4  ;;  %v571_v11 = vld [vmem:[#allocation5 + $0x130] sm:$0xff]  ;;  %v2681_v12 = vpack.c.bf16 %v579_v10, %v576_v9  ;;  %v574_v13 = vld [vmem:[#allocation5 + $0x148] sm:$0xff]  ;;  %v577_v18 = vld [vmem:[#allocation5 + $0x160] sm:$0xff] }
  0xb5   : > { %2698 = vmatprep.subr.bf16.mxu1 %v2697_v50  ;;  %v575_v14 = vld [vmem:[#allocation5 + $0x150] sm:$0xff]  ;;  %v578_v15 = vld [vmem:[#allocation5 + $0x168] sm:$0xff]  ;;  %v2709_v16 = vpack.c.bf16 %v574_v13, %v571_v11  ;;  %v580_v19 = vld [vmem:[#allocation5 + $0x178] sm:$0xff] }
  0xb6   : > { %2668 = vmatpush1.bf16.msra.mxu0 %v2667_v42  ;;  %v2683_v17 = vpack.c.bf16 %v578_v15, %v575_v14  ;;  %v2713_v20 = vpack.c.bf16 %v580_v19, %v577_v18  ;;  %vm3683_vm1 = vmpackc.low %vm781_vm0, %vm781_vm0 }
  0xb7   : > { %2670 = vmatprep.subr.bf16.mxu0 %v2669_v46 }
  0xb8   : > { %2700 = vmatpush3.bf16.msra.mxu1 %v2697_v50 }
  0xb9   : > { %2702 = vmatprep.subr.bf16.mxu1 %v2701_v59 }
  0xba   : > { %2672 = vmatpush1.bf16.msra.mxu0 %v2671_v51 }
  0xbb   : > { %2674 = vmatprep.subr.bf16.mxu0 %v2673_v55 }
  0xbc   : > { %2704 = vmatpush3.bf16.msra.mxu1 %v2701_v59 }
  0xbd   : > { %2706 = vmatprep.subr.bf16.mxu1 %v2705_v7 }
  0xbe   : > { %2676 = vmatpush1.bf16.msra.mxu0 %v2675_v60 }
  0xbf   : > { %2678 = vmatprep.subr.bf16.mxu0 %v2677_v2 }
  0xc0   : > { %2708 = vmatpush3.bf16.msra.mxu1 %v2705_v7 }
  0xc1   : > { %2710 = vmatprep.subr.bf16.mxu1 %v2709_v16 }
  0xc2   : > { %2680 = vmatpush1.bf16.msra.mxu0 %v2679_v8 }
  0xc3   : > { %2682 = vmatprep.subr.bf16.mxu0 %v2681_v12 }
  0xc4   : > { %2712 = vmatpush3.bf16.msra.mxu1 %v2709_v16 }
  0xc5   : > { %2714 = vmatprep.subr.bf16.mxu1 %v2713_v20 }
  0xc6   : > { %2684 = vmatpush1.bf16.msra.mxu0 %v2683_v17 }
  0xc8   : > { %2716 = vmatpush3.bf16.msra.mxu1 %v2713_v20 }
 0x133   : > { %v495_v26 = vpop.xlane.xlu0 %494 }
 0x134   : > { %v499_v27 = vmul.f32 0.0078125, %v495_v26 }
 0x136   : > { %v3660_v28 = vsub.f32 %v3653_v0, %v499_v27 }
 0x137   : > { %v497_v29 = vpop.xlane.xlu0 %496 }
 0x138   : > { %v500_v30 = vmul.f32 0.0078125, %v497_v29  ;;  %v503_v31 = vmul.f32 %v3660_v28, %v3660_v28  ;;  %v2346_v29 = vld [vmem:[%s3853_s1] ss:$0 sm:$0xff] }
 0x13a   : > { %v3665_v32 = vsub.f32 %v3656_v1, %v500_v30  ;;  %505 = vadd.xlane.f32.xlu1 %v503_v31  ;;  %v2347_v31 = vld [vmem:[%s3854_s2] ss:$0 sm:$0xff] }
 0x13c   : > { %v504_v33 = vmul.f32 %v3665_v32, %v3665_v32 }
 0x13e   : > { %507 = vadd.xlane.f32.xlu1 %v504_v33 }
 0x1c7   : > { %v506_v21 = vpop.xlane.xlu1 %505 }
 0x1c8   : > { %v509_v22 = vmul.f32 0.0078125, %v506_v21 }
 0x1ca   : > { %v511_v23 = vadd.f32 1e-06, %v509_v22 }
 0x1cb   : > { %v508_v24 = vpop.xlane.xlu1 %507 }
 0x1cc   : > { %3061 = vrsqrt.f32 %v511_v23  ;;  %v510_v25 = vmul.f32 0.0078125, %v508_v24 }
 0x1ce   : > { %v512_v26 = vadd.f32 1e-06, %v510_v25 }
 0x1d0   : > { %3063 = vrsqrt.f32 %v512_v26 }
 0x1d6   : > { %v3062_v27 = vpop.eup %3061 }
 0x1d7   : > { %v515_v30 = vmul.f32 %v3062_v27, %v3660_v28 }
 0x1d9   : > { %v523_v33 = vmul.f32 %v2346_v29, %v515_v30 }
 0x1da   : > { %v3064_v34 = vpop.eup %3063 }
 0x1db   : > { %v531_v35 = vadd.f32 %v2347_v31, %v523_v33  ;;  %v516_v36 = vmul.f32 %v3064_v34, %v3665_v32 }
 0x1dd   : > { %646 = vmatmul.mubr.f32.vlgmr.msra.gmra.mrb[0].mxu0 %v531_v35  ;;  %2559 = vmatprep.mubr.f32.mxu1 %v531_v35  ;;  %v524_v37 = vmul.f32 %v2346_v29, %v516_v36 }
 0x1de   : > { %651 = vmatprep.mubr.f32.mxu0 %v3346_v6 }
 0x1df   : > { %v532_v38 = vadd.f32 %v2347_v31, %v524_v37 }
 0x1e1   : > { %652 = vmatmul.mubr.f32.gmra.mrb[2].mxu0 %v532_v38  ;;  %2560 = vmatmul.mubr.f32.vlgmr.msra.gmra.mrb[0].mxu1 %v532_v38 }
 0x2b0   : > { %v647_v39 = vpop.f32.mrb[0].mxu0 }
 0x2b1   : > { %v649_v28 = vpop.f32.mrb[1].mxu0  ;;  %735 = vrot.lane.b32.xlu1 %v647_v39, %s3347_s16  ;;  %2566 = vmatprep.mubr.msk.f32.mxu1 %vm781_vm0, %v647_v39 }
 0x2b4   : > { %v653_v40 = vpop.f32.mrb[2].mxu0  ;;  %v2561_v41 = vpop.f32.mrb[0].mxu1 }
 0x2b5   : > { %v655_v42 = vpop.f32.mrb[3].mxu0  ;;  %v724_v32 = vpop.f32.mrb[1].mxu1 }
 0x2b6   : > { %v2717_v43 = vpack.c.bf16 %v655_v42, %v649_v28  ;;  %v2741_v44 = vpack.c.bf16 %v2561_v41, %v724_v32  ;;  %v3021_v45 = vpack.i.bf16 %v655_v42, %v649_v28  ;;  %v3687_v47 = vpack.i.bf16 %v2561_v41, %v724_v32 }
 0x2b8   : > { %2742 = vmatprep.subr.bf16.mxu0 %v2741_v44  ;;  %3022 = vrot.lane.b32.xlu1 %v3021_v45, %s3348_s3 }
 0x2b9   : > { %3017 = vrot.lane.b32.xlu0 %v3021_v45, %s3347_s16  ;;  %2719 = vmatprep.subr.msk.bf16.mxu1 %vm3683_vm1, %v2717_v43 }
 0x2ba   : > { %2722 = vmatpush3.bf16.xpose.msk.msra.mxu1 %vm3683_vm1, %v2717_v43  ;;  %2744 = vmatpush3.bf16.msra.mxu0 %v2741_v44 }
 0x2bc   : > { %737 = vrot.lane.b32.xlu1 %v653_v40, %s3347_s16 }
 0x2bd   : > { %3027 = vrot.lane.b32.xlu0 %v3021_v45, %s3349_s14 }
 0x2c0   : > { %739 = vrot.lane.b32.xlu1 %v647_v39, %s3348_s3 }
 0x2c1   : > { %741 = vrot.lane.b32.xlu0 %v653_v40, %s3348_s3  ;;  %2567 = vmatmul.mubr.msk.f32.vlgmr.msra.gmra.mrb[2].mxu1 %vm781_vm0, %v653_v40 }
 0x2c4   : > { %743 = vrot.lane.b32.xlu1 %v647_v39, %s3349_s14 }
 0x2c5   : > { %745 = vrot.lane.b32.xlu0 %v653_v40, %s3349_s14 }
 0x323   : > { %v736_v48 = vpop.permute.xlu1 %735 }
 0x324   : > { %2573 = vmatprep.mubr.msk.f32.mxu1 %vm781_vm0, %v736_v48 }
 0x32a   : > { %v3023_v49 = vpop.permute.xlu1 %3022 }
 0x32b   : > { %v3018_v50 = vpop.permute.xlu0 %3017  ;;  %v3025_v53 = vunpack.i.h.bf16 %v3023_v49  ;;  %v3024_v54 = vunpack.i.l.bf16 %v3023_v49 }
 0x32c   : > { %v3020_v51 = vunpack.i.h.bf16 %v3018_v50  ;;  %v3019_v52 = vunpack.i.l.bf16 %v3018_v50 }
 0x32d   : > { %v2729_v56 = vpack.c.bf16 %v3025_v53, %v3024_v54 }
 0x32e   : > { %v2723_v55 = vpack.c.bf16 %v3020_v51, %v3019_v52  ;;  %v738_v58 = vpop.permute.xlu1 %737 }
 0x32f   : > { %v3028_v57 = vpop.permute.xlu0 %3027 }
 0x330   : > { %2725 = vmatprep.subr.msk.bf16.mxu1 %vm3683_vm1, %v2723_v55  ;;  %v3030_v59 = vunpack.i.h.bf16 %v3028_v57  ;;  %v3029_v60 = vunpack.i.l.bf16 %v3028_v57 }
 0x331   : > { %2728 = vmatpush3.bf16.xpose.msk.msra.mxu1 %vm3683_vm1, %v2723_v55 }
 0x332   : > { %2731 = vmatprep.subr.msk.bf16.mxu1 %vm3683_vm1, %v2729_v56  ;;  %v2735_v61 = vpack.c.bf16 %v3030_v59, %v3029_v60  ;;  %v740_v62 = vpop.permute.xlu1 %739 }
 0x333   : > { %v742_v63 = vpop.permute.xlu0 %741 }
 0x336   : > { %v744_v2 = vpop.permute.xlu1 %743 }
 0x337   : > { %v746_v3 = vpop.permute.xlu0 %745 }
 0x338   : > { %2574 = vmatmul.mubr.msk.f32.vlgmr.msra.gmra.mrb[4].mxu1 %vm781_vm0, %v738_v58 }
 0x339   : > { %2734 = vmatpush3.bf16.xpose.msk.msra.mxu1 %vm3683_vm1, %v2729_v56  ;;  %2580 = vmatprep.mubr.msk.f32.mxu1 %vm781_vm0, %v740_v62 }
 0x33a   : > { %2737 = vmatprep.subr.msk.bf16.mxu1 %vm3683_vm1, %v2735_v61 }
 0x340   : > { %2581 = vmatmul.mubr.msk.f32.vlgmr.msra.gmra.mrb[6].mxu1 %vm781_vm0, %v742_v63 }
 0x341   : > { %2740 = vmatpush3.bf16.xpose.msk.msra.mxu1 %vm3683_vm1, %v2735_v61  ;;  %2587 = vmatprep.mubr.msk.f32.mxu1 %vm781_vm0, %v744_v2 }
 0x348   : > { %2588 = vmatmul.mubr.msk.f32.vlgmr.msra.gmra.mrb[8].mxu1 %vm781_vm0, %v746_v3 }
 0x394   : > { %v2568_v4 = vpop.f32.mrb[2].mxu1 }
 0x395   : > { %v856_v5 = vpop.f32.mrb[3].mxu1  ;;  %v1118_v7 = vsel %vm1114_vm2, %v2568_v4, -inf }
 0x396   : > { %1119 = vmax.xlane.f32.xlu0 %v1118_v7  ;;  %v1115_v8 = vsel %vm1114_vm2, %v856_v5, -inf }
 0x397   : > { %1116 = vmax.xlane.f32.xlu1 %v1115_v8 }
 0x40b   : > { %v2575_v9 = vpop.f32.mrb[4].mxu1 }
 0x40c   : > { %v939_v10 = vpop.f32.mrb[5].mxu1  ;;  %v1124_v11 = vsel %vm1114_vm2, %v2575_v9, -inf }
 0x40d   : > { %1125 = vmax.xlane.f32.xlu0 %v1124_v11  ;;  %v1121_v12 = vsel %vm1114_vm2, %v939_v10, -inf }
 0x411   : > { %1122 = vmax.xlane.f32.xlu0 %v1121_v12 }
 0x413   : > { %v2582_v13 = vpop.f32.mrb[6].mxu1 }
 0x414   : > { %v1022_v14 = vpop.f32.mrb[7].mxu1  ;;  %v1130_v15 = vsel %vm1114_vm2, %v2582_v13, -inf }
 0x415   : > { %1131 = vmax.xlane.f32.xlu0 %v1130_v15  ;;  %v1127_v16 = vsel %vm1114_vm2, %v1022_v14, -inf }
 0x416   : > { %1128 = vmax.xlane.f32.xlu1 %v1127_v16 }
 0x41b   : > { %v2589_v17 = vpop.f32.mrb[8].mxu1 }
 0x41c   : > { %v1105_v18 = vpop.f32.mrb[9].mxu1  ;;  %v1136_v19 = vsel %vm1114_vm2, %v2589_v17, -inf }
 0x41d   : > { %1137 = vmax.xlane.f32.xlu0 %v1136_v19  ;;  %v1133_v20 = vsel %vm1114_vm2, %v1105_v18, -inf }
 0x41e   : > { %1134 = vmax.xlane.f32.xlu1 %v1133_v20 }
 0x423   : > { %v1120_v21 = vpop.xlane.xlu0 %1119 }
 0x424   : > { %v1140_v22 = vsub.f32 %v2568_v4, %v1120_v21  ;;  %v1117_v26 = vpop.xlane.xlu1 %1116 }
 0x425   : > { %v1139_v27 = vsub.f32 %v856_v5, %v1117_v26 }
 0x426   : > { %v1149_v23 = vmul.f32 1.442695, %v1140_v22 }
 0x427   : > { %v1147_v29 = vmul.f32 1.442695, %v1139_v27 }
 0x428   : > { %3065 = vpow2.f32 %v1149_v23 }
 0x429   : > { %3067 = vpow2.f32 %v1147_v29 }
 0x42f   : > { %3032 = vrot.lane.b32.xlu1 %v3687_v47, %s3347_s16 }
 0x432   : > { %v3730_v24 = vpop.eup %3065 }
 0x433   : > { %v1166_v25 = vsel %vm1114_vm2, %v3730_v24, 0.0  ;;  %v3068_v30 = vpop.eup %3067 }
 0x434   : > { %1167 = vadd.xlane.f32.xlu0 %v1166_v25  ;;  %v1163_v31 = vsel %vm1114_vm2, %v3068_v30, 0.0 }
 0x453   : > { %1164 = vadd.xlane.f32.xlu1 %v1163_v31 }
 0x49a   : > { %v1126_v33 = vpop.xlane.xlu0 %1125 }
 0x49b   : > { %v1142_v34 = vsub.f32 %v2575_v9, %v1126_v33 }
 0x49d   : > { %v1153_v35 = vmul.f32 1.442695, %v1142_v34 }
 0x49e   : > { %v1123_v36 = vpop.xlane.xlu0 %1122 }
 0x49f   : > { %3069 = vpow2.f32 %v1153_v35  ;;  %v1141_v37 = vsub.f32 %v939_v10, %v1123_v36 }
 0x4a1   : > { %v1151_v38 = vmul.f32 1.442695, %v1141_v37 }
 0x4a2   : > { %v1132_v39 = vpop.xlane.xlu0 %1131 }
 0x4a3   : > { %3071 = vpow2.f32 %v1151_v38  ;;  %v1144_v28 = vsub.f32 %v2582_v13, %v1132_v39  ;;  %v1129_v40 = vpop.xlane.xlu1 %1128  ;;  %v1559_v38 = vld [vmem:[#allocation7] sm:$0xff]  ;;  %v1560_v39 = vld [vmem:[#allocation7 + $0x8] sm:$0xff] }
 0x4a4   : > { %v1143_v41 = vsub.f32 %v1022_v14, %v1129_v40  ;;  %v2757_v40 = vpack.c.bf16 %v1560_v39, %v1559_v38  ;;  %v1706_v38 = vld [vmem:[#allocation8 + $0x38] sm:$0xff]  ;;  %v1699_v39 = vld [vmem:[#allocation8] sm:$0xff] }
 0x4a5   : > { %v1157_v42 = vmul.f32 1.442695, %v1144_v28  ;;  %v1561_v28 = vld [vmem:[#allocation7 + $0x10] sm:$0xff] }
 0x4a6   : > { %v1155_v32 = vmul.f32 1.442695, %v1143_v41  ;;  %v1562_v41 = vld [vmem:[#allocation7 + $0x18] sm:$0xff] }
 0x4a7   : > { %3073 = vpow2.f32 %v1157_v42  ;;  %v2761_v42 = vpack.c.bf16 %v1562_v41, %v1561_v28  ;;  %v1703_v28 = vld [vmem:[#allocation8 + $0x20] sm:$0xff] }
 0x4a8   : > { %3075 = vpow2.f32 %v1155_v32  ;;  %v1563_v32 = vld [vmem:[#allocation7 + $0x20] sm:$0xff]  ;;  %v2791_v41 = vpack.c.bf16 %v1703_v28, %v1699_v39  ;;  %v1737_v39 = vld [vmem:[#allocation8 + $0x130] sm:$0xff] }
 0x4a9   : > { %v3070_v43 = vpop.eup %3069 }
 0x4aa   : > { %v1138_v44 = vpop.xlane.xlu0 %1137  ;;  %v1172_v45 = vsel %vm1114_vm2, %v3070_v43, 0.0 }
 0x4ab   : > { %v1146_v46 = vsub.f32 %v2589_v17, %v1138_v44  ;;  %1173 = vadd.xlane.f32.xlu0 %v1172_v45  ;;  %v1135_v48 = vpop.xlane.xlu1 %1134  ;;  %v1565_v45 = vld [vmem:[#allocation7 + $0x30] sm:$0xff] }
 0x4ac   : > { %v1145_v49 = vsub.f32 %v1105_v18, %v1135_v48 }
 0x4ad   : > { %v3072_v50 = vpop.eup %3071  ;;  %v1161_v51 = vmul.f32 1.442695, %v1146_v46  ;;  %v1566_v46 = vld [vmem:[#allocation7 + $0x38] sm:$0xff] }
 0x4ae   : > { %v1159_v52 = vmul.f32 1.442695, %v1145_v49  ;;  %v1169_v53 = vsel %vm1114_vm2, %v3072_v50, 0.0  ;;  %v2769_v48 = vpack.c.bf16 %v1566_v46, %v1565_v45  ;;  %v1714_v45 = vld [vmem:[#allocation8 + $0x78] sm:$0xff] }
 0x4af   : > { %3077 = vpow2.f32 %v1161_v51  ;;  %1170 = vadd.xlane.f32.xlu1 %v1169_v53  ;;  %v3033_v54 = vpop.permute.xlu1 %3032  ;;  %v1567_v51 = vld [vmem:[#allocation7 + $0x40] sm:$0xff] }
 0x4b0   : > { %3079 = vpow2.f32 %v1159_v52  ;;  %v3035_v55 = vunpack.i.h.bf16 %v3033_v54  ;;  %v3034_v56 = vunpack.i.l.bf16 %v3033_v54  ;;  %v1568_v52 = vld [vmem:[#allocation7 + $0x48] sm:$0xff]  ;;  %v1569_v54 = vld [vmem:[#allocation7 + $0x50] sm:$0xff] }
 0x4b1   : > { %v3074_v57 = vpop.eup %3073  ;;  %v2773_v53 = vpack.c.bf16 %v1568_v52, %v1567_v51  ;;  %v1709_v51 = vld [vmem:[#allocation8 + $0x50] sm:$0xff] }
 0x4b2   : > { %v3076_v58 = vpop.eup %3075  ;;  %v2745_v59 = vpack.c.bf16 %v3035_v55, %v3034_v56  ;;  %v1178_v60 = vsel %vm1114_vm2, %v3074_v57, 0.0  ;;  %v1570_v55 = vld [vmem:[#allocation7 + $0x58] sm:$0xff]  ;;  %v1571_v56 = vld [vmem:[#allocation7 + $0x60] sm:$0xff] }
 0x4b3   : > { %1179 = vadd.xlane.f32.xlu0 %v1178_v60  ;;  %v1175_v61 = vsel %vm1114_vm2, %v3076_v58, 0.0 }
 0x4b4   : > { %1176 = vadd.xlane.f32.xlu1 %v1175_v61  ;;  %2746 = vmatprep.subr.bf16.mxu1 %v2745_v59 }
 0x4b5   : > { %2748 = vmatpush3.bf16.msra.mxu1 %v2745_v59 }
 0x4b9   : > { %v3078_v62 = vpop.eup %3077 }
 0x4ba   : > { %v3080_v63 = vpop.eup %3079  ;;  %v1184_v2 = vsel %vm1114_vm2, %v3078_v62, 0.0 }
 0x4bb   : > { %1185 = vadd.xlane.f32.xlu0 %v1184_v2  ;;  %v1181_v3 = vsel %vm1114_vm2, %v3080_v63, 0.0 }
 0x4bc   : > { %1182 = vadd.xlane.f32.xlu1 %v1181_v3 }
 0x4c1   : > { %v1168_v4 = vpop.xlane.xlu0 %1167 }
 0x4c2   : > { %3081 = vrcp.f32 %v1168_v4 }
 0x4cc   : > { %v3082_v7 = vpop.eup %3081 }
 0x4cd   : > { %3042 = vrot.lane.b32.xlu1 %v3687_v47, %s3349_s14  ;;  %v1196_v10 = vmul.f32 %v3082_v7, %v3730_v24 }
 0x4d1   : > { %3037 = vrot.lane.b32.xlu0 %v3687_v47, %s3348_s3 }
 0x4e0   : > { %v1165_v5 = vpop.xlane.xlu1 %1164 }
 0x4e1   : > { %3083 = vrcp.f32 %v1165_v5 }
 0x4eb   : > { %v3084_v8 = vpop.eup %3083 }
 0x4ec   : > { %v1195_v9 = vmul.f32 %v3084_v8, %v3068_v30 }
 0x4ee   : > { %2594 = vmatprep.mubr.msk.f32.mxu0 %vm1114_vm2, %v1195_v9 }
 0x4ef   : > { %2595 = vmatmul.mubr.msk.f32.vlgmr.msra.gmra.mrb[4].mxu0 %vm1114_vm2, %v1196_v10 }
 0x538   : > { %v1174_v11 = vpop.xlane.xlu0 %1173 }
 0x539   : > { %3085 = vrcp.f32 %v1174_v11 }
 0x53c   : > { %v1171_v12 = vpop.xlane.xlu1 %1170 }
 0x53d   : > { %3087 = vrcp.f32 %v1171_v12 }
 0x540   : > { %v1180_v47 = vpop.xlane.xlu0 %1179 }
 0x541   : > { %v1177_v13 = vpop.xlane.xlu1 %1176 }
 0x542   : > { %3089 = vrcp.f32 %v1177_v13 }
 0x543   : > { %v3086_v14 = vpop.eup %3085  ;;  %3091 = vrcp.f32 %v1180_v47 }
 0x544   : > { %v1198_v18 = vmul.f32 %v3086_v14, %v3070_v43  ;;  %v1564_v43 = vld [vmem:[#allocation7 + $0x28] sm:$0xff] }
 0x545   : > { %v2765_v44 = vpack.c.bf16 %v1564_v43, %v1563_v32  ;;  %v1705_v32 = vld [vmem:[#allocation8 + $0x30] sm:$0xff] }
 0x547   : > { %v3088_v15 = vpop.eup %3087 }
 0x548   : > { %v1186_v16 = vpop.xlane.xlu0 %1185  ;;  %v1197_v17 = vmul.f32 %v3088_v15, %v3072_v50 }
 0x549   : > { %3093 = vrcp.f32 %v1186_v16  ;;  %v1183_v19 = vpop.xlane.xlu1 %1182 }
 0x54a   : > { %3095 = vrcp.f32 %v1183_v19  ;;  %2601 = vmatprep.mubr.msk.f32.mxu1 %vm1114_vm2, %v1197_v17 }
 0x54b   : > { %2602 = vmatmul.mubr.msk.f32.vlgmr.msra.gmra.mrb[10].mxu1 %vm1114_vm2, %v1198_v18 }
 0x54c   : > { %v3090_v20 = vpop.eup %3089  ;;  %v3038_v21 = vpop.permute.xlu0 %3037 }
 0x54d   : > { %v3040_v22 = vunpack.i.h.bf16 %v3038_v21  ;;  %v3039_v23 = vunpack.i.l.bf16 %v3038_v21  ;;  %v3043_v24 = vpop.permute.xlu1 %3042  ;;  %v1199_v25 = vmul.f32 %v3090_v20, %v3076_v58  ;;  %v3092_v30 = vpop.eup %3091  ;;  %v1572_v58 = vld [vmem:[#allocation7 + $0x68] sm:$0xff] }
 0x54e   : > { %v3045_v26 = vunpack.i.h.bf16 %v3043_v24  ;;  %v3044_v27 = vunpack.i.l.bf16 %v3043_v24  ;;  %v1200_v34 = vmul.f32 %v3092_v30, %v3074_v57  ;;  %v2777_v57 = vpack.c.bf16 %v1570_v55, %v1569_v54  ;;  %v1716_v54 = vld [vmem:[#allocation8 + $0x88] sm:$0xff] }
 0x54f   : > { %v2749_v29 = vpack.c.bf16 %v3040_v22, %v3039_v23  ;;  %2608 = vmatprep.mubr.msk.f32.mxu0 %vm1114_vm2, %v1199_v25  ;;  %v2781_v59 = vpack.c.bf16 %v1572_v58, %v1571_v56  ;;  %v2372_v25 = vld [vmem:[%s3857_s5] ss:$0 sm:$0xff]  ;;  %v1720_v55 = vld [vmem:[#allocation8 + $0xa8] sm:$0xff]  ;;  %v1718_v58 = vld [vmem:[#allocation8 + $0x98] sm:$0xff] }
 0x550   : > { %v2753_v31 = vpack.c.bf16 %v3045_v26, %v3044_v27 }
 0x551   : > { %2750 = vmatprep.subr.bf16.mxu0 %v2749_v29 }
 0x552   : > { %2752 = vmatpush3.bf16.msra.mxu0 %v2749_v29  ;;  %2754 = vmatprep.subr.bf16.mxu1 %v2753_v31 }
 0x553   : > { %v3094_v33 = vpop.eup %3093  ;;  %2756 = vmatpush3.bf16.msra.mxu1 %v2753_v31  ;;  %2758 = vmatprep.subr.bf16.mxu0 %v2757_v40 }
 0x554   : > { %v3096_v35 = vpop.eup %3095  ;;  %v1202_v37 = vmul.f32 %v3094_v33, %v3078_v62  ;;  %v1573_v62 = vld [vmem:[#allocation7 + $0x70] sm:$0xff] }
 0x555   : > { %2609 = vmatmul.mubr.msk.f32.vlgmr.msra.gmra.mrb[6].mxu0 %vm1114_vm2, %v1200_v34  ;;  %v1201_v36 = vmul.f32 %v3096_v35, %v3080_v63  ;;  %v1574_v63 = vld [vmem:[#allocation7 + $0x78] sm:$0xff]  ;;  %v1700_v34 = vld [vmem:[#allocation8 + $0x8] sm:$0xff] }
 0x556   : > { %2760 = vmatpush3.bf16.msra.mxu0 %v2757_v40  ;;  %v2785_v3 = vpack.c.bf16 %v1574_v63, %v1573_v62  ;;  %v1704_v35 = vld [vmem:[#allocation8 + $0x28] sm:$0xff]  ;;  %v1719_v62 = vld [vmem:[#allocation8 + $0xa0] sm:$0xff]  ;;  %v1717_v63 = vld [vmem:[#allocation8 + $0x90] sm:$0xff] }
 0x557   : > { %2615 = vmatprep.mubr.msk.f32.mxu1 %vm1114_vm2, %v1201_v36  ;;  %2762 = vmatprep.subr.bf16.mxu0 %v2761_v42  ;;  %v1702_v36 = vld [vmem:[#allocation8 + $0x18] sm:$0xff] }
 0x558   : > { %2616 = vmatmul.mubr.msk.f32.vlgmr.msra.gmra.mrb[12].mxu1 %vm1114_vm2, %v1202_v37  ;;  %v2789_v37 = vpack.c.bf16 %v1704_v35, %v1700_v34  ;;  %v2821_v40 = vpack.c.bf16 %v1706_v38, %v1702_v36  ;;  %v1731_v34 = vld [vmem:[#allocation8 + $0x100] sm:$0xff]  ;;  %v1733_v38 = vld [vmem:[#allocation8 + $0x110] sm:$0xff] }
 0x559   : > { %1849 = vmatprep.mubr.f32.mxu1 %v3346_v6  ;;  %v1735_v35 = vld [vmem:[#allocation8 + $0x120] sm:$0xff]  ;;  %v2839_v28 = vpack.c.bf16 %v1737_v39, %v1733_v38  ;;  %v1997_v38 = vld [vmem:[#allocation10 + $0x90] sm:$0xff] }
 0x55a   : > { %2764 = vmatpush3.bf16.msra.mxu0 %v2761_v42  ;;  %v1701_v42 = vld [vmem:[#allocation8 + $0x10] sm:$0xff]  ;;  %2790 = vmatprep.subr.bf16.mxu1 %v2789_v37  ;;  %v2807_v37 = vpack.c.bf16 %v1735_v35, %v1731_v34  ;;  %v1979_v34 = vld [vmem:[#allocation10] sm:$0xff]  ;;  %v1980_v35 = vld [vmem:[#allocation10 + $0x8] sm:$0xff] }
 0x55b   : > { %2766 = vmatprep.subr.bf16.mxu0 %v2765_v44  ;;  %v2823_v43 = vpack.c.bf16 %v1705_v32, %v1701_v42  ;;  %2792 = vmatpush1.bf16.msra.mxu1 %v2791_v41  ;;  %v1744_v41 = vld [vmem:[#allocation8 + $0x168] sm:$0xff]  ;;  %v1742_v42 = vld [vmem:[#allocation8 + $0x158] sm:$0xff] }
 0x55e   : > { %2768 = vmatpush3.bf16.msra.mxu0 %v2765_v44  ;;  %v1710_v44 = vld [vmem:[#allocation8 + $0x58] sm:$0xff] }
 0x55f   : > { %2770 = vmatprep.subr.bf16.mxu0 %v2769_v48 }
 0x562   : > { %2772 = vmatpush3.bf16.msra.mxu0 %v2769_v48  ;;  %v2825_v48 = vpack.c.bf16 %v1714_v45, %v1710_v44 }
 0x563   : > { %2774 = vmatprep.subr.bf16.mxu0 %v2773_v53 }
 0x566   : > { %2776 = vmatpush3.bf16.msra.mxu0 %v2773_v53  ;;  %v1713_v53 = vld [vmem:[#allocation8 + $0x70] sm:$0xff] }
 0x567   : > { %2778 = vmatprep.subr.bf16.mxu0 %v2777_v57  ;;  %v2827_v56 = vpack.c.bf16 %v1713_v53, %v1709_v51  ;;  %v1752_v51 = vld [vmem:[#allocation8 + $0x1a8] sm:$0xff]  ;;  %v1754_v53 = vld [vmem:[#allocation8 + $0x1b8] sm:$0xff] }
 0x56a   : > { %2780 = vmatpush3.bf16.msra.mxu0 %v2777_v57  ;;  %v2797_v57 = vpack.c.bf16 %v1720_v55, %v1716_v54 }
 0x56b   : > { %2782 = vmatprep.subr.bf16.mxu0 %v2781_v59 }
 0x56e   : > { %2784 = vmatpush3.bf16.msra.mxu0 %v2781_v59  ;;  %v1722_v59 = vld [vmem:[#allocation8 + $0xb8] sm:$0xff] }
 0x56f   : > { %2786 = vmatprep.subr.bf16.mxu0 %v2785_v3 }
 0x572   : > { %2788 = vmatpush3.bf16.msra.mxu0 %v2785_v3 }
 0x573   : > { %2822 = vmatprep.subr.bf16.mxu0 %v2821_v40  ;;  %v1740_v40 = vld [vmem:[#allocation8 + $0x148] sm:$0xff] }
 0x574   : > { %v2809_v32 = vpack.c.bf16 %v1744_v41, %v1740_v40  ;;  %v2029_v40 = vld [vmem:[#allocation10 + $0x190] sm:$0xff]  ;;  %v2030_v41 = vld [vmem:[#allocation10 + $0x198] sm:$0xff] }
 0x5c2   : > { %v2596_v49 = vpop.f32.mrb[4].mxu0 }
 0x5c3   : > { %v1275_v50 = vpop.f32.mrb[5].mxu0 }
 0x61e   : > { %v2603_v60 = vpop.f32.mrb[10].mxu1 }
 0x61f   : > { %v1356_v61 = vpop.f32.mrb[11].mxu1 }
 0x620   : > { %v3046_v2 = vpack.i.bf16 %v2603_v60, %v1356_v61  ;;  %v1715_v60 = vld [vmem:[#allocation8 + $0x80] sm:$0xff]  ;;  %v2829_v61 = vpack.c.bf16 %v1722_v59, %v1718_v58  ;;  %v1749_v58 = vld [vmem:[#allocation8 + $0x190] sm:$0xff] }
 0x621   : > { %v2799_v3 = vpack.c.bf16 %v1719_v62, %v1715_v60  ;;  %v1753_v60 = vld [vmem:[#allocation8 + $0x1b0] sm:$0xff]  ;;  %v1760_v62 = vld [vmem:[#allocation8 + $0x1e8] sm:$0xff] }
 0x622   : > { %3047 = vrot.lane.b32.xlu1 %v3046_v2, %s3349_s14  ;;  %v1721_v2 = vld [vmem:[#allocation8 + $0xb0] sm:$0xff]  ;;  %s489_s14 = scalar_lea.vmem [#allocation11], %s2340_s17  ;;  %s2205_s17 = scalar_lea.sflag [#allocation4], %s3635_s21 }
 0x623   : > { %s2218_s26 = sshll.u32 %s489_s14, 4  ;;  %s3802_s26 = int_to_ptr.vmem [resolvable:$true] %s2218_s26 }
 0x624   : > { %s3259_s27 = scalar_lea.vmem %s3802_s26, 256  ;;  %p3266_p12 = scmp.lt.s32.totalorder %s3802_s26, %s3264_s29 }
 0x625   : > { %p3260_p3 = scmp.ne.s32.totalorder %s3802_s26, %s3259_s27 }
 0x627   : > { %p3261_p5 = pnand %p3260_p3, %p3580_p10 }
 0x628   : > { %v2610_v4 = vpop.f32.mrb[6].mxu0 }
 0x629   : > { %v1437_v5 = vpop.f32.mrb[7].mxu0  ;;  %p3262_p7 = pneg %p3261_p5 }
 0x62a   : > { %v3051_v7 = vpack.i.bf16 %v2610_v4, %v1437_v5  ;;  %v2831_v4 = vpack.c.bf16 %v1721_v2, %v1717_v63  ;;  %v2847_v63 = vpack.c.bf16 %v1753_v60, %v1749_v58  ;;  %v1984_v60 = vld [vmem:[#allocation10 + $0x28] sm:$0xff] }
 0x62b   : > { %v2617_v8 = vpop.f32.mrb[12].mxu1 }
 0x62c   : > { %3052 = vrot.lane.b32.xlu1 %v3051_v7, %s3348_s3  ;;  %v1518_v9 = vpop.f32.mrb[13].mxu1  ;;  %s3895_s3 = sld [smem:[#allocation20_spill]] }
 0x62d   : > { %v3056_v10 = vpack.i.bf16 %v2617_v8, %v1518_v9 }
 0x62f   : > { %3057 = vrot.lane.b32.xlu0 %v3056_v10, %s3347_s16 }
 0x694   : > { %v3048_v11 = vpop.permute.xlu1 %3047 }
 0x695   : > { %v3050_v12 = vunpack.i.h.bf16 %v3048_v11  ;;  %v3049_v13 = vunpack.i.l.bf16 %v3048_v11 }
 0x697   : > { %v1552_v17 = vsel %vm781_vm0, %v2596_v49, %v3050_v12  ;;  %v1551_v20 = vsel %vm781_vm0, %v1275_v50, %v3049_v13  ;;  %v1707_v49 = vld [vmem:[#allocation8 + $0x40] sm:$0xff] }
 0x698   : > { %v1711_v50 = vld [vmem:[#allocation8 + $0x60] sm:$0xff] }
 0x699   : > { %v2795_v52 = vpack.c.bf16 %v1711_v50, %v1707_v49  ;;  %v1748_v49 = vld [vmem:[#allocation8 + $0x188] sm:$0xff] }
 0x69a   : > { %v2813_v54 = vpack.c.bf16 %v1752_v51, %v1748_v49  ;;  %v2014_v49 = vld [vmem:[#allocation10 + $0x118] sm:$0xff] }
 0x69e   : > { %v3053_v47 = vpop.permute.xlu1 %3052 }
 0x69f   : > { %v3055_v14 = vunpack.i.h.bf16 %v3053_v47  ;;  %v3054_v15 = vunpack.i.l.bf16 %v3053_v47  ;;  %v1724_v47 = vld [vmem:[#allocation8 + $0xc8] sm:$0xff] }
 0x6a1   : > { %v3058_v16 = vpop.permute.xlu0 %3057  ;;  %v1554_v21 = vsel %vm1553_vm3, %v1551_v20, %v3054_v15  ;;  %v1555_v22 = vsel %vm1553_vm3, %v1552_v17, %v3055_v14  ;;  %v1728_v14 = vld [vmem:[#allocation8 + $0xe8] sm:$0xff]  ;;  %v1726_v15 = vld [vmem:[#allocation8 + $0xd8] sm:$0xff] }
 0x6a2   : > { %v3060_v18 = vunpack.i.h.bf16 %v3058_v16  ;;  %v3059_v19 = vunpack.i.l.bf16 %v3058_v16  ;;  %v2801_v16 = vpack.c.bf16 %v1728_v14, %v1724_v47  ;;  %v1730_v17 = vld [vmem:[#allocation8 + $0xf8] sm:$0xff]  ;;  %v1995_v14 = vld [vmem:[#allocation10 + $0x80] sm:$0xff] }
 0x6a3   : > { %v2833_v20 = vpack.c.bf16 %v1730_v17, %v1726_v15  ;;  %v1996_v15 = vld [vmem:[#allocation10 + $0x88] sm:$0xff] }
 0x6a4   : > { %v1557_v23 = vsel %vm1556_vm4, %v1554_v21, %v3059_v19  ;;  %v1558_v24 = vsel %vm1556_vm4, %v1555_v22, %v3060_v18  ;;  %v1723_v18 = vld [vmem:[#allocation8 + $0xc0] sm:$0xff]  ;;  %v1725_v22 = vld [vmem:[#allocation8 + $0xd0] sm:$0xff]  ;;  %v2853_v17 = vpack.c.bf16 %v1996_v15, %v1995_v14  ;;  %v2018_v14 = vld [vmem:[#allocation10 + $0x138] sm:$0xff] }
 0x6a5   : > { %2650 = vmatprep.mubr.f32.mxu0 %v1557_v23  ;;  %v1727_v19 = vld [vmem:[#allocation8 + $0xe0] sm:$0xff]  ;;  %v1729_v23 = vld [vmem:[#allocation8 + $0xf0] sm:$0xff] }
 0x6a6   : > { %2651 = vmatmul.mubr.f32.vlgmr.msra.gmra.mrb[8].mxu0 %v1558_v24  ;;  %v2803_v21 = vpack.c.bf16 %v1727_v19, %v1723_v18  ;;  %v2835_v24 = vpack.c.bf16 %v1729_v23, %v1725_v22  ;;  %v2028_v18 = vld [vmem:[#allocation10 + $0x188] sm:$0xff] }
 0x6a7   : > { %1926 = vmatprep.mubr.f32.mxu0 %v3346_v6  ;;  %2824 = vmatpush1.bf16.msra.mxu0 %v2823_v43  ;;  %v1739_v43 = vld [vmem:[#allocation8 + $0x140] sm:$0xff] }
 0x6a8   : > { %2826 = vmatprep.subr.bf16.mxu0 %v2825_v48  ;;  %v1745_v48 = vld [vmem:[#allocation8 + $0x170] sm:$0xff] }
 0x6ab   : > { %2828 = vmatpush1.bf16.msra.mxu0 %v2827_v56  ;;  %v1747_v56 = vld [vmem:[#allocation8 + $0x180] sm:$0xff] }
 0x6ac   : > { %2830 = vmatprep.subr.bf16.mxu0 %v2829_v61  ;;  %v1756_v61 = vld [vmem:[#allocation8 + $0x1c8] sm:$0xff] }
 0x6ad   : > { %v2817_v2 = vpack.c.bf16 %v1760_v62, %v1756_v61  ;;  %v2015_v61 = vld [vmem:[#allocation10 + $0x120] sm:$0xff]  ;;  %v2016_v62 = vld [vmem:[#allocation10 + $0x128] sm:$0xff] }
 0x6af   : > { %2832 = vmatpush1.bf16.msra.mxu0 %v2831_v4  ;;  %v1762_v4 = vld [vmem:[#allocation8 + $0x1f8] sm:$0xff] }
 0x6b0   : > { %2834 = vmatprep.subr.bf16.mxu0 %v2833_v20 }
 0x6b3   : > { %2836 = vmatpush1.bf16.msra.mxu0 %v2835_v24 }
 0x779   : > { %v2652_v26 = vpop.f32.mrb[8].mxu0 }
 0x77a   : > { %v1654_v27 = vadd.f32 %v2652_v26, %v2372_v25  ;;  %v1648_v29 = vpop.f32.mrb[9].mxu0  ;;  %v1736_v26 = vld [vmem:[#allocation8 + $0x128] sm:$0xff] }
 0x77b   : > { %v1649_v30 = vadd.f32 %v2372_v25, %v1648_v29  ;;  %v1732_v25 = vld [vmem:[#allocation8 + $0x108] sm:$0xff] }
 0x77c   : > { %v3765_v31 = vadd.f32 %v1654_v27, %v3656_v1  ;;  %v1708_v1 = vld [vmem:[#allocation8 + $0x48] sm:$0xff]  ;;  %v1734_v27 = vld [vmem:[#allocation8 + $0x118] sm:$0xff]  ;;  %v2805_v29 = vpack.c.bf16 %v1736_v26, %v1732_v25 }
 0x77d   : > { %v3768_v33 = vadd.f32 %v1649_v30, %v3653_v0  ;;  %v1712_v0 = vld [vmem:[#allocation8 + $0x68] sm:$0xff]  ;;  %v1738_v30 = vld [vmem:[#allocation8 + $0x138] sm:$0xff] }
 0x77e   : > { %1663 = vadd.xlane.f32.xlu0 %v3765_v31  ;;  %v2793_v46 = vpack.c.bf16 %v1712_v0, %v1708_v1  ;;  %v2837_v36 = vpack.c.bf16 %v1738_v30, %v1734_v27  ;;  %v1746_v1 = vld [vmem:[#allocation8 + $0x178] sm:$0xff]  ;;  %v1743_v0 = vld [vmem:[#allocation8 + $0x160] sm:$0xff] }
 0x77f   : > { %1661 = vadd.xlane.f32.xlu1 %v3768_v33  ;;  %v2841_v44 = vpack.c.bf16 %v1746_v1, %v1742_v42  ;;  %v2811_v45 = vpack.c.bf16 %v1743_v0, %v1739_v43  ;;  %v2373_v27 = vld [vmem:[%s3858_s6] ss:$0 sm:$0xff]  ;;  %v2855_v43 = vpack.c.bf16 %v1980_v35, %v1979_v34  ;;  %v2037_v34 = vld [vmem:[#allocation10 + $0x1d0] sm:$0xff] }
 0x780   : > { %2794 = vmatprep.subr.bf16.mxu1 %v2793_v46  ;;  %2838 = vmatprep.subr.bf16.mxu0 %v2837_v36  ;;  %v1741_v46 = vld [vmem:[#allocation8 + $0x150] sm:$0xff]  ;;  %v2011_v36 = vld [vmem:[#allocation10 + $0x100] sm:$0xff] }
 0x781   : > { %2796 = vmatpush1.bf16.msra.mxu1 %v2795_v52  ;;  %2840 = vmatpush1.bf16.msra.mxu0 %v2839_v28  ;;  %v2843_v50 = vpack.c.bf16 %v1745_v48, %v1741_v46  ;;  %v1750_v52 = vld [vmem:[#allocation8 + $0x198] sm:$0xff]  ;;  %v2889_v48 = vpack.c.bf16 %v2030_v41, %v2029_v40  ;;  %v2021_v40 = vld [vmem:[#allocation10 + $0x150] sm:$0xff] }
 0x782   : > { %2798 = vmatprep.subr.bf16.mxu1 %v2797_v57  ;;  %2842 = vmatprep.subr.bf16.mxu0 %v2841_v44  ;;  %v2845_v55 = vpack.c.bf16 %v1754_v53, %v1750_v52  ;;  %v1751_v57 = vld [vmem:[#allocation8 + $0x1a0] sm:$0xff]  ;;  %v1998_v28 = vld [vmem:[#allocation10 + $0x98] sm:$0xff]  ;;  %v1981_v44 = vld [vmem:[#allocation10 + $0x10] sm:$0xff] }
 0x783   : > { %v2815_v59 = vpack.c.bf16 %v1751_v57, %v1747_v56  ;;  %v2857_v46 = vpack.c.bf16 %v1998_v28, %v1997_v38  ;;  %v2000_v52 = vld [vmem:[#allocation10 + $0xa8] sm:$0xff]  ;;  %v2031_v53 = vld [vmem:[#allocation10 + $0x1a0] sm:$0xff]  ;;  %v1990_v38 = vld [vmem:[#allocation10 + $0x58] sm:$0xff] }
 0x784   : > { %v1983_v57 = vld [vmem:[#allocation10 + $0x20] sm:$0xff]  ;;  %v2022_v41 = vld [vmem:[#allocation10 + $0x158] sm:$0xff] }
 0x785   : > { %2800 = vmatpush1.bf16.msra.mxu1 %v2799_v3  ;;  %2844 = vmatpush1.bf16.msra.mxu0 %v2843_v50  ;;  %v1758_v3 = vld [vmem:[#allocation8 + $0x1d8] sm:$0xff]  ;;  %v1999_v50 = vld [vmem:[#allocation10 + $0xa0] sm:$0xff] }
 0x786   : > { %2802 = vmatprep.subr.bf16.mxu1 %v2801_v16  ;;  %2846 = vmatprep.subr.bf16.mxu0 %v2845_v55  ;;  %v2027_v16 = vld [vmem:[#allocation10 + $0x180] sm:$0xff]  ;;  %v2861_v58 = vpack.c.bf16 %v2000_v52, %v1999_v50  ;;  %v2024_v50 = vld [vmem:[#allocation10 + $0x168] sm:$0xff]  ;;  %v2009_v52 = vld [vmem:[#allocation10 + $0xf0] sm:$0xff] }
 0x787   : > { %v2885_v19 = vpack.c.bf16 %v2028_v18, %v2027_v16  ;;  %v2003_v16 = vld [vmem:[#allocation10 + $0xc0] sm:$0xff] }
 0x788   : > { %v2035_v18 = vld [vmem:[#allocation10 + $0x1c0] sm:$0xff] }
 0x789   : > { %2804 = vmatpush1.bf16.msra.mxu1 %v2803_v21  ;;  %2848 = vmatpush1.bf16.msra.mxu0 %v2847_v63  ;;  %v2863_v63 = vpack.c.bf16 %v1984_v60, %v1983_v57  ;;  %v1994_v57 = vld [vmem:[#allocation10 + $0x78] sm:$0xff]  ;;  %v2025_v60 = vld [vmem:[#allocation10 + $0x170] sm:$0xff] }
 0x78a   : > { %2806 = vmatprep.subr.bf16.mxu1 %v2805_v29  ;;  %v2374_v29 = vld [vmem:[%s3859_s7] ss:$0 sm:$0xff] }
 0x78d   : > { %2808 = vmatpush1.bf16.msra.mxu1 %v2807_v37  ;;  %v2012_v37 = vld [vmem:[#allocation10 + $0x108] sm:$0xff] }
 0x78e   : > { %2810 = vmatprep.subr.bf16.mxu1 %v2809_v32  ;;  %v2887_v0 = vpack.c.bf16 %v2012_v37, %v2011_v36  ;;  %v2038_v36 = vld [vmem:[#allocation10 + $0x1d8] sm:$0xff]  ;;  %v1989_v37 = vld [vmem:[#allocation10 + $0x50] sm:$0xff] }
 0x78f   : > { %v2875_v28 = vpack.c.bf16 %v1990_v38, %v1989_v37 }
 0x791   : > { %2812 = vmatpush1.bf16.msra.mxu1 %v2811_v45  ;;  %v1982_v45 = vld [vmem:[#allocation10 + $0x18] sm:$0xff] }
 0x792   : > { %2814 = vmatprep.subr.bf16.mxu1 %v2813_v54  ;;  %v2032_v54 = vld [vmem:[#allocation10 + $0x1a8] sm:$0xff]  ;;  %v2859_v55 = vpack.c.bf16 %v1982_v45, %v1981_v44  ;;  %v1991_v45 = vld [vmem:[#allocation10 + $0x60] sm:$0xff] }
 0x793   : > { %v2040_v44 = vld [vmem:[#allocation10 + $0x1e8] sm:$0xff] }
 0x795   : > { %2816 = vmatpush1.bf16.msra.mxu1 %v2815_v59  ;;  %v2893_v59 = vpack.c.bf16 %v2032_v54, %v2031_v53  ;;  %v2010_v53 = vld [vmem:[#allocation10 + $0xf8] sm:$0xff]  ;;  %v2041_v54 = vld [vmem:[#allocation10 + $0x1f0] sm:$0xff] }
 0x796   : > { %2818 = vmatprep.subr.bf16.mxu1 %v2817_v2  ;;  %v2895_v2 = vpack.c.bf16 %v2016_v62, %v2015_v61  ;;  %v2026_v61 = vld [vmem:[#allocation10 + $0x178] sm:$0xff] }
 0x797   : > { %v2915_v62 = vpack.c.bf16 %v2026_v61, %v2025_v60 }
 0x80b   : > { %v1664_v5 = vpop.xlane.xlu0 %1663 }
 0x80c   : > { %v1662_v7 = vpop.xlane.xlu1 %1661  ;;  %v1666_v8 = vmul.f32 0.0078125, %v1664_v5  ;;  %v1755_v5 = vld [vmem:[#allocation8 + $0x1c0] sm:$0xff] }
 0x80d   : > { %v1665_v9 = vmul.f32 0.0078125, %v1662_v7  ;;  %v2849_v7 = vpack.c.bf16 %v1762_v4, %v1758_v3  ;;  %v2002_v3 = vld [vmem:[#allocation10 + $0xb8] sm:$0xff]  ;;  %v2033_v4 = vld [vmem:[#allocation10 + $0x1b0] sm:$0xff] }
 0x80e   : > { %v3776_v11 = vsub.f32 %v3765_v31, %v1666_v8  ;;  %v1759_v8 = vld [vmem:[#allocation8 + $0x1e0] sm:$0xff] }
 0x80f   : > { %v3773_v10 = vsub.f32 %v3768_v33, %v1665_v9  ;;  %v1757_v9 = vld [vmem:[#allocation8 + $0x1d0] sm:$0xff]  ;;  %2850 = vmatprep.subr.bf16.mxu0 %v2849_v7  ;;  %v2034_v7 = vld [vmem:[#allocation10 + $0x1b8] sm:$0xff] }
 0x810   : > { %v1670_v13 = vmul.f32 %v3776_v11, %v3776_v11 }
 0x811   : > { %v1669_v12 = vmul.f32 %v3773_v10, %v3773_v10 }
 0x813   : > { %1671 = vadd.xlane.f32.xlu0 %v1669_v12  ;;  %v1761_v12 = vld [vmem:[#allocation8 + $0x1f0] sm:$0xff] }
 0x814   : > { %v2851_v47 = vpack.c.bf16 %v1761_v12, %v1757_v9  ;;  %v1986_v9 = vld [vmem:[#allocation10 + $0x38] sm:$0xff]  ;;  %v2897_v12 = vpack.c.bf16 %v2034_v7, %v2033_v4  ;;  %v1763_v4 = vld [vmem:[%s3894_s11] sm:$0xf]  ;;  %s3265_s11 = scalar_lea.vmem %s3264_s29, 512 }
 0x815   : > { %p3267_p2 = scmp.lt.s32.totalorder %s3265_s11, %s3259_s27 }
 0x816   : > { %2852 = vmatpush1.bf16.msra.mxu0 %v2851_v47  ;;  %v2017_v47 = vld [vmem:[#allocation10 + $0x130] sm:$0xff] }
 0x817   : > { %1673 = vadd.xlane.f32.xlu0 %v1670_v13  ;;  %v2819_v13 = vpack.c.bf16 %v1759_v8, %v1755_v5  ;;  %2886 = vmatprep.subr.bf16.mxu0 %v2885_v19  ;;  %v1985_v8 = vld [vmem:[#allocation10 + $0x30] sm:$0xff]  ;;  %v2899_v15 = vpack.c.bf16 %v2018_v14, %v2017_v47  ;;  %p3268_p1 = por %p3267_p2, %p3266_p12 }
 0x819   : > { %2820 = vmatpush1.bf16.msra.mxu1 %v2819_v13  ;;  %v2867_v13 = vpack.c.bf16 %v1986_v9, %v1985_v8  ;;  %p3269_p13 = pnand %p3268_p1, %p3262_p7 }
 0x81a   : > { %2854 = vmatprep.subr.bf16.mxu1 %v2853_v17  ;;  %v2004_v17 = vld [vmem:[#allocation10 + $0xc8] sm:$0xff] }
 0x81b   : > { %v2869_v19 = vpack.c.bf16 %v2004_v17, %v2003_v16 }
 0x8a0   : > { %v1672_v20 = vpop.xlane.xlu0 %1671 }
 0x8a1   : > { %v1675_v21 = vmul.f32 0.0078125, %v1672_v20  ;;  %v2036_v20 = vld [vmem:[#allocation10 + $0x1c8] sm:$0xff] }
 0x8a3   : > { %v1677_v22 = vadd.f32 1e-06, %v1675_v21  ;;  %v1987_v21 = vld [vmem:[#allocation10 + $0x40] sm:$0xff] }
 0x8a4   : > { %v1674_v23 = vpop.xlane.xlu0 %1673 }
 0x8a5   : > { %3097 = vrsqrt.f32 %v1677_v22  ;;  %v1676_v24 = vmul.f32 0.0078125, %v1674_v23  ;;  %v1988_v22 = vld [vmem:[#allocation10 + $0x48] sm:$0xff]  ;;  %v2901_v23 = vpack.c.bf16 %v2036_v20, %v2035_v18 }
 0x8a7   : > { %v1678_v25 = vadd.f32 1e-06, %v1676_v24  ;;  %v2871_v24 = vpack.c.bf16 %v1988_v22, %v1987_v21 }
 0x8a9   : > { %3099 = vrsqrt.f32 %v1678_v25  ;;  %v2019_v25 = vld [vmem:[#allocation10 + $0x140] sm:$0xff] }
 0x8af   : > { %v3098_v26 = vpop.eup %3097 }
 0x8b0   : > { %v1681_v30 = vmul.f32 %v3098_v26, %v3773_v10  ;;  %v2013_v10 = vld [vmem:[#allocation10 + $0x110] sm:$0xff]  ;;  %v2020_v26 = vld [vmem:[#allocation10 + $0x148] sm:$0xff] }
 0x8b1   : > { %v2891_v56 = vpack.c.bf16 %v2014_v49, %v2013_v10  ;;  %v2023_v49 = vld [vmem:[#allocation10 + $0x160] sm:$0xff] }
 0x8b2   : > { %v1689_v39 = vmul.f32 %v2373_v27, %v1681_v30  ;;  %v2006_v30 = vld [vmem:[#allocation10 + $0xd8] sm:$0xff] }
 0x8b3   : > { %v3100_v42 = vpop.eup %3099 }
 0x8b4   : > { %v1697_v32 = vadd.f32 %v2374_v29, %v1689_v39  ;;  %v1682_v1 = vmul.f32 %v3100_v42, %v3776_v11  ;;  %v2905_v39 = vpack.c.bf16 %v2038_v36, %v2037_v34  ;;  %v2907_v42 = vpack.c.bf16 %v2022_v41, %v2021_v40 }
 0x8b6   : > { %1850 = vmatmul.mubr.f32.vlgmr.msra.gmra.mrb[14].mxu1 %v1697_v32  ;;  %1927 = vmatmul.mubr.f32.vlgmr.msra.gmra.mrb[10].mxu0 %v1697_v32  ;;  %v1690_v51 = vmul.f32 %v2373_v27, %v1682_v1  ;;  %v2903_v27 = vpack.c.bf16 %v2020_v26, %v2019_v25  ;;  %v2007_v32 = vld [vmem:[#allocation10 + $0xe0] sm:$0xff]  ;;  %v2008_v1 = vld [vmem:[#allocation10 + $0xe8] sm:$0xff] }
 0x8b7   : > { %1855 = vmatprep.mubr.f32.mxu1 %v3346_v6  ;;  %1932 = vmatprep.mubr.f32.mxu0 %v3346_v6  ;;  %v2001_v6 = vld [vmem:[#allocation10 + $0xb0] sm:$0xff] }
 0x8b8   : > { %v1698_v11 = vadd.f32 %v2374_v29, %v1690_v51  ;;  %2856 = vmatpush3.bf16.msra.mxu1 %v2855_v43  ;;  %2888 = vmatpush3.bf16.msra.mxu0 %v2887_v0  ;;  %v2865_v5 = vpack.c.bf16 %v2002_v3, %v2001_v6  ;;  %v2005_v29 = vld [vmem:[#allocation10 + $0xd0] sm:$0xff]  ;;  %v2039_v43 = vld [vmem:[#allocation10 + $0x1e0] sm:$0xff]  ;;  %v2877_v0 = vpack.c.bf16 %v2008_v1, %v2007_v32 }
 0x8b9   : > { %2858 = vmatprep.subr.bf16.mxu1 %v2857_v46  ;;  %2890 = vmatprep.subr.bf16.mxu0 %v2889_v48  ;;  %v2873_v35 = vpack.c.bf16 %v2006_v30, %v2005_v29  ;;  %v1992_v46 = vld [vmem:[#allocation10 + $0x68] sm:$0xff]  ;;  %v2909_v48 = vpack.c.bf16 %v2040_v44, %v2039_v43  ;;  %v2911_v51 = vpack.c.bf16 %v2024_v50, %v2023_v49 }
 0x8ba   : > { %1856 = vmatmul.mubr.f32.gmra.mrb[16].mxu1 %v1698_v11  ;;  %1933 = vmatmul.mubr.f32.gmra.mrb[12].mxu0 %v1698_v11  ;;  %v2879_v10 = vpack.c.bf16 %v1992_v46, %v1991_v45  ;;  %v2881_v11 = vpack.c.bf16 %v2010_v53, %v2009_v52 }
 0x8bc   : > { %2860 = vmatpush3.bf16.msra.mxu1 %v2859_v55  ;;  %2892 = vmatpush3.bf16.msra.mxu0 %v2891_v56  ;;  %v2042_v55 = vld [vmem:[#allocation10 + $0x1f8] sm:$0xff]  ;;  %v1993_v56 = vld [vmem:[#allocation10 + $0x70] sm:$0xff] }
 0x8bd   : > { %2862 = vmatprep.subr.bf16.mxu1 %v2861_v58  ;;  %2894 = vmatprep.subr.bf16.mxu0 %v2893_v59  ;;  %v2913_v58 = vpack.c.bf16 %v2042_v55, %v2041_v54  ;;  %v2883_v59 = vpack.c.bf16 %v1994_v57, %v1993_v56 }
 0x8c0   : > { %2864 = vmatpush3.bf16.msra.mxu1 %v2863_v63  ;;  %2896 = vmatpush3.bf16.msra.mxu0 %v2895_v2  ;;  %v1765_v63 = vlaneseq }
 0x8c1   : > { %2866 = vmatprep.subr.bf16.mxu1 %v2865_v5  ;;  %2898 = vmatprep.subr.bf16.mxu0 %v2897_v12 }
 0x8c2   : > { %v1766_v2 = vshrl.u32 %v1765_v63, 7 }
 0x8c4   : > { %2868 = vmatpush3.bf16.msra.mxu1 %v2867_v13  ;;  %2900 = vmatpush3.bf16.msra.mxu0 %v2899_v15  ;;  %v1767_v6 = vsub.s32 0, %v1766_v2  ;;  %v1775_v3 = vsub.s32 2, %v1766_v2  ;;  %v1771_v5 = vsub.s32 1, %v1766_v2  ;;  %v1779_v7 = vsub.s32 3, %v1766_v2 }
 0x8c5   : > { %2870 = vmatprep.subr.bf16.mxu1 %v2869_v19  ;;  %2902 = vmatprep.subr.bf16.mxu0 %v2901_v23 }
 0x8c6   : > { %v1768_v8 = vrot.slane %v1763_v4, %v1767_v6  ;;  %v1776_v9 = vrot.slane %v1763_v4, %v1775_v3  ;;  %v1772_v12 = vrot.slane %v1763_v4, %v1771_v5  ;;  %v1780_v13 = vrot.slane %v1763_v4, %v1779_v7 }
 0x8c8   : > { %2872 = vmatpush3.bf16.msra.mxu1 %v2871_v24  ;;  %2904 = vmatpush3.bf16.msra.mxu0 %v2903_v27 }
 0x8c9   : > { %2874 = vmatprep.subr.bf16.mxu1 %v2873_v35  ;;  %2906 = vmatprep.subr.bf16.mxu0 %v2905_v39 }
 0x8cc   : > { %2876 = vmatpush3.bf16.msra.mxu1 %v2875_v28  ;;  %2908 = vmatpush3.bf16.msra.mxu0 %v2907_v42 }
 0x8cd   : > { %2878 = vmatprep.subr.bf16.mxu1 %v2877_v0  ;;  %2910 = vmatprep.subr.bf16.mxu0 %v2909_v48 }
 0x8d0   : > { %2880 = vmatpush3.bf16.msra.mxu1 %v2879_v10  ;;  %2912 = vmatpush3.bf16.msra.mxu0 %v2911_v51 }
 0x8d1   : > { %2882 = vmatprep.subr.bf16.mxu1 %v2881_v11  ;;  %2914 = vmatprep.subr.bf16.mxu0 %v2913_v58 }
 0x8d4   : > { %2884 = vmatpush3.bf16.msra.mxu1 %v2883_v59  ;;  %2916 = vmatpush3.bf16.msra.mxu0 %v2915_v62 }
 0x989   : > { %v1851_v47 = vpop.f32.mrb[14].mxu1  ;;  %v1928_v14 = vpop.f32.mrb[10].mxu0 }
 0x98a   : > { %v1852_v15 = vadd.f32 %v1851_v47, %v1768_v8  ;;  %v1929_v16 = vadd.f32 %v1928_v14, %v1776_v9  ;;  %v1853_v17 = vpop.f32.mrb[15].mxu1  ;;  %v1930_v18 = vpop.f32.mrb[11].mxu0 }
 0x98b   : > { %v1854_v19 = vadd.f32 %v1853_v17, %v1772_v12  ;;  %v1931_v20 = vadd.f32 %v1930_v18, %v1780_v13 }
 0x98c   : > { %v1947_v21 = vmul.f32 0.70710677, %v1852_v15  ;;  %v1949_v22 = vmul.f32 0.70710677, %v1929_v16  ;;  %v1939_v45 = vmul.f32 0.5, %v1852_v15  ;;  %v1941_v49 = vmul.f32 0.5, %v1929_v16 }
 0x98d   : > { %v1948_v23 = vmul.f32 0.70710677, %v1854_v19  ;;  %v1950_v24 = vmul.f32 0.70710677, %v1931_v20  ;;  %v1857_v25 = vpop.f32.mrb[16].mxu1  ;;  %v1934_v26 = vpop.f32.mrb[12].mxu0 }
 0x98e   : > { %3101 = verf.f32 %v1947_v21  ;;  %v1858_v27 = vadd.f32 %v1857_v25, %v1768_v8  ;;  %v1935_v29 = vadd.f32 %v1934_v26, %v1776_v9  ;;  %v1859_v30 = vpop.f32.mrb[17].mxu1  ;;  %v1936_v34 = vpop.f32.mrb[13].mxu0  ;;  %v1940_v0 = vmul.f32 0.5, %v1854_v19  ;;  %v2375_v8 = vld [vmem:[%s3895_s3] ss:$0 sm:$0xff] }
 0x98f   : > { %3103 = verf.f32 %v1949_v22  ;;  %v1860_v35 = vadd.f32 %v1859_v30, %v1772_v12  ;;  %v1937_v36 = vadd.f32 %v1936_v34, %v1780_v13  ;;  %v1942_v46 = vmul.f32 0.5, %v1931_v20 }
 0x990   : > { %3105 = verf.f32 %v1948_v23  ;;  %v1951_v37 = vmul.f32 0.70710677, %v1858_v27  ;;  %v1953_v38 = vmul.f32 0.70710677, %v1935_v29  ;;  %v1943_v60 = vmul.f32 0.5, %v1858_v27 }
 0x991   : > { %3107 = verf.f32 %v1950_v24  ;;  %v1952_v39 = vmul.f32 0.70710677, %v1860_v35  ;;  %v1954_v28 = vmul.f32 0.70710677, %v1937_v36  ;;  %v1944_v58 = vmul.f32 0.5, %v1860_v35 }
 0x992   : > { %3109 = verf.f32 %v1951_v37  ;;  %v1946_v61 = vmul.f32 0.5, %v1937_v36  ;;  %v1945_v63 = vmul.f32 0.5, %v1935_v29 }
 0x993   : > { %3111 = verf.f32 %v1953_v38 }
 0x994   : > { %3113 = verf.f32 %v1952_v39 }
 0x995   : > { %3115 = verf.f32 %v1954_v28 }
 0x998   : > { %v3102_v40 = vpop.eup %3101 }
 0x999   : > { %v3104_v41 = vpop.eup %3103  ;;  %v1963_v32 = vadd.f32 1.0, %v3102_v40 }
 0x99a   : > { %v3106_v42 = vpop.eup %3105  ;;  %v1965_v43 = vadd.f32 1.0, %v3104_v41 }
 0x99b   : > { %v3108_v1 = vpop.eup %3107  ;;  %v1964_v44 = vadd.f32 1.0, %v3106_v42  ;;  %v1971_v52 = vmul.f32 %v1963_v32, %v1939_v45 }
 0x99c   : > { %v1966_v48 = vadd.f32 1.0, %v3108_v1  ;;  %v3110_v10 = vpop.eup %3109  ;;  %v1973_v11 = vmul.f32 %v1965_v43, %v1941_v49 }
 0x99d   : > { %v1972_v50 = vmul.f32 %v1964_v44, %v1940_v0  ;;  %v3112_v51 = vpop.eup %3111  ;;  %v1967_v55 = vadd.f32 1.0, %v3110_v10 }
 0x99e   : > { %v1974_v53 = vmul.f32 %v1966_v48, %v1942_v46  ;;  %v3114_v54 = vpop.eup %3113  ;;  %v1969_v57 = vadd.f32 1.0, %v3112_v51 }
 0x99f   : > { %2114 = vmatprep.mubr.f32.mxu1 %v1972_v50  ;;  %v3116_v56 = vpop.eup %3115  ;;  %v1968_v59 = vadd.f32 1.0, %v3114_v54  ;;  %v1975_v3 = vmul.f32 %v1967_v55, %v1943_v60 }
 0x9a0   : > { %2189 = vmatprep.mubr.f32.mxu0 %v1974_v53  ;;  %2115 = vmatmul.mubr.f32.vlgmr.msra.gmra.mrb[18].mxu1 %v1971_v52  ;;  %v1970_v62 = vadd.f32 1.0, %v3116_v56  ;;  %v1977_v4 = vmul.f32 %v1969_v57, %v1945_v63 }
 0x9a1   : > { %2190 = vmatmul.mubr.f32.vlgmr.msra.gmra.mrb[14].mxu0 %v1973_v11  ;;  %v1976_v2 = vmul.f32 %v1968_v59, %v1944_v58 }
 0x9a2   : > { %v1978_v6 = vmul.f32 %v1970_v62, %v1946_v61 }
 0x9a3   : > { %2119 = vmatprep.mubr.f32.mxu1 %v1976_v2 }
 0x9a4   : > { %2194 = vmatprep.mubr.f32.mxu0 %v1978_v6  ;;  %2120 = vmatmul.mubr.f32.gmra.mrb[20].mxu1 %v1975_v3 }
 0x9a5   : > { %2195 = vmatmul.mubr.f32.gmra.mrb[16].mxu0 %v1977_v4 }
 0xa73   : > { %v2483_v5 = vpop.f32.mrb[18].mxu1 }
 0xa74   : > { %v2521_v7 = vpop.f32.mrb[14].mxu0  ;;  %v2484_v9 = vpop.f32.mrb[19].mxu1 }
 0xa75   : > { %v2485_v12 = vadd.f32 %v2484_v9, %v2483_v5  ;;  %v2522_v13 = vpop.f32.mrb[15].mxu0 }
 0xa76   : > { %v2523_v47 = vadd.f32 %v2522_v13, %v2521_v7 }
 0xa77   : > { %v2117_v14 = vadd.f32 %v2485_v12, %v2375_v8  ;;  %v2486_v15 = vpop.f32.mrb[20].mxu1 }
 0xa78   : > { %v2524_v17 = vpop.f32.mrb[16].mxu0  ;;  %v2487_v18 = vpop.f32.mrb[21].mxu1 }
 0xa79   : > { %v2192_v16 = vadd.f32 %v2523_v47, %v2117_v14  ;;  %v2488_v19 = vadd.f32 %v2487_v18, %v2486_v15  ;;  %v2525_v20 = vpop.f32.mrb[17].mxu0 }
 0xa7a   : > { %v2526_v22 = vadd.f32 %v2525_v20, %v2524_v17 }
 0xa7b   : > { %v2200_v21 = vadd.f32 %v2192_v16, %v3768_v33  ;;  %v2122_v23 = vadd.f32 %v2488_v19, %v2375_v8 }
 0xa7d   : > { %2202 = vst [vmem:[%s489_s14] sm:$0xff] %v2200_v21  ;;  %v2197_v24 = vadd.f32 %v2526_v22, %v2122_v23 }
 0xa7f   : > { %v2201_v33 = vadd.f32 %v2197_v24, %v3765_v31 }
 0xa81   : > { %2203 = vst [vmem:[%s489_s14 + $0x8] sm:$0xff] %v2201_v33 }
 0xa82   : > { %3272 = shalt.err (!%p3269_p13)
}
 0xa83   : > { %s3273_s9 = scalar_lea.hbm %s3807_s12, 256  ;;  %s3277_s14 = scalar_lea.hbm %s3896_s28, 512 }
 0xa84   : > { %p3274_p9 = scmp.ne.s32.totalorder %s3807_s12, %s3273_s9  ;;  %p3278_p4 = scmp.lt.u32.totalorder %s3807_s12, %s3896_s28 }
 0xa85   : > { %p3279_p8 = scmp.lt.u32.totalorder %s3277_s14, %s3273_s9  ;;  %p3281_p3 = scmp.lt.u32.totalorder %s3273_s9, %s3807_s12 }
 0xa86   : > { %p3275_p0 = pnand %p3274_p9, %p3580_p10 }
 0xa87   : > { %p3280_p6 = por %p3279_p8, %p3278_p4 }
 0xa88   : > { %p3276_p11 = pneg %p3275_p0 }
 0xa89   : > { %p3282_p5 = por %p3281_p3, %p3280_p6 }
 0xa8b   : > { %p3283_p7 = pnand %p3282_p5, %p3276_p11 }
 0xa8d   : > { %3286 = shalt.err (!%p3283_p7)
}
 0xa8e   : > { %s3351_s13 = smov 128   ;;  %s3352_s27 = smov 8  }
 0xa8f   : > { %2935 = dma.vmem_to_hbm [thread:$0]  (%p3580_p10), %s3802_s26, 256, %s3807_s12, %s2205_s17, %s3351_s13, %s3351_s13, %s3352_s27  }
 0xa90 PF: > { %s3897_s25 = sld [smem:[#allocation16_spill]]  ;;  %s3898_s29 = sld [smem:[#allocation17_spill]] }
 0xa91   : > { %p3900_p2 = scmp.ge.s32.totalorder %s3333_s24, 2 }
 0xa96   : > { %s2233_s11 = sand.u32 1, %s3897_s25   ;;  %p3899_p12 = scmp.ne.s32.totalorder %s3898_s29, 0 }
 0xa97   : > { %s2234_s9 = scalar_lea.sflag [#allocation4], %s2233_s11 }
 0xa98   : > { %p2955_p1 = pnand %p3900_p2, %p3899_p12 }
 0xa9a   : > { %3316 = dma.done.wait (!%p2955_p1), %s2234_s9, 256  }
 0xa9b   : > { %3318 = vsyncadd (!%p2955_p1), %s2234_s9, 4294967040  ;;  %p27_p13 = scmp.ge.s32.totalorder %s3570_s30, 4   ;;  %s3901_s21 = smov %s3325_s22 }
 0xa9c   : > { %s3902_s22 = smov %s3329_s23  ;;  %s3903_s23 = smov %s3586_s20 }
 0xa9d   : > { %s3904_s24 = smov %s3570_s30  ;;  %29 = sbr.rel (!%p27_p13) target bundleno = 12 (0xc), region = 129 }
 0xaa4   :  { %2239 = vsyncpa [#allocation3], 1 }
 0xaa5   :  { %2241 = vsyncpa [#allocation3 + $0x1], 1 }
 0xaa6   :  { %2242 = vsyncpa [#allocation6], 1 }
 0xaa7   :  { %2243 = vsyncpa [#allocation9], 1 }
 0xaa8   :  { %2244 = vsyncpa [#allocation4], 1 }
 0xaa9   :  { %2246 = vsyncpa [#allocation4 + $0x1], 1 }

</bundles_post_ra>
